<compile_context>
chip_gen: v7x
topology: tpu7x:2x2x1
jax: 0.10.0
libtpu: 0.0.40
codegen_flags: <defaults>
</compile_context>

<pallas_src>
import math

import jax
import jax.numpy as jnp
from jax.experimental import pallas as pl
from jax.experimental.pallas import tpu as pltpu


def _make_gather_kernel(rows_per_step: int, n_inner: int, scale: float):
    """Kernel body factory.

    Refs (in order): ids (SMEM scalar prefetch), emb (HBM / ANY), out (VMEM),
    buf (VMEM scratch, 2 slots of rows_per_step rows), sem (2 DMA semaphores).
    """

    def kernel(ids_ref, emb_ref, out_ref, buf_ref, sem_ref):
        o = pl.program_id(0)          # outer ("parallel") chunk
        it = pl.program_id(1)         # inner ("arbitrary") step within chunk
        step = o * n_inner + it       # global token-block index

        def fetch(step_idx, slot):
            # Issue one row DMA per token of block `step_idx` into slot `slot`.
            base = step_idx * rows_per_step
            dst_base = slot * rows_per_step
            for r in range(rows_per_step):                  # static unroll
                tok = ids_ref[base + r]
                pltpu.make_async_copy(
                    emb_ref.at[pl.ds(tok, 1), :],           # (1, D) HBM row
                    buf_ref.at[pl.ds(dst_base + r, 1), :],  # (1, D) VMEM row
                    sem_ref.at[slot],
                ).start()

        # Prime the pipeline at the start of each outer chunk (runs once per
        # chunk on whichever core owns it -> megacore-safe).
        @pl.when(it == 0)
        def _():
            fetch(step, step % 2)

        # Prefetch the next block's rows into the other slot before waiting on
        # the current one, so gather latency overlaps the scale + store below.
        @pl.when(it + 1 < n_inner)
        def _():
            fetch(step + 1, (step + 1) % 2)

        # Wait for every row of the current slot.  DMA semaphores count bytes,
        # so one wait sized to the whole slot covers all rows_per_step copies.
        slot = step % 2
        slot_base = pl.multiple_of(slot * rows_per_step, rows_per_step)
        pltpu.make_async_copy(
            emb_ref.at[pl.ds(0, rows_per_step), :],         # dummy src (size only)
            buf_ref.at[pl.ds(slot_base, rows_per_step), :],
            sem_ref.at[slot],
        ).wait()

        rows = buf_ref[pl.ds(slot_base, rows_per_step), :]
        out_ref[...] = (rows.astype(jnp.float32)
                        * jnp.float32(scale)).astype(out_ref.dtype)

    return kernel


def input_embedding(x_ids: jax.Array, emb_table: jax.Array, *,
                    rows_per_step: int = 64, outer_chunks: int = 2) -> jax.Array:
    """Pallas equivalent of InputEmbedding.forward: embedding(x) * sqrt(d_model).

    x_ids:     (B, S) integer token ids.
    emb_table: (V, D) embedding weights (f32 or bf16).
    Returns    (B, S, D) in emb_table's dtype.
    """
    B, S = x_ids.shape
    V, D = emb_table.shape
    if D % 128 != 0:
        raise ValueError("d_model must be a multiple of 128 (lane-dense stores)")
    if rows_per_step % 8 != 0:
        raise ValueError("rows_per_step must be a multiple of 8")
    if V < rows_per_step:
        raise ValueError("vocab_size must be >= rows_per_step")
    scale = math.sqrt(D)

    # Flatten, clamp (protect the gather DMA from out-of-range ids) and pad so
    # the token count divides evenly into outer_chunks * rows_per_step.
    n_tok = B * S
    ids = jnp.clip(x_ids.reshape(n_tok).astype(jnp.int32), 0, V - 1)
    group = rows_per_step * outer_chunks
    n_total = ((n_tok + group - 1) // group) * group
    if n_total != n_tok:
        # Padded tokens gather row 0 and are sliced off below.
        ids = jnp.concatenate(
            [ids, jnp.zeros((n_total - n_tok,), jnp.int32)], axis=0)
    n_steps = n_total // rows_per_step
    n_inner = n_steps // outer_chunks

    grid_spec = pltpu.PrefetchScalarGridSpec(
        num_scalar_prefetch=1,                             # ids -> SMEM
        grid=(outer_chunks, n_inner),
        in_specs=[pl.BlockSpec(memory_space=pl.ANY)],      # table stays in HBM
        out_specs=pl.BlockSpec(
            (rows_per_step, D),
            lambda o, it, ids_ref: (o * n_inner + it, 0)),
        scratch_shapes=[
            pltpu.VMEM((2 * rows_per_step, D), emb_table.dtype),  # 2 gather slots
            pltpu.SemaphoreType.DMA((2,)),                        # 1 sem / slot
        ],
    )

    itemsize = jnp.dtype(emb_table.dtype).itemsize
    out = pl.pallas_call(
        _make_gather_kernel(rows_per_step, n_inner, scale),
        out_shape=jax.ShapeDtypeStruct((n_total, D), emb_table.dtype),
        grid_spec=grid_spec,
        compiler_params=pltpu.CompilerParams(
            dimension_semantics=("parallel", "arbitrary")),
        cost_estimate=pl.CostEstimate(
            flops=n_total * D,
            transcendentals=0,
            bytes_accessed=n_total * D * itemsize * 2 + n_total * 4),
    )(ids, emb_table)

    return out[:n_tok].reshape(B, S, D)


if __name__ == "__main__":
    d_model, vocab_size = 128, 512
    key = jax.random.PRNGKey(0)
    k_emb, k1, k2 = jax.random.split(key, 3)

    # nn.Embedding default init ~ N(0, 1).
    emb_table = jax.random.normal(k_emb, (vocab_size, d_model), dtype=jnp.float32)
    scale = jnp.float32(math.sqrt(d_model))

    # Case 1: tiny (B=2, S=8) -> exercises the padding path (n_inner == 1).
    x_small = jax.random.randint(k1, (2, 8), 0, vocab_size, dtype=jnp.int32)
    out_small = jax.block_until_ready(input_embedding(x_small, emb_table))
    ref_small = emb_table[x_small] * scale
    assert out_small.shape == (2, 8, d_model)
    assert jnp.allclose(out_small, ref_small, atol=1e-6, rtol=1e-6)

    # Case 2: (B=2, S=128) -> multiple inner steps, exercises the
    # double-buffered cross-step prefetch path with no padding.
    x_big = jax.random.randint(k2, (2, 128), 0, vocab_size, dtype=jnp.int32)
    out_big = jax.block_until_ready(input_embedding(x_big, emb_table))
    ref_big = emb_table[x_big] * scale
    assert out_big.shape == (2, 128, d_model)
    assert jnp.allclose(out_big, ref_big, atol=1e-6, rtol=1e-6)

    print("KERNEL_OK")
</pallas_src>

<mosaic_0001>
module attributes {stable_mosaic.version = 11 : i64} {
  func.func @kernel(%arg0: i32, %arg1: i32, %arg2: memref<128xi32, #tpu.memory_space<smem>>, %arg3: memref<512x128xf32, #tpu.memory_space<any>>, %arg4: memref<64x128xf32, #tpu.memory_space<vmem>>, %arg5: memref<128x128xf32, #tpu.memory_space<vmem>>, %arg6: memref<2x!tpu.dma_semaphore, #tpu.memory_space<semaphore_mem>>) attributes {dimension_semantics = [#tpu.dimension_semantics<parallel>, #tpu.dimension_semantics<arbitrary>], iteration_bounds = array<i64: 2, 1>, scalar_prefetch = 1 : i64, scratch_operands = 2 : i64, tpu.core_type = #tpu.core_type<tc>, window_params = [{}, {transform_indices = @transform_1, window_bounds = array<i64: 64, 128>}]} {
    %c1_i32 = arith.constant 1 : i32
    %0 = arith.muli %arg0, %c1_i32 : i32
    %1 = arith.addi %0, %arg1 : i32
    %c0_i32 = arith.constant 0 : i32
    %2 = arith.cmpi eq, %arg1, %c0_i32 : i32
    %3 = arith.extui %2 : i1 to i32
    %c0_i32_0 = arith.constant 0 : i32
    %4 = arith.cmpi ne, %3, %c0_i32_0 : i32
    scf.if %4 {
      %c2_i32_14 = arith.constant 2 : i32
      %c0_i32_15 = arith.constant 0 : i32
      %30 = arith.cmpi eq, %c2_i32_14, %c0_i32_15 : i32
      %c1_i32_16 = arith.constant 1 : i32
      %31 = arith.select %30, %c1_i32_16, %c2_i32_14 : i32
      %32 = arith.remsi %1, %31 : i32
      %c0_i32_17 = arith.constant 0 : i32
      %33 = arith.cmpi ne, %32, %c0_i32_17 : i32
      %c0_i32_18 = arith.constant 0 : i32
      %34 = arith.cmpi slt, %32, %c0_i32_18 : i32
      %c0_i32_19 = arith.constant 0 : i32
      %35 = arith.cmpi slt, %31, %c0_i32_19 : i32
      %36 = arith.xori %34, %35 : i1
      %37 = arith.andi %36, %33 : i1
      %38 = arith.addi %32, %31 : i32
      %39 = arith.select %37, %38, %32 : i32
      %c64_i32_20 = arith.constant 64 : i32
      %40 = arith.muli %1, %c64_i32_20 : i32
      %c64_i32_21 = arith.constant 64 : i32
      %41 = arith.muli %39, %c64_i32_21 : i32
      %c0_i32_22 = arith.constant 0 : i32
      %42 = arith.addi %40, %c0_i32_22 : i32
      %43 = arith.index_cast %42 : i32 to index
      %44 = memref.load %arg2[%43] : memref<128xi32, #tpu.memory_space<smem>>
      %c0_i32_23 = arith.constant 0 : i32
      %45 = arith.addi %41, %c0_i32_23 : i32
      %c0_i32_24 = arith.constant 0 : i32
      %46 = tpu.memref_slice %arg3[%44, %c0_i32_24] : memref<512x128xf32, #tpu.memory_space<any>> -> memref<1x128xf32, #tpu.memory_space<any>>
      %c0_i32_25 = arith.constant 0 : i32
      %47 = tpu.memref_slice %arg5[%45, %c0_i32_25] : memref<128x128xf32, #tpu.memory_space<vmem>> -> memref<1x128xf32, #tpu.memory_space<vmem>>
      %48 = tpu.memref_slice %arg6[%39] : memref<2x!tpu.dma_semaphore, #tpu.memory_space<semaphore_mem>> -> memref<1x!tpu.dma_semaphore, #tpu.memory_space<semaphore_mem>>
      %49 = tpu.memref_squeeze %48 : memref<1x!tpu.dma_semaphore, #tpu.memory_space<semaphore_mem>> -> memref<!tpu.dma_semaphore, #tpu.memory_space<semaphore_mem>>
      tpu.enqueue_dma source(%46 : memref<1x128xf32, #tpu.memory_space<any>>) target(%47 : memref<1x128xf32, #tpu.memory_space<vmem>>) target_semaphore(%49 : memref<!tpu.dma_semaphore, #tpu.memory_space<semaphore_mem>>)
      %c1_i32_26 = arith.constant 1 : i32
      %50 = arith.addi %40, %c1_i32_26 : i32
      %51 = arith.index_cast %50 : i32 to index
      %52 = memref.load %arg2[%51] : memref<128xi32, #tpu.memory_space<smem>>
      %c1_i32_27 = arith.constant 1 : i32
      %53 = arith.addi %41, %c1_i32_27 : i32
      %c0_i32_28 = arith.constant 0 : i32
      %54 = tpu.memref_slice %arg3[%52, %c0_i32_28] : memref<512x128xf32, #tpu.memory_space<any>> -> memref<1x128xf32, #tpu.memory_space<any>>
      %c0_i32_29 = arith.constant 0 : i32
      %55 = tpu.memref_slice %arg5[%53, %c0_i32_29] : memref<128x128xf32, #tpu.memory_space<vmem>> -> memref<1x128xf32, #tpu.memory_space<vmem>>
      %56 = tpu.memref_slice %arg6[%39] : memref<2x!tpu.dma_semaphore, #tpu.memory_space<semaphore_mem>> -> memref<1x!tpu.dma_semaphore, #tpu.memory_space<semaphore_mem>>
      %57 = tpu.memref_squeeze %56 : memref<1x!tpu.dma_semaphore, #tpu.memory_space<semaphore_mem>> -> memref<!tpu.dma_semaphore, #tpu.memory_space<semaphore_mem>>
      tpu.enqueue_dma source(%54 : memref<1x128xf32, #tpu.memory_space<any>>) target(%55 : memref<1x128xf32, #tpu.memory_space<vmem>>) target_semaphore(%57 : memref<!tpu.dma_semaphore, #tpu.memory_space<semaphore_mem>>)
      %c2_i32_30 = arith.constant 2 : i32
      %58 = arith.addi %40, %c2_i32_30 : i32
      %59 = arith.index_cast %58 : i32 to index
      %60 = memref.load %arg2[%59] : memref<128xi32, #tpu.memory_space<smem>>
      %c2_i32_31 = arith.constant 2 : i32
      %61 = arith.addi %41, %c2_i32_31 : i32
      %c0_i32_32 = arith.constant 0 : i32
      %62 = tpu.memref_slice %arg3[%60, %c0_i32_32] : memref<512x128xf32, #tpu.memory_space<any>> -> memref<1x128xf32, #tpu.memory_space<any>>
      %c0_i32_33 = arith.constant 0 : i32
      %63 = tpu.memref_slice %arg5[%61, %c0_i32_33] : memref<128x128xf32, #tpu.memory_space<vmem>> -> memref<1x128xf32, #tpu.memory_space<vmem>>
      %64 = tpu.memref_slice %arg6[%39] : memref<2x!tpu.dma_semaphore, #tpu.memory_space<semaphore_mem>> -> memref<1x!tpu.dma_semaphore, #tpu.memory_space<semaphore_mem>>
      %65 = tpu.memref_squeeze %64 : memref<1x!tpu.dma_semaphore, #tpu.memory_space<semaphore_mem>> -> memref<!tpu.dma_semaphore, #tpu.memory_space<semaphore_mem>>
      tpu.enqueue_dma source(%62 : memref<1x128xf32, #tpu.memory_space<any>>) target(%63 : memref<1x128xf32, #tpu.memory_space<vmem>>) target_semaphore(%65 : memref<!tpu.dma_semaphore, #tpu.memory_space<semaphore_mem>>)
      %c3_i32 = arith.constant 3 : i32
      %66 = arith.addi %40, %c3_i32 : i32
      %67 = arith.index_cast %66 : i32 to index
      %68 = memref.load %arg2[%67] : memref<128xi32, #tpu.memory_space<smem>>
      %c3_i32_34 = arith.constant 3 : i32
      %69 = arith.addi %41, %c3_i32_34 : i32
      %c0_i32_35 = arith.constant 0 : i32
      %70 = tpu.memref_slice %arg3[%68, %c0_i32_35] : memref<512x128xf32, #tpu.memory_space<any>> -> memref<1x128xf32, #tpu.memory_space<any>>
      %c0_i32_36 = arith.constant 0 : i32
      %71 = tpu.memref_slice %arg5[%69, %c0_i32_36] : memref<128x128xf32, #tpu.memory_space<vmem>> -> memref<1x128xf32, #tpu.memory_space<vmem>>
      %72 = tpu.memref_slice %arg6[%39] : memref<2x!tpu.dma_semaphore, #tpu.memory_space<semaphore_mem>> -> memref<1x!tpu.dma_semaphore, #tpu.memory_space<semaphore_mem>>
      %73 = tpu.memref_squeeze %72 : memref<1x!tpu.dma_semaphore, #tpu.memory_space<semaphore_mem>> -> memref<!tpu.dma_semaphore, #tpu.memory_space<semaphore_mem>>
      tpu.enqueue_dma source(%70 : memref<1x128xf32, #tpu.memory_space<any>>) target(%71 : memref<1x128xf32, #tpu.memory_space<vmem>>) target_semaphore(%73 : memref<!tpu.dma_semaphore, #tpu.memory_space<semaphore_mem>>)
      %c4_i32 = arith.constant 4 : i32
      %74 = arith.addi %40, %c4_i32 : i32
      %75 = arith.index_cast %74 : i32 to index
      %76 = memref.load %arg2[%75] : memref<128xi32, #tpu.memory_space<smem>>
      %c4_i32_37 = arith.constant 4 : i32
      %77 = arith.addi %41, %c4_i32_37 : i32
      %c0_i32_38 = arith.constant 0 : i32
      %78 = tpu.memref_slice %arg3[%76, %c0_i32_38] : memref<512x128xf32, #tpu.memory_space<any>> -> memref<1x128xf32, #tpu.memory_space<any>>
      %c0_i32_39 = arith.constant 0 : i32
      %79 = tpu.memref_slice %arg5[%77, %c0_i32_39] : memref<128x128xf32, #tpu.memory_space<vmem>> -> memref<1x128xf32, #tpu.memory_space<vmem>>
      %80 = tpu.memref_slice %arg6[%39] : memref<2x!tpu.dma_semaphore, #tpu.memory_space<semaphore_mem>> -> memref<1x!tpu.dma_semaphore, #tpu.memory_space<semaphore_mem>>
      %81 = tpu.memref_squeeze %80 : memref<1x!tpu.dma_semaphore, #tpu.memory_space<semaphore_mem>> -> memref<!tpu.dma_semaphore, #tpu.memory_space<semaphore_mem>>
      tpu.enqueue_dma source(%78 : memref<1x128xf32, #tpu.memory_space<any>>) target(%79 : memref<1x128xf32, #tpu.memory_space<vmem>>) target_semaphore(%81 : memref<!tpu.dma_semaphore, #tpu.memory_space<semaphore_mem>>)
      %c5_i32 = arith.constant 5 : i32
      %82 = arith.addi %40, %c5_i32 : i32
      %83 = arith.index_cast %82 : i32 to index
      %84 = memref.load %arg2[%83] : memref<128xi32, #tpu.memory_space<smem>>
      %c5_i32_40 = arith.constant 5 : i32
      %85 = arith.addi %41, %c5_i32_40 : i32
      %c0_i32_41 = arith.constant 0 : i32
      %86 = tpu.memref_slice %arg3[%84, %c0_i32_41] : memref<512x128xf32, #tpu.memory_space<any>> -> memref<1x128xf32, #tpu.memory_space<any>>
      %c0_i32_42 = arith.constant 0 : i32
      %87 = tpu.memref_slice %arg5[%85, %c0_i32_42] : memref<128x128xf32, #tpu.memory_space<vmem>> -> memref<1x128xf32, #tpu.memory_space<vmem>>
      %88 = tpu.memref_slice %arg6[%39] : memref<2x!tpu.dma_semaphore, #tpu.memory_space<semaphore_mem>> -> memref<1x!tpu.dma_semaphore, #tpu.memory_space<semaphore_mem>>
      %89 = tpu.memref_squeeze %88 : memref<1x!tpu.dma_semaphore, #tpu.memory_space<semaphore_mem>> -> memref<!tpu.dma_semaphore, #tpu.memory_space<semaphore_mem>>
      tpu.enqueue_dma source(%86 : memref<1x128xf32, #tpu.memory_space<any>>) target(%87 : memref<1x128xf32, #tpu.memory_space<vmem>>) target_semaphore(%89 : memref<!tpu.dma_semaphore, #tpu.memory_space<semaphore_mem>>)
      %c6_i32 = arith.constant 6 : i32
      %90 = arith.addi %40, %c6_i32 : i32
      %91 = arith.index_cast %90 : i32 to index
      %92 = memref.load %arg2[%91] : memref<128xi32, #tpu.memory_space<smem>>
      %c6_i32_43 = arith.constant 6 : i32
      %93 = arith.addi %41, %c6_i32_43 : i32
      %c0_i32_44 = arith.constant 0 : i32
      %94 = tpu.memref_slice %arg3[%92, %c0_i32_44] : memref<512x128xf32, #tpu.memory_space<any>> -> memref<1x128xf32, #tpu.memory_space<any>>
      %c0_i32_45 = arith.constant 0 : i32
      %95 = tpu.memref_slice %arg5[%93, %c0_i32_45] : memref<128x128xf32, #tpu.memory_space<vmem>> -> memref<1x128xf32, #tpu.memory_space<vmem>>
      %96 = tpu.memref_slice %arg6[%39] : memref<2x!tpu.dma_semaphore, #tpu.memory_space<semaphore_mem>> -> memref<1x!tpu.dma_semaphore, #tpu.memory_space<semaphore_mem>>
      %97 = tpu.memref_squeeze %96 : memref<1x!tpu.dma_semaphore, #tpu.memory_space<semaphore_mem>> -> memref<!tpu.dma_semaphore, #tpu.memory_space<semaphore_mem>>
      tpu.enqueue_dma source(%94 : memref<1x128xf32, #tpu.memory_space<any>>) target(%95 : memref<1x128xf32, #tpu.memory_space<vmem>>) target_semaphore(%97 : memref<!tpu.dma_semaphore, #tpu.memory_space<semaphore_mem>>)
      %c7_i32 = arith.constant 7 : i32
      %98 = arith.addi %40, %c7_i32 : i32
      %99 = arith.index_cast %98 : i32 to index
      %100 = memref.load %arg2[%99] : memref<128xi32, #tpu.memory_space<smem>>
      %c7_i32_46 = arith.constant 7 : i32
      %101 = arith.addi %41, %c7_i32_46 : i32
      %c0_i32_47 = arith.constant 0 : i32
      %102 = tpu.memref_slice %arg3[%100, %c0_i32_47] : memref<512x128xf32, #tpu.memory_space<any>> -> memref<1x128xf32, #tpu.memory_space<any>>
      %c0_i32_48 = arith.constant 0 : i32
      %103 = tpu.memref_slice %arg5[%101, %c0_i32_48] : memref<128x128xf32, #tpu.memory_space<vmem>> -> memref<1x128xf32, #tpu.memory_space<vmem>>
      %104 = tpu.memref_slice %arg6[%39] : memref<2x!tpu.dma_semaphore, #tpu.memory_space<semaphore_mem>> -> memref<1x!tpu.dma_semaphore, #tpu.memory_space<semaphore_mem>>
      %105 = tpu.memref_squeeze %104 : memref<1x!tpu.dma_semaphore, #tpu.memory_space<semaphore_mem>> -> memref<!tpu.dma_semaphore, #tpu.memory_space<semaphore_mem>>
      tpu.enqueue_dma source(%102 : memref<1x128xf32, #tpu.memory_space<any>>) target(%103 : memref<1x128xf32, #tpu.memory_space<vmem>>) target_semaphore(%105 : memref<!tpu.dma_semaphore, #tpu.memory_space<semaphore_mem>>)
      %c8_i32 = arith.constant 8 : i32
      %106 = arith.addi %40, %c8_i32 : i32
      %107 = arith.index_cast %106 : i32 to index
      %108 = memref.load %arg2[%107] : memref<128xi32, #tpu.memory_space<smem>>
      %c8_i32_49 = arith.constant 8 : i32
      %109 = arith.addi %41, %c8_i32_49 : i32
      %c0_i32_50 = arith.constant 0 : i32
      %110 = tpu.memref_slice %arg3[%108, %c0_i32_50] : memref<512x128xf32, #tpu.memory_space<any>> -> memref<1x128xf32, #tpu.memory_space<any>>
      %c0_i32_51 = arith.constant 0 : i32
      %111 = tpu.memref_slice %arg5[%109, %c0_i32_51] : memref<128x128xf32, #tpu.memory_space<vmem>> -> memref<1x128xf32, #tpu.memory_space<vmem>>
      %112 = tpu.memref_slice %arg6[%39] : memref<2x!tpu.dma_semaphore, #tpu.memory_space<semaphore_mem>> -> memref<1x!tpu.dma_semaphore, #tpu.memory_space<semaphore_mem>>
      %113 = tpu.memref_squeeze %112 : memref<1x!tpu.dma_semaphore, #tpu.memory_space<semaphore_mem>> -> memref<!tpu.dma_semaphore, #tpu.memory_space<semaphore_mem>>
      tpu.enqueue_dma source(%110 : memref<1x128xf32, #tpu.memory_space<any>>) target(%111 : memref<1x128xf32, #tpu.memory_space<vmem>>) target_semaphore(%113 : memref<!tpu.dma_semaphore, #tpu.memory_space<semaphore_mem>>)
      %c9_i32 = arith.constant 9 : i32
      %114 = arith.addi %40, %c9_i32 : i32
      %115 = arith.index_cast %114 : i32 to index
      %116 = memref.load %arg2[%115] : memref<128xi32, #tpu.memory_space<smem>>
      %c9_i32_52 = arith.constant 9 : i32
      %117 = arith.addi %41, %c9_i32_52 : i32
      %c0_i32_53 = arith.constant 0 : i32
      %118 = tpu.memref_slice %arg3[%116, %c0_i32_53] : memref<512x128xf32, #tpu.memory_space<any>> -> memref<1x128xf32, #tpu.memory_space<any>>
      %c0_i32_54 = arith.constant 0 : i32
      %119 = tpu.memref_slice %arg5[%117, %c0_i32_54] : memref<128x128xf32, #tpu.memory_space<vmem>> -> memref<1x128xf32, #tpu.memory_space<vmem>>
      %120 = tpu.memref_slice %arg6[%39] : memref<2x!tpu.dma_semaphore, #tpu.memory_space<semaphore_mem>> -> memref<1x!tpu.dma_semaphore, #tpu.memory_space<semaphore_mem>>
      %121 = tpu.memref_squeeze %120 : memref<1x!tpu.dma_semaphore, #tpu.memory_space<semaphore_mem>> -> memref<!tpu.dma_semaphore, #tpu.memory_space<semaphore_mem>>
      tpu.enqueue_dma source(%118 : memref<1x128xf32, #tpu.memory_space<any>>) target(%119 : memref<1x128xf32, #tpu.memory_space<vmem>>) target_semaphore(%121 : memref<!tpu.dma_semaphore, #tpu.memory_space<semaphore_mem>>)
      %c10_i32 = arith.constant 10 : i32
      %122 = arith.addi %40, %c10_i32 : i32
      %123 = arith.index_cast %122 : i32 to index
      %124 = memref.load %arg2[%123] : memref<128xi32, #tpu.memory_space<smem>>
      %c10_i32_55 = arith.constant 10 : i32
      %125 = arith.addi %41, %c10_i32_55 : i32
      %c0_i32_56 = arith.constant 0 : i32
      %126 = tpu.memref_slice %arg3[%124, %c0_i32_56] : memref<512x128xf32, #tpu.memory_space<any>> -> memref<1x128xf32, #tpu.memory_space<any>>
      %c0_i32_57 = arith.constant 0 : i32
      %127 = tpu.memref_slice %arg5[%125, %c0_i32_57] : memref<128x128xf32, #tpu.memory_space<vmem>> -> memref<1x128xf32, #tpu.memory_space<vmem>>
      %128 = tpu.memref_slice %arg6[%39] : memref<2x!tpu.dma_semaphore, #tpu.memory_space<semaphore_mem>> -> memref<1x!tpu.dma_semaphore, #tpu.memory_space<semaphore_mem>>
      %129 = tpu.memref_squeeze %128 : memref<1x!tpu.dma_semaphore, #tpu.memory_space<semaphore_mem>> -> memref<!tpu.dma_semaphore, #tpu.memory_space<semaphore_mem>>
      tpu.enqueue_dma source(%126 : memref<1x128xf32, #tpu.memory_space<any>>) target(%127 : memref<1x128xf32, #tpu.memory_space<vmem>>) target_semaphore(%129 : memref<!tpu.dma_semaphore, #tpu.memory_space<semaphore_mem>>)
      %c11_i32 = arith.constant 11 : i32
      %130 = arith.addi %40, %c11_i32 : i32
      %131 = arith.index_cast %130 : i32 to index
      %132 = memref.load %arg2[%131] : memref<128xi32, #tpu.memory_space<smem>>
      %c11_i32_58 = arith.constant 11 : i32
      %133 = arith.addi %41, %c11_i32_58 : i32
      %c0_i32_59 = arith.constant 0 : i32
      %134 = tpu.memref_slice %arg3[%132, %c0_i32_59] : memref<512x128xf32, #tpu.memory_space<any>> -> memref<1x128xf32, #tpu.memory_space<any>>
      %c0_i32_60 = arith.constant 0 : i32
      %135 = tpu.memref_slice %arg5[%133, %c0_i32_60] : memref<128x128xf32, #tpu.memory_space<vmem>> -> memref<1x128xf32, #tpu.memory_space<vmem>>
      %136 = tpu.memref_slice %arg6[%39] : memref<2x!tpu.dma_semaphore, #tpu.memory_space<semaphore_mem>> -> memref<1x!tpu.dma_semaphore, #tpu.memory_space<semaphore_mem>>
      %137 = tpu.memref_squeeze %136 : memref<1x!tpu.dma_semaphore, #tpu.memory_space<semaphore_mem>> -> memref<!tpu.dma_semaphore, #tpu.memory_space<semaphore_mem>>
      tpu.enqueue_dma source(%134 : memref<1x128xf32, #tpu.memory_space<any>>) target(%135 : memref<1x128xf32, #tpu.memory_space<vmem>>) target_semaphore(%137 : memref<!tpu.dma_semaphore, #tpu.memory_space<semaphore_mem>>)
      %c12_i32 = arith.constant 12 : i32
      %138 = arith.addi %40, %c12_i32 : i32
      %139 = arith.index_cast %138 : i32 to index
      %140 = memref.load %arg2[%139] : memref<128xi32, #tpu.memory_space<smem>>
      %c12_i32_61 = arith.constant 12 : i32
      %141 = arith.addi %41, %c12_i32_61 : i32
      %c0_i32_62 = arith.constant 0 : i32
      %142 = tpu.memref_slice %arg3[%140, %c0_i32_62] : memref<512x128xf32, #tpu.memory_space<any>> -> memref<1x128xf32, #tpu.memory_space<any>>
      %c0_i32_63 = arith.constant 0 : i32
      %143 = tpu.memref_slice %arg5[%141, %c0_i32_63] : memref<128x128xf32, #tpu.memory_space<vmem>> -> memref<1x128xf32, #tpu.memory_space<vmem>>
      %144 = tpu.memref_slice %arg6[%39] : memref<2x!tpu.dma_semaphore, #tpu.memory_space<semaphore_mem>> -> memref<1x!tpu.dma_semaphore, #tpu.memory_space<semaphore_mem>>
      %145 = tpu.memref_squeeze %144 : memref<1x!tpu.dma_semaphore, #tpu.memory_space<semaphore_mem>> -> memref<!tpu.dma_semaphore, #tpu.memory_space<semaphore_mem>>
      tpu.enqueue_dma source(%142 : memref<1x128xf32, #tpu.memory_space<any>>) target(%143 : memref<1x128xf32, #tpu.memory_space<vmem>>) target_semaphore(%145 : memref<!tpu.dma_semaphore, #tpu.memory_space<semaphore_mem>>)
      %c13_i32 = arith.constant 13 : i32
      %146 = arith.addi %40, %c13_i32 : i32
      %147 = arith.index_cast %146 : i32 to index
      %148 = memref.load %arg2[%147] : memref<128xi32, #tpu.memory_space<smem>>
      %c13_i32_64 = arith.constant 13 : i32
      %149 = arith.addi %41, %c13_i32_64 : i32
      %c0_i32_65 = arith.constant 0 : i32
      %150 = tpu.memref_slice %arg3[%148, %c0_i32_65] : memref<512x128xf32, #tpu.memory_space<any>> -> memref<1x128xf32, #tpu.memory_space<any>>
      %c0_i32_66 = arith.constant 0 : i32
      %151 = tpu.memref_slice %arg5[%149, %c0_i32_66] : memref<128x128xf32, #tpu.memory_space<vmem>> -> memref<1x128xf32, #tpu.memory_space<vmem>>
      %152 = tpu.memref_slice %arg6[%39] : memref<2x!tpu.dma_semaphore, #tpu.memory_space<semaphore_mem>> -> memref<1x!tpu.dma_semaphore, #tpu.memory_space<semaphore_mem>>
      %153 = tpu.memref_squeeze %152 : memref<1x!tpu.dma_semaphore, #tpu.memory_space<semaphore_mem>> -> memref<!tpu.dma_semaphore, #tpu.memory_space<semaphore_mem>>
      tpu.enqueue_dma source(%150 : memref<1x128xf32, #tpu.memory_space<any>>) target(%151 : memref<1x128xf32, #tpu.memory_space<vmem>>) target_semaphore(%153 : memref<!tpu.dma_semaphore, #tpu.memory_space<semaphore_mem>>)
      %c14_i32 = arith.constant 14 : i32
      %154 = arith.addi %40, %c14_i32 : i32
      %155 = arith.index_cast %154 : i32 to index
      %156 = memref.load %arg2[%155] : memref<128xi32, #tpu.memory_space<smem>>
      %c14_i32_67 = arith.constant 14 : i32
      %157 = arith.addi %41, %c14_i32_67 : i32
      %c0_i32_68 = arith.constant 0 : i32
      %158 = tpu.memref_slice %arg3[%156, %c0_i32_68] : memref<512x128xf32, #tpu.memory_space<any>> -> memref<1x128xf32, #tpu.memory_space<any>>
      %c0_i32_69 = arith.constant 0 : i32
      %159 = tpu.memref_slice %arg5[%157, %c0_i32_69] : memref<128x128xf32, #tpu.memory_space<vmem>> -> memref<1x128xf32, #tpu.memory_space<vmem>>
      %160 = tpu.memref_slice %arg6[%39] : memref<2x!tpu.dma_semaphore, #tpu.memory_space<semaphore_mem>> -> memref<1x!tpu.dma_semaphore, #tpu.memory_space<semaphore_mem>>
      %161 = tpu.memref_squeeze %160 : memref<1x!tpu.dma_semaphore, #tpu.memory_space<semaphore_mem>> -> memref<!tpu.dma_semaphore, #tpu.memory_space<semaphore_mem>>
      tpu.enqueue_dma source(%158 : memref<1x128xf32, #tpu.memory_space<any>>) target(%159 : memref<1x128xf32, #tpu.memory_space<vmem>>) target_semaphore(%161 : memref<!tpu.dma_semaphore, #tpu.memory_space<semaphore_mem>>)
      %c15_i32 = arith.constant 15 : i32
      %162 = arith.addi %40, %c15_i32 : i32
      %163 = arith.index_cast %162 : i32 to index
      %164 = memref.load %arg2[%163] : memref<128xi32, #tpu.memory_space<smem>>
      %c15_i32_70 = arith.constant 15 : i32
      %165 = arith.addi %41, %c15_i32_70 : i32
      %c0_i32_71 = arith.constant 0 : i32
      %166 = tpu.memref_slice %arg3[%164, %c0_i32_71] : memref<512x128xf32, #tpu.memory_space<any>> -> memref<1x128xf32, #tpu.memory_space<any>>
      %c0_i32_72 = arith.constant 0 : i32
      %167 = tpu.memref_slice %arg5[%165, %c0_i32_72] : memref<128x128xf32, #tpu.memory_space<vmem>> -> memref<1x128xf32, #tpu.memory_space<vmem>>
      %168 = tpu.memref_slice %arg6[%39] : memref<2x!tpu.dma_semaphore, #tpu.memory_space<semaphore_mem>> -> memref<1x!tpu.dma_semaphore, #tpu.memory_space<semaphore_mem>>
      %169 = tpu.memref_squeeze %168 : memref<1x!tpu.dma_semaphore, #tpu.memory_space<semaphore_mem>> -> memref<!tpu.dma_semaphore, #tpu.memory_space<semaphore_mem>>
      tpu.enqueue_dma source(%166 : memref<1x128xf32, #tpu.memory_space<any>>) target(%167 : memref<1x128xf32, #tpu.memory_space<vmem>>) target_semaphore(%169 : memref<!tpu.dma_semaphore, #tpu.memory_space<semaphore_mem>>)
      %c16_i32 = arith.constant 16 : i32
      %170 = arith.addi %40, %c16_i32 : i32
      %171 = arith.index_cast %170 : i32 to index
      %172 = memref.load %arg2[%171] : memref<128xi32, #tpu.memory_space<smem>>
      %c16_i32_73 = arith.constant 16 : i32
      %173 = arith.addi %41, %c16_i32_73 : i32
      %c0_i32_74 = arith.constant 0 : i32
      %174 = tpu.memref_slice %arg3[%172, %c0_i32_74] : memref<512x128xf32, #tpu.memory_space<any>> -> memref<1x128xf32, #tpu.memory_space<any>>
      %c0_i32_75 = arith.constant 0 : i32
      %175 = tpu.memref_slice %arg5[%173, %c0_i32_75] : memref<128x128xf32, #tpu.memory_space<vmem>> -> memref<1x128xf32, #tpu.memory_space<vmem>>
      %176 = tpu.memref_slice %arg6[%39] : memref<2x!tpu.dma_semaphore, #tpu.memory_space<semaphore_mem>> -> memref<1x!tpu.dma_semaphore, #tpu.memory_space<semaphore_mem>>
      %177 = tpu.memref_squeeze %176 : memref<1x!tpu.dma_semaphore, #tpu.memory_space<semaphore_mem>> -> memref<!tpu.dma_semaphore, #tpu.memory_space<semaphore_mem>>
      tpu.enqueue_dma source(%174 : memref<1x128xf32, #tpu.memory_space<any>>) target(%175 : memref<1x128xf32, #tpu.memory_space<vmem>>) target_semaphore(%177 : memref<!tpu.dma_semaphore, #tpu.memory_space<semaphore_mem>>)
      %c17_i32 = arith.constant 17 : i32
      %178 = arith.addi %40, %c17_i32 : i32
      %179 = arith.index_cast %178 : i32 to index
      %180 = memref.load %arg2[%179] : memref<128xi32, #tpu.memory_space<smem>>
      %c17_i32_76 = arith.constant 17 : i32
      %181 = arith.addi %41, %c17_i32_76 : i32
      %c0_i32_77 = arith.constant 0 : i32
      %182 = tpu.memref_slice %arg3[%180, %c0_i32_77] : memref<512x128xf32, #tpu.memory_space<any>> -> memref<1x128xf32, #tpu.memory_space<any>>
      %c0_i32_78 = arith.constant 0 : i32
      %183 = tpu.memref_slice %arg5[%181, %c0_i32_78] : memref<128x128xf32, #tpu.memory_space<vmem>> -> memref<1x128xf32, #tpu.memory_space<vmem>>
      %184 = tpu.memref_slice %arg6[%39] : memref<2x!tpu.dma_semaphore, #tpu.memory_space<semaphore_mem>> -> memref<1x!tpu.dma_semaphore, #tpu.memory_space<semaphore_mem>>
      %185 = tpu.memref_squeeze %184 : memref<1x!tpu.dma_semaphore, #tpu.memory_space<semaphore_mem>> -> memref<!tpu.dma_semaphore, #tpu.memory_space<semaphore_mem>>
      tpu.enqueue_dma source(%182 : memref<1x128xf32, #tpu.memory_space<any>>) target(%183 : memref<1x128xf32, #tpu.memory_space<vmem>>) target_semaphore(%185 : memref<!tpu.dma_semaphore, #tpu.memory_space<semaphore_mem>>)
      %c18_i32 = arith.constant 18 : i32
      %186 = arith.addi %40, %c18_i32 : i32
      %187 = arith.index_cast %186 : i32 to index
      %188 = memref.load %arg2[%187] : memref<128xi32, #tpu.memory_space<smem>>
      %c18_i32_79 = arith.constant 18 : i32
      %189 = arith.addi %41, %c18_i32_79 : i32
      %c0_i32_80 = arith.constant 0 : i32
      %190 = tpu.memref_slice %arg3[%188, %c0_i32_80] : memref<512x128xf32, #tpu.memory_space<any>> -> memref<1x128xf32, #tpu.memory_space<any>>
      %c0_i32_81 = arith.constant 0 : i32
      %191 = tpu.memref_slice %arg5[%189, %c0_i32_81] : memref<128x128xf32, #tpu.memory_space<vmem>> -> memref<1x128xf32, #tpu.memory_space<vmem>>
      %192 = tpu.memref_slice %arg6[%39] : memref<2x!tpu.dma_semaphore, #tpu.memory_space<semaphore_mem>> -> memref<1x!tpu.dma_semaphore, #tpu.memory_space<semaphore_mem>>
      %193 = tpu.memref_squeeze %192 : memref<1x!tpu.dma_semaphore, #tpu.memory_space<semaphore_mem>> -> memref<!tpu.dma_semaphore, #tpu.memory_space<semaphore_mem>>
      tpu.enqueue_dma source(%190 : memref<1x128xf32, #tpu.memory_space<any>>) target(%191 : memref<1x128xf32, #tpu.memory_space<vmem>>) target_semaphore(%193 : memref<!tpu.dma_semaphore, #tpu.memory_space<semaphore_mem>>)
      %c19_i32 = arith.constant 19 : i32
      %194 = arith.addi %40, %c19_i32 : i32
      %195 = arith.index_cast %194 : i32 to index
      %196 = memref.load %arg2[%195] : memref<128xi32, #tpu.memory_space<smem>>
      %c19_i32_82 = arith.constant 19 : i32
      %197 = arith.addi %41, %c19_i32_82 : i32
      %c0_i32_83 = arith.constant 0 : i32
      %198 = tpu.memref_slice %arg3[%196, %c0_i32_83] : memref<512x128xf32, #tpu.memory_space<any>> -> memref<1x128xf32, #tpu.memory_space<any>>
      %c0_i32_84 = arith.constant 0 : i32
      %199 = tpu.memref_slice %arg5[%197, %c0_i32_84] : memref<128x128xf32, #tpu.memory_space<vmem>> -> memref<1x128xf32, #tpu.memory_space<vmem>>
      %200 = tpu.memref_slice %arg6[%39] : memref<2x!tpu.dma_semaphore, #tpu.memory_space<semaphore_mem>> -> memref<1x!tpu.dma_semaphore, #tpu.memory_space<semaphore_mem>>
      %201 = tpu.memref_squeeze %200 : memref<1x!tpu.dma_semaphore, #tpu.memory_space<semaphore_mem>> -> memref<!tpu.dma_semaphore, #tpu.memory_space<semaphore_mem>>
      tpu.enqueue_dma source(%198 : memref<1x128xf32, #tpu.memory_space<any>>) target(%199 : memref<1x128xf32, #tpu.memory_space<vmem>>) target_semaphore(%201 : memref<!tpu.dma_semaphore, #tpu.memory_space<semaphore_mem>>)
      %c20_i32 = arith.constant 20 : i32
      %202 = arith.addi %40, %c20_i32 : i32
      %203 = arith.index_cast %202 : i32 to index
      %204 = memref.load %arg2[%203] : memref<128xi32, #tpu.memory_space<smem>>
      %c20_i32_85 = arith.constant 20 : i32
      %205 = arith.addi %41, %c20_i32_85 : i32
      %c0_i32_86 = arith.constant 0 : i32
      %206 = tpu.memref_slice %arg3[%204, %c0_i32_86] : memref<512x128xf32, #tpu.memory_space<any>> -> memref<1x128xf32, #tpu.memory_space<any>>
      %c0_i32_87 = arith.constant 0 : i32
      %207 = tpu.memref_slice %arg5[%205, %c0_i32_87] : memref<128x128xf32, #tpu.memory_space<vmem>> -> memref<1x128xf32, #tpu.memory_space<vmem>>
      %208 = tpu.memref_slice %arg6[%39] : memref<2x!tpu.dma_semaphore, #tpu.memory_space<semaphore_mem>> -> memref<1x!tpu.dma_semaphore, #tpu.memory_space<semaphore_mem>>
      %209 = tpu.memref_squeeze %208 : memref<1x!tpu.dma_semaphore, #tpu.memory_space<semaphore_mem>> -> memref<!tpu.dma_semaphore, #tpu.memory_space<semaphore_mem>>
      tpu.enqueue_dma source(%206 : memref<1x128xf32, #tpu.memory_space<any>>) target(%207 : memref<1x128xf32, #tpu.memory_space<vmem>>) target_semaphore(%209 : memref<!tpu.dma_semaphore, #tpu.memory_space<semaphore_mem>>)
      %c21_i32 = arith.constant 21 : i32
      %210 = arith.addi %40, %c21_i32 : i32
      %211 = arith.index_cast %210 : i32 to index
      %212 = memref.load %arg2[%211] : memref<128xi32, #tpu.memory_space<smem>>
      %c21_i32_88 = arith.constant 21 : i32
      %213 = arith.addi %41, %c21_i32_88 : i32
      %c0_i32_89 = arith.constant 0 : i32
      %214 = tpu.memref_slice %arg3[%212, %c0_i32_89] : memref<512x128xf32, #tpu.memory_space<any>> -> memref<1x128xf32, #tpu.memory_space<any>>
      %c0_i32_90 = arith.constant 0 : i32
      %215 = tpu.memref_slice %arg5[%213, %c0_i32_90] : memref<128x128xf32, #tpu.memory_space<vmem>> -> memref<1x128xf32, #tpu.memory_space<vmem>>
      %216 = tpu.memref_slice %arg6[%39] : memref<2x!tpu.dma_semaphore, #tpu.memory_space<semaphore_mem>> -> memref<1x!tpu.dma_semaphore, #tpu.memory_space<semaphore_mem>>
      %217 = tpu.memref_squeeze %216 : memref<1x!tpu.dma_semaphore, #tpu.memory_space<semaphore_mem>> -> memref<!tpu.dma_semaphore, #tpu.memory_space<semaphore_mem>>
      tpu.enqueue_dma source(%214 : memref<1x128xf32, #tpu.memory_space<any>>) target(%215 : memref<1x128xf32, #tpu.memory_space<vmem>>) target_semaphore(%217 : memref<!tpu.dma_semaphore, #tpu.memory_space<semaphore_mem>>)
      %c22_i32 = arith.constant 22 : i32
      %218 = arith.addi %40, %c22_i32 : i32
      %219 = arith.index_cast %218 : i32 to index
      %220 = memref.load %arg2[%219] : memref<128xi32, #tpu.memory_space<smem>>
      %c22_i32_91 = arith.constant 22 : i32
      %221 = arith.addi %41, %c22_i32_91 : i32
      %c0_i32_92 = arith.constant 0 : i32
      %222 = tpu.memref_slice %arg3[%220, %c0_i32_92] : memref<512x128xf32, #tpu.memory_space<any>> -> memref<1x128xf32, #tpu.memory_space<any>>
      %c0_i32_93 = arith.constant 0 : i32
      %223 = tpu.memref_slice %arg5[%221, %c0_i32_93] : memref<128x128xf32, #tpu.memory_space<vmem>> -> memref<1x128xf32, #tpu.memory_space<vmem>>
      %224 = tpu.memref_slice %arg6[%39] : memref<2x!tpu.dma_semaphore, #tpu.memory_space<semaphore_mem>> -> memref<1x!tpu.dma_semaphore, #tpu.memory_space<semaphore_mem>>
      %225 = tpu.memref_squeeze %224 : memref<1x!tpu.dma_semaphore, #tpu.memory_space<semaphore_mem>> -> memref<!tpu.dma_semaphore, #tpu.memory_space<semaphore_mem>>
      tpu.enqueue_dma source(%222 : memref<1x128xf32, #tpu.memory_space<any>>) target(%223 : memref<1x128xf32, #tpu.memory_space<vmem>>) target_semaphore(%225 : memref<!tpu.dma_semaphore, #tpu.memory_space<semaphore_mem>>)
      %c23_i32 = arith.constant 23 : i32
      %226 = arith.addi %40, %c23_i32 : i32
      %227 = arith.index_cast %226 : i32 to index
      %228 = memref.load %arg2[%227] : memref<128xi32, #tpu.memory_space<smem>>
      %c23_i32_94 = arith.constant 23 : i32
      %229 = arith.addi %41, %c23_i32_94 : i32
      %c0_i32_95 = arith.constant 0 : i32
      %230 = tpu.memref_slice %arg3[%228, %c0_i32_95] : memref<512x128xf32, #tpu.memory_space<any>> -> memref<1x128xf32, #tpu.memory_space<any>>
      %c0_i32_96 = arith.constant 0 : i32
      %231 = tpu.memref_slice %arg5[%229, %c0_i32_96] : memref<128x128xf32, #tpu.memory_space<vmem>> -> memref<1x128xf32, #tpu.memory_space<vmem>>
      %232 = tpu.memref_slice %arg6[%39] : memref<2x!tpu.dma_semaphore, #tpu.memory_space<semaphore_mem>> -> memref<1x!tpu.dma_semaphore, #tpu.memory_space<semaphore_mem>>
      %233 = tpu.memref_squeeze %232 : memref<1x!tpu.dma_semaphore, #tpu.memory_space<semaphore_mem>> -> memref<!tpu.dma_semaphore, #tpu.memory_space<semaphore_mem>>
      tpu.enqueue_dma source(%230 : memref<1x128xf32, #tpu.memory_space<any>>) target(%231 : memref<1x128xf32, #tpu.memory_space<vmem>>) target_semaphore(%233 : memref<!tpu.dma_semaphore, #tpu.memory_space<semaphore_mem>>)
      %c24_i32 = arith.constant 24 : i32
      %234 = arith.addi %40, %c24_i32 : i32
      %235 = arith.index_cast %234 : i32 to index
      %236 = memref.load %arg2[%235] : memref<128xi32, #tpu.memory_space<smem>>
      %c24_i32_97 = arith.constant 24 : i32
      %237 = arith.addi %41, %c24_i32_97 : i32
      %c0_i32_98 = arith.constant 0 : i32
      %238 = tpu.memref_slice %arg3[%236, %c0_i32_98] : memref<512x128xf32, #tpu.memory_space<any>> -> memref<1x128xf32, #tpu.memory_space<any>>
      %c0_i32_99 = arith.constant 0 : i32
      %239 = tpu.memref_slice %arg5[%237, %c0_i32_99] : memref<128x128xf32, #tpu.memory_space<vmem>> -> memref<1x128xf32, #tpu.memory_space<vmem>>
      %240 = tpu.memref_slice %arg6[%39] : memref<2x!tpu.dma_semaphore, #tpu.memory_space<semaphore_mem>> -> memref<1x!tpu.dma_semaphore, #tpu.memory_space<semaphore_mem>>
      %241 = tpu.memref_squeeze %240 : memref<1x!tpu.dma_semaphore, #tpu.memory_space<semaphore_mem>> -> memref<!tpu.dma_semaphore, #tpu.memory_space<semaphore_mem>>
      tpu.enqueue_dma source(%238 : memref<1x128xf32, #tpu.memory_space<any>>) target(%239 : memref<1x128xf32, #tpu.memory_space<vmem>>) target_semaphore(%241 : memref<!tpu.dma_semaphore, #tpu.memory_space<semaphore_mem>>)
      %c25_i32 = arith.constant 25 : i32
      %242 = arith.addi %40, %c25_i32 : i32
      %243 = arith.index_cast %242 : i32 to index
      %244 = memref.load %arg2[%243] : memref<128xi32, #tpu.memory_space<smem>>
      %c25_i32_100 = arith.constant 25 : i32
      %245 = arith.addi %41, %c25_i32_100 : i32
      %c0_i32_101 = arith.constant 0 : i32
      %246 = tpu.memref_slice %arg3[%244, %c0_i32_101] : memref<512x128xf32, #tpu.memory_space<any>> -> memref<1x128xf32, #tpu.memory_space<any>>
      %c0_i32_102 = arith.constant 0 : i32
      %247 = tpu.memref_slice %arg5[%245, %c0_i32_102] : memref<128x128xf32, #tpu.memory_space<vmem>> -> memref<1x128xf32, #tpu.memory_space<vmem>>
      %248 = tpu.memref_slice %arg6[%39] : memref<2x!tpu.dma_semaphore, #tpu.memory_space<semaphore_mem>> -> memref<1x!tpu.dma_semaphore, #tpu.memory_space<semaphore_mem>>
      %249 = tpu.memref_squeeze %248 : memref<1x!tpu.dma_semaphore, #tpu.memory_space<semaphore_mem>> -> memref<!tpu.dma_semaphore, #tpu.memory_space<semaphore_mem>>
      tpu.enqueue_dma source(%246 : memref<1x128xf32, #tpu.memory_space<any>>) target(%247 : memref<1x128xf32, #tpu.memory_space<vmem>>) target_semaphore(%249 : memref<!tpu.dma_semaphore, #tpu.memory_space<semaphore_mem>>)
      %c26_i32 = arith.constant 26 : i32
      %250 = arith.addi %40, %c26_i32 : i32
      %251 = arith.index_cast %250 : i32 to index
      %252 = memref.load %arg2[%251] : memref<128xi32, #tpu.memory_space<smem>>
      %c26_i32_103 = arith.constant 26 : i32
      %253 = arith.addi %41, %c26_i32_103 : i32
      %c0_i32_104 = arith.constant 0 : i32
      %254 = tpu.memref_slice %arg3[%252, %c0_i32_104] : memref<512x128xf32, #tpu.memory_space<any>> -> memref<1x128xf32, #tpu.memory_space<any>>
      %c0_i32_105 = arith.constant 0 : i32
      %255 = tpu.memref_slice %arg5[%253, %c0_i32_105] : memref<128x128xf32, #tpu.memory_space<vmem>> -> memref<1x128xf32, #tpu.memory_space<vmem>>
      %256 = tpu.memref_slice %arg6[%39] : memref<2x!tpu.dma_semaphore, #tpu.memory_space<semaphore_mem>> -> memref<1x!tpu.dma_semaphore, #tpu.memory_space<semaphore_mem>>
      %257 = tpu.memref_squeeze %256 : memref<1x!tpu.dma_semaphore, #tpu.memory_space<semaphore_mem>> -> memref<!tpu.dma_semaphore, #tpu.memory_space<semaphore_mem>>
      tpu.enqueue_dma source(%254 : memref<1x128xf32, #tpu.memory_space<any>>) target(%255 : memref<1x128xf32, #tpu.memory_space<vmem>>) target_semaphore(%257 : memref<!tpu.dma_semaphore, #tpu.memory_space<semaphore_mem>>)
      %c27_i32 = arith.constant 27 : i32
      %258 = arith.addi %40, %c27_i32 : i32
      %259 = arith.index_cast %258 : i32 to index
      %260 = memref.load %arg2[%259] : memref<128xi32, #tpu.memory_space<smem>>
      %c27_i32_106 = arith.constant 27 : i32
      %261 = arith.addi %41, %c27_i32_106 : i32
      %c0_i32_107 = arith.constant 0 : i32
      %262 = tpu.memref_slice %arg3[%260, %c0_i32_107] : memref<512x128xf32, #tpu.memory_space<any>> -> memref<1x128xf32, #tpu.memory_space<any>>
      %c0_i32_108 = arith.constant 0 : i32
      %263 = tpu.memref_slice %arg5[%261, %c0_i32_108] : memref<128x128xf32, #tpu.memory_space<vmem>> -> memref<1x128xf32, #tpu.memory_space<vmem>>
      %264 = tpu.memref_slice %arg6[%39] : memref<2x!tpu.dma_semaphore, #tpu.memory_space<semaphore_mem>> -> memref<1x!tpu.dma_semaphore, #tpu.memory_space<semaphore_mem>>
      %265 = tpu.memref_squeeze %264 : memref<1x!tpu.dma_semaphore, #tpu.memory_space<semaphore_mem>> -> memref<!tpu.dma_semaphore, #tpu.memory_space<semaphore_mem>>
      tpu.enqueue_dma source(%262 : memref<1x128xf32, #tpu.memory_space<any>>) target(%263 : memref<1x128xf32, #tpu.memory_space<vmem>>) target_semaphore(%265 : memref<!tpu.dma_semaphore, #tpu.memory_space<semaphore_mem>>)
      %c28_i32 = arith.constant 28 : i32
      %266 = arith.addi %40, %c28_i32 : i32
      %267 = arith.index_cast %266 : i32 to index
      %268 = memref.load %arg2[%267] : memref<128xi32, #tpu.memory_space<smem>>
      %c28_i32_109 = arith.constant 28 : i32
      %269 = arith.addi %41, %c28_i32_109 : i32
      %c0_i32_110 = arith.constant 0 : i32
      %270 = tpu.memref_slice %arg3[%268, %c0_i32_110] : memref<512x128xf32, #tpu.memory_space<any>> -> memref<1x128xf32, #tpu.memory_space<any>>
      %c0_i32_111 = arith.constant 0 : i32
      %271 = tpu.memref_slice %arg5[%269, %c0_i32_111] : memref<128x128xf32, #tpu.memory_space<vmem>> -> memref<1x128xf32, #tpu.memory_space<vmem>>
      %272 = tpu.memref_slice %arg6[%39] : memref<2x!tpu.dma_semaphore, #tpu.memory_space<semaphore_mem>> -> memref<1x!tpu.dma_semaphore, #tpu.memory_space<semaphore_mem>>
      %273 = tpu.memref_squeeze %272 : memref<1x!tpu.dma_semaphore, #tpu.memory_space<semaphore_mem>> -> memref<!tpu.dma_semaphore, #tpu.memory_space<semaphore_mem>>
      tpu.enqueue_dma source(%270 : memref<1x128xf32, #tpu.memory_space<any>>) target(%271 : memref<1x128xf32, #tpu.memory_space<vmem>>) target_semaphore(%273 : memref<!tpu.dma_semaphore, #tpu.memory_space<semaphore_mem>>)
      %c29_i32 = arith.constant 29 : i32
      %274 = arith.addi %40, %c29_i32 : i32
      %275 = arith.index_cast %274 : i32 to index
      %276 = memref.load %arg2[%275] : memref<128xi32, #tpu.memory_space<smem>>
      %c29_i32_112 = arith.constant 29 : i32
      %277 = arith.addi %41, %c29_i32_112 : i32
      %c0_i32_113 = arith.constant 0 : i32
      %278 = tpu.memref_slice %arg3[%276, %c0_i32_113] : memref<512x128xf32, #tpu.memory_space<any>> -> memref<1x128xf32, #tpu.memory_space<any>>
      %c0_i32_114 = arith.constant 0 : i32
      %279 = tpu.memref_slice %arg5[%277, %c0_i32_114] : memref<128x128xf32, #tpu.memory_space<vmem>> -> memref<1x128xf32, #tpu.memory_space<vmem>>
      %280 = tpu.memref_slice %arg6[%39] : memref<2x!tpu.dma_semaphore, #tpu.memory_space<semaphore_mem>> -> memref<1x!tpu.dma_semaphore, #tpu.memory_space<semaphore_mem>>
      %281 = tpu.memref_squeeze %280 : memref<1x!tpu.dma_semaphore, #tpu.memory_space<semaphore_mem>> -> memref<!tpu.dma_semaphore, #tpu.memory_space<semaphore_mem>>
      tpu.enqueue_dma source(%278 : memref<1x128xf32, #tpu.memory_space<any>>) target(%279 : memref<1x128xf32, #tpu.memory_space<vmem>>) target_semaphore(%281 : memref<!tpu.dma_semaphore, #tpu.memory_space<semaphore_mem>>)
      %c30_i32 = arith.constant 30 : i32
      %282 = arith.addi %40, %c30_i32 : i32
      %283 = arith.index_cast %282 : i32 to index
      %284 = memref.load %arg2[%283] : memref<128xi32, #tpu.memory_space<smem>>
      %c30_i32_115 = arith.constant 30 : i32
      %285 = arith.addi %41, %c30_i32_115 : i32
      %c0_i32_116 = arith.constant 0 : i32
      %286 = tpu.memref_slice %arg3[%284, %c0_i32_116] : memref<512x128xf32, #tpu.memory_space<any>> -> memref<1x128xf32, #tpu.memory_space<any>>
      %c0_i32_117 = arith.constant 0 : i32
      %287 = tpu.memref_slice %arg5[%285, %c0_i32_117] : memref<128x128xf32, #tpu.memory_space<vmem>> -> memref<1x128xf32, #tpu.memory_space<vmem>>
      %288 = tpu.memref_slice %arg6[%39] : memref<2x!tpu.dma_semaphore, #tpu.memory_space<semaphore_mem>> -> memref<1x!tpu.dma_semaphore, #tpu.memory_space<semaphore_mem>>
      %289 = tpu.memref_squeeze %288 : memref<1x!tpu.dma_semaphore, #tpu.memory_space<semaphore_mem>> -> memref<!tpu.dma_semaphore, #tpu.memory_space<semaphore_mem>>
      tpu.enqueue_dma source(%286 : memref<1x128xf32, #tpu.memory_space<any>>) target(%287 : memref<1x128xf32, #tpu.memory_space<vmem>>) target_semaphore(%289 : memref<!tpu.dma_semaphore, #tpu.memory_space<semaphore_mem>>)
      %c31_i32 = arith.constant 31 : i32
      %290 = arith.addi %40, %c31_i32 : i32
      %291 = arith.index_cast %290 : i32 to index
      %292 = memref.load %arg2[%291] : memref<128xi32, #tpu.memory_space<smem>>
      %c31_i32_118 = arith.constant 31 : i32
      %293 = arith.addi %41, %c31_i32_118 : i32
      %c0_i32_119 = arith.constant 0 : i32
      %294 = tpu.memref_slice %arg3[%292, %c0_i32_119] : memref<512x128xf32, #tpu.memory_space<any>> -> memref<1x128xf32, #tpu.memory_space<any>>
      %c0_i32_120 = arith.constant 0 : i32
      %295 = tpu.memref_slice %arg5[%293, %c0_i32_120] : memref<128x128xf32, #tpu.memory_space<vmem>> -> memref<1x128xf32, #tpu.memory_space<vmem>>
      %296 = tpu.memref_slice %arg6[%39] : memref<2x!tpu.dma_semaphore, #tpu.memory_space<semaphore_mem>> -> memref<1x!tpu.dma_semaphore, #tpu.memory_space<semaphore_mem>>
      %297 = tpu.memref_squeeze %296 : memref<1x!tpu.dma_semaphore, #tpu.memory_space<semaphore_mem>> -> memref<!tpu.dma_semaphore, #tpu.memory_space<semaphore_mem>>
      tpu.enqueue_dma source(%294 : memref<1x128xf32, #tpu.memory_space<any>>) target(%295 : memref<1x128xf32, #tpu.memory_space<vmem>>) target_semaphore(%297 : memref<!tpu.dma_semaphore, #tpu.memory_space<semaphore_mem>>)
      %c32_i32 = arith.constant 32 : i32
      %298 = arith.addi %40, %c32_i32 : i32
      %299 = arith.index_cast %298 : i32 to index
      %300 = memref.load %arg2[%299] : memref<128xi32, #tpu.memory_space<smem>>
      %c32_i32_121 = arith.constant 32 : i32
      %301 = arith.addi %41, %c32_i32_121 : i32
      %c0_i32_122 = arith.constant 0 : i32
      %302 = tpu.memref_slice %arg3[%300, %c0_i32_122] : memref<512x128xf32, #tpu.memory_space<any>> -> memref<1x128xf32, #tpu.memory_space<any>>
      %c0_i32_123 = arith.constant 0 : i32
      %303 = tpu.memref_slice %arg5[%301, %c0_i32_123] : memref<128x128xf32, #tpu.memory_space<vmem>> -> memref<1x128xf32, #tpu.memory_space<vmem>>
      %304 = tpu.memref_slice %arg6[%39] : memref<2x!tpu.dma_semaphore, #tpu.memory_space<semaphore_mem>> -> memref<1x!tpu.dma_semaphore, #tpu.memory_space<semaphore_mem>>
      %305 = tpu.memref_squeeze %304 : memref<1x!tpu.dma_semaphore, #tpu.memory_space<semaphore_mem>> -> memref<!tpu.dma_semaphore, #tpu.memory_space<semaphore_mem>>
      tpu.enqueue_dma source(%302 : memref<1x128xf32, #tpu.memory_space<any>>) target(%303 : memref<1x128xf32, #tpu.memory_space<vmem>>) target_semaphore(%305 : memref<!tpu.dma_semaphore, #tpu.memory_space<semaphore_mem>>)
      %c33_i32 = arith.constant 33 : i32
      %306 = arith.addi %40, %c33_i32 : i32
      %307 = arith.index_cast %306 : i32 to index
      %308 = memref.load %arg2[%307] : memref<128xi32, #tpu.memory_space<smem>>
      %c33_i32_124 = arith.constant 33 : i32
      %309 = arith.addi %41, %c33_i32_124 : i32
      %c0_i32_125 = arith.constant 0 : i32
      %310 = tpu.memref_slice %arg3[%308, %c0_i32_125] : memref<512x128xf32, #tpu.memory_space<any>> -> memref<1x128xf32, #tpu.memory_space<any>>
      %c0_i32_126 = arith.constant 0 : i32
      %311 = tpu.memref_slice %arg5[%309, %c0_i32_126] : memref<128x128xf32, #tpu.memory_space<vmem>> -> memref<1x128xf32, #tpu.memory_space<vmem>>
      %312 = tpu.memref_slice %arg6[%39] : memref<2x!tpu.dma_semaphore, #tpu.memory_space<semaphore_mem>> -> memref<1x!tpu.dma_semaphore, #tpu.memory_space<semaphore_mem>>
      %313 = tpu.memref_squeeze %312 : memref<1x!tpu.dma_semaphore, #tpu.memory_space<semaphore_mem>> -> memref<!tpu.dma_semaphore, #tpu.memory_space<semaphore_mem>>
      tpu.enqueue_dma source(%310 : memref<1x128xf32, #tpu.memory_space<any>>) target(%311 : memref<1x128xf32, #tpu.memory_space<vmem>>) target_semaphore(%313 : memref<!tpu.dma_semaphore, #tpu.memory_space<semaphore_mem>>)
      %c34_i32 = arith.constant 34 : i32
      %314 = arith.addi %40, %c34_i32 : i32
      %315 = arith.index_cast %314 : i32 to index
      %316 = memref.load %arg2[%315] : memref<128xi32, #tpu.memory_space<smem>>
      %c34_i32_127 = arith.constant 34 : i32
      %317 = arith.addi %41, %c34_i32_127 : i32
      %c0_i32_128 = arith.constant 0 : i32
      %318 = tpu.memref_slice %arg3[%316, %c0_i32_128] : memref<512x128xf32, #tpu.memory_space<any>> -> memref<1x128xf32, #tpu.memory_space<any>>
      %c0_i32_129 = arith.constant 0 : i32
      %319 = tpu.memref_slice %arg5[%317, %c0_i32_129] : memref<128x128xf32, #tpu.memory_space<vmem>> -> memref<1x128xf32, #tpu.memory_space<vmem>>
      %320 = tpu.memref_slice %arg6[%39] : memref<2x!tpu.dma_semaphore, #tpu.memory_space<semaphore_mem>> -> memref<1x!tpu.dma_semaphore, #tpu.memory_space<semaphore_mem>>
      %321 = tpu.memref_squeeze %320 : memref<1x!tpu.dma_semaphore, #tpu.memory_space<semaphore_mem>> -> memref<!tpu.dma_semaphore, #tpu.memory_space<semaphore_mem>>
      tpu.enqueue_dma source(%318 : memref<1x128xf32, #tpu.memory_space<any>>) target(%319 : memref<1x128xf32, #tpu.memory_space<vmem>>) target_semaphore(%321 : memref<!tpu.dma_semaphore, #tpu.memory_space<semaphore_mem>>)
      %c35_i32 = arith.constant 35 : i32
      %322 = arith.addi %40, %c35_i32 : i32
      %323 = arith.index_cast %322 : i32 to index
      %324 = memref.load %arg2[%323] : memref<128xi32, #tpu.memory_space<smem>>
      %c35_i32_130 = arith.constant 35 : i32
      %325 = arith.addi %41, %c35_i32_130 : i32
      %c0_i32_131 = arith.constant 0 : i32
      %326 = tpu.memref_slice %arg3[%324, %c0_i32_131] : memref<512x128xf32, #tpu.memory_space<any>> -> memref<1x128xf32, #tpu.memory_space<any>>
      %c0_i32_132 = arith.constant 0 : i32
      %327 = tpu.memref_slice %arg5[%325, %c0_i32_132] : memref<128x128xf32, #tpu.memory_space<vmem>> -> memref<1x128xf32, #tpu.memory_space<vmem>>
      %328 = tpu.memref_slice %arg6[%39] : memref<2x!tpu.dma_semaphore, #tpu.memory_space<semaphore_mem>> -> memref<1x!tpu.dma_semaphore, #tpu.memory_space<semaphore_mem>>
      %329 = tpu.memref_squeeze %328 : memref<1x!tpu.dma_semaphore, #tpu.memory_space<semaphore_mem>> -> memref<!tpu.dma_semaphore, #tpu.memory_space<semaphore_mem>>
      tpu.enqueue_dma source(%326 : memref<1x128xf32, #tpu.memory_space<any>>) target(%327 : memref<1x128xf32, #tpu.memory_space<vmem>>) target_semaphore(%329 : memref<!tpu.dma_semaphore, #tpu.memory_space<semaphore_mem>>)
      %c36_i32 = arith.constant 36 : i32
      %330 = arith.addi %40, %c36_i32 : i32
      %331 = arith.index_cast %330 : i32 to index
      %332 = memref.load %arg2[%331] : memref<128xi32, #tpu.memory_space<smem>>
      %c36_i32_133 = arith.constant 36 : i32
      %333 = arith.addi %41, %c36_i32_133 : i32
      %c0_i32_134 = arith.constant 0 : i32
      %334 = tpu.memref_slice %arg3[%332, %c0_i32_134] : memref<512x128xf32, #tpu.memory_space<any>> -> memref<1x128xf32, #tpu.memory_space<any>>
      %c0_i32_135 = arith.constant 0 : i32
      %335 = tpu.memref_slice %arg5[%333, %c0_i32_135] : memref<128x128xf32, #tpu.memory_space<vmem>> -> memref<1x128xf32, #tpu.memory_space<vmem>>
      %336 = tpu.memref_slice %arg6[%39] : memref<2x!tpu.dma_semaphore, #tpu.memory_space<semaphore_mem>> -> memref<1x!tpu.dma_semaphore, #tpu.memory_space<semaphore_mem>>
      %337 = tpu.memref_squeeze %336 : memref<1x!tpu.dma_semaphore, #tpu.memory_space<semaphore_mem>> -> memref<!tpu.dma_semaphore, #tpu.memory_space<semaphore_mem>>
      tpu.enqueue_dma source(%334 : memref<1x128xf32, #tpu.memory_space<any>>) target(%335 : memref<1x128xf32, #tpu.memory_space<vmem>>) target_semaphore(%337 : memref<!tpu.dma_semaphore, #tpu.memory_space<semaphore_mem>>)
      %c37_i32 = arith.constant 37 : i32
      %338 = arith.addi %40, %c37_i32 : i32
      %339 = arith.index_cast %338 : i32 to index
      %340 = memref.load %arg2[%339] : memref<128xi32, #tpu.memory_space<smem>>
      %c37_i32_136 = arith.constant 37 : i32
      %341 = arith.addi %41, %c37_i32_136 : i32
      %c0_i32_137 = arith.constant 0 : i32
      %342 = tpu.memref_slice %arg3[%340, %c0_i32_137] : memref<512x128xf32, #tpu.memory_space<any>> -> memref<1x128xf32, #tpu.memory_space<any>>
      %c0_i32_138 = arith.constant 0 : i32
      %343 = tpu.memref_slice %arg5[%341, %c0_i32_138] : memref<128x128xf32, #tpu.memory_space<vmem>> -> memref<1x128xf32, #tpu.memory_space<vmem>>
      %344 = tpu.memref_slice %arg6[%39] : memref<2x!tpu.dma_semaphore, #tpu.memory_space<semaphore_mem>> -> memref<1x!tpu.dma_semaphore, #tpu.memory_space<semaphore_mem>>
      %345 = tpu.memref_squeeze %344 : memref<1x!tpu.dma_semaphore, #tpu.memory_space<semaphore_mem>> -> memref<!tpu.dma_semaphore, #tpu.memory_space<semaphore_mem>>
      tpu.enqueue_dma source(%342 : memref<1x128xf32, #tpu.memory_space<any>>) target(%343 : memref<1x128xf32, #tpu.memory_space<vmem>>) target_semaphore(%345 : memref<!tpu.dma_semaphore, #tpu.memory_space<semaphore_mem>>)
      %c38_i32 = arith.constant 38 : i32
      %346 = arith.addi %40, %c38_i32 : i32
      %347 = arith.index_cast %346 : i32 to index
      %348 = memref.load %arg2[%347] : memref<128xi32, #tpu.memory_space<smem>>
      %c38_i32_139 = arith.constant 38 : i32
      %349 = arith.addi %41, %c38_i32_139 : i32
      %c0_i32_140 = arith.constant 0 : i32
      %350 = tpu.memref_slice %arg3[%348, %c0_i32_140] : memref<512x128xf32, #tpu.memory_space<any>> -> memref<1x128xf32, #tpu.memory_space<any>>
      %c0_i32_141 = arith.constant 0 : i32
      %351 = tpu.memref_slice %arg5[%349, %c0_i32_141] : memref<128x128xf32, #tpu.memory_space<vmem>> -> memref<1x128xf32, #tpu.memory_space<vmem>>
      %352 = tpu.memref_slice %arg6[%39] : memref<2x!tpu.dma_semaphore, #tpu.memory_space<semaphore_mem>> -> memref<1x!tpu.dma_semaphore, #tpu.memory_space<semaphore_mem>>
      %353 = tpu.memref_squeeze %352 : memref<1x!tpu.dma_semaphore, #tpu.memory_space<semaphore_mem>> -> memref<!tpu.dma_semaphore, #tpu.memory_space<semaphore_mem>>
      tpu.enqueue_dma source(%350 : memref<1x128xf32, #tpu.memory_space<any>>) target(%351 : memref<1x128xf32, #tpu.memory_space<vmem>>) target_semaphore(%353 : memref<!tpu.dma_semaphore, #tpu.memory_space<semaphore_mem>>)
      %c39_i32 = arith.constant 39 : i32
      %354 = arith.addi %40, %c39_i32 : i32
      %355 = arith.index_cast %354 : i32 to index
      %356 = memref.load %arg2[%355] : memref<128xi32, #tpu.memory_space<smem>>
      %c39_i32_142 = arith.constant 39 : i32
      %357 = arith.addi %41, %c39_i32_142 : i32
      %c0_i32_143 = arith.constant 0 : i32
      %358 = tpu.memref_slice %arg3[%356, %c0_i32_143] : memref<512x128xf32, #tpu.memory_space<any>> -> memref<1x128xf32, #tpu.memory_space<any>>
      %c0_i32_144 = arith.constant 0 : i32
      %359 = tpu.memref_slice %arg5[%357, %c0_i32_144] : memref<128x128xf32, #tpu.memory_space<vmem>> -> memref<1x128xf32, #tpu.memory_space<vmem>>
      %360 = tpu.memref_slice %arg6[%39] : memref<2x!tpu.dma_semaphore, #tpu.memory_space<semaphore_mem>> -> memref<1x!tpu.dma_semaphore, #tpu.memory_space<semaphore_mem>>
      %361 = tpu.memref_squeeze %360 : memref<1x!tpu.dma_semaphore, #tpu.memory_space<semaphore_mem>> -> memref<!tpu.dma_semaphore, #tpu.memory_space<semaphore_mem>>
      tpu.enqueue_dma source(%358 : memref<1x128xf32, #tpu.memory_space<any>>) target(%359 : memref<1x128xf32, #tpu.memory_space<vmem>>) target_semaphore(%361 : memref<!tpu.dma_semaphore, #tpu.memory_space<semaphore_mem>>)
      %c40_i32 = arith.constant 40 : i32
      %362 = arith.addi %40, %c40_i32 : i32
      %363 = arith.index_cast %362 : i32 to index
      %364 = memref.load %arg2[%363] : memref<128xi32, #tpu.memory_space<smem>>
      %c40_i32_145 = arith.constant 40 : i32
      %365 = arith.addi %41, %c40_i32_145 : i32
      %c0_i32_146 = arith.constant 0 : i32
      %366 = tpu.memref_slice %arg3[%364, %c0_i32_146] : memref<512x128xf32, #tpu.memory_space<any>> -> memref<1x128xf32, #tpu.memory_space<any>>
      %c0_i32_147 = arith.constant 0 : i32
      %367 = tpu.memref_slice %arg5[%365, %c0_i32_147] : memref<128x128xf32, #tpu.memory_space<vmem>> -> memref<1x128xf32, #tpu.memory_space<vmem>>
      %368 = tpu.memref_slice %arg6[%39] : memref<2x!tpu.dma_semaphore, #tpu.memory_space<semaphore_mem>> -> memref<1x!tpu.dma_semaphore, #tpu.memory_space<semaphore_mem>>
      %369 = tpu.memref_squeeze %368 : memref<1x!tpu.dma_semaphore, #tpu.memory_space<semaphore_mem>> -> memref<!tpu.dma_semaphore, #tpu.memory_space<semaphore_mem>>
      tpu.enqueue_dma source(%366 : memref<1x128xf32, #tpu.memory_space<any>>) target(%367 : memref<1x128xf32, #tpu.memory_space<vmem>>) target_semaphore(%369 : memref<!tpu.dma_semaphore, #tpu.memory_space<semaphore_mem>>)
      %c41_i32 = arith.constant 41 : i32
      %370 = arith.addi %40, %c41_i32 : i32
      %371 = arith.index_cast %370 : i32 to index
      %372 = memref.load %arg2[%371] : memref<128xi32, #tpu.memory_space<smem>>
      %c41_i32_148 = arith.constant 41 : i32
      %373 = arith.addi %41, %c41_i32_148 : i32
      %c0_i32_149 = arith.constant 0 : i32
      %374 = tpu.memref_slice %arg3[%372, %c0_i32_149] : memref<512x128xf32, #tpu.memory_space<any>> -> memref<1x128xf32, #tpu.memory_space<any>>
      %c0_i32_150 = arith.constant 0 : i32
      %375 = tpu.memref_slice %arg5[%373, %c0_i32_150] : memref<128x128xf32, #tpu.memory_space<vmem>> -> memref<1x128xf32, #tpu.memory_space<vmem>>
      %376 = tpu.memref_slice %arg6[%39] : memref<2x!tpu.dma_semaphore, #tpu.memory_space<semaphore_mem>> -> memref<1x!tpu.dma_semaphore, #tpu.memory_space<semaphore_mem>>
      %377 = tpu.memref_squeeze %376 : memref<1x!tpu.dma_semaphore, #tpu.memory_space<semaphore_mem>> -> memref<!tpu.dma_semaphore, #tpu.memory_space<semaphore_mem>>
      tpu.enqueue_dma source(%374 : memref<1x128xf32, #tpu.memory_space<any>>) target(%375 : memref<1x128xf32, #tpu.memory_space<vmem>>) target_semaphore(%377 : memref<!tpu.dma_semaphore, #tpu.memory_space<semaphore_mem>>)
      %c42_i32 = arith.constant 42 : i32
      %378 = arith.addi %40, %c42_i32 : i32
      %379 = arith.index_cast %378 : i32 to index
      %380 = memref.load %arg2[%379] : memref<128xi32, #tpu.memory_space<smem>>
      %c42_i32_151 = arith.constant 42 : i32
      %381 = arith.addi %41, %c42_i32_151 : i32
      %c0_i32_152 = arith.constant 0 : i32
      %382 = tpu.memref_slice %arg3[%380, %c0_i32_152] : memref<512x128xf32, #tpu.memory_space<any>> -> memref<1x128xf32, #tpu.memory_space<any>>
      %c0_i32_153 = arith.constant 0 : i32
      %383 = tpu.memref_slice %arg5[%381, %c0_i32_153] : memref<128x128xf32, #tpu.memory_space<vmem>> -> memref<1x128xf32, #tpu.memory_space<vmem>>
      %384 = tpu.memref_slice %arg6[%39] : memref<2x!tpu.dma_semaphore, #tpu.memory_space<semaphore_mem>> -> memref<1x!tpu.dma_semaphore, #tpu.memory_space<semaphore_mem>>
      %385 = tpu.memref_squeeze %384 : memref<1x!tpu.dma_semaphore, #tpu.memory_space<semaphore_mem>> -> memref<!tpu.dma_semaphore, #tpu.memory_space<semaphore_mem>>
      tpu.enqueue_dma source(%382 : memref<1x128xf32, #tpu.memory_space<any>>) target(%383 : memref<1x128xf32, #tpu.memory_space<vmem>>) target_semaphore(%385 : memref<!tpu.dma_semaphore, #tpu.memory_space<semaphore_mem>>)
      %c43_i32 = arith.constant 43 : i32
      %386 = arith.addi %40, %c43_i32 : i32
      %387 = arith.index_cast %386 : i32 to index
      %388 = memref.load %arg2[%387] : memref<128xi32, #tpu.memory_space<smem>>
      %c43_i32_154 = arith.constant 43 : i32
      %389 = arith.addi %41, %c43_i32_154 : i32
      %c0_i32_155 = arith.constant 0 : i32
      %390 = tpu.memref_slice %arg3[%388, %c0_i32_155] : memref<512x128xf32, #tpu.memory_space<any>> -> memref<1x128xf32, #tpu.memory_space<any>>
      %c0_i32_156 = arith.constant 0 : i32
      %391 = tpu.memref_slice %arg5[%389, %c0_i32_156] : memref<128x128xf32, #tpu.memory_space<vmem>> -> memref<1x128xf32, #tpu.memory_space<vmem>>
      %392 = tpu.memref_slice %arg6[%39] : memref<2x!tpu.dma_semaphore, #tpu.memory_space<semaphore_mem>> -> memref<1x!tpu.dma_semaphore, #tpu.memory_space<semaphore_mem>>
      %393 = tpu.memref_squeeze %392 : memref<1x!tpu.dma_semaphore, #tpu.memory_space<semaphore_mem>> -> memref<!tpu.dma_semaphore, #tpu.memory_space<semaphore_mem>>
      tpu.enqueue_dma source(%390 : memref<1x128xf32, #tpu.memory_space<any>>) target(%391 : memref<1x128xf32, #tpu.memory_space<vmem>>) target_semaphore(%393 : memref<!tpu.dma_semaphore, #tpu.memory_space<semaphore_mem>>)
      %c44_i32 = arith.constant 44 : i32
      %394 = arith.addi %40, %c44_i32 : i32
      %395 = arith.index_cast %394 : i32 to index
      %396 = memref.load %arg2[%395] : memref<128xi32, #tpu.memory_space<smem>>
      %c44_i32_157 = arith.constant 44 : i32
      %397 = arith.addi %41, %c44_i32_157 : i32
      %c0_i32_158 = arith.constant 0 : i32
      %398 = tpu.memref_slice %arg3[%396, %c0_i32_158] : memref<512x128xf32, #tpu.memory_space<any>> -> memref<1x128xf32, #tpu.memory_space<any>>
      %c0_i32_159 = arith.constant 0 : i32
      %399 = tpu.memref_slice %arg5[%397, %c0_i32_159] : memref<128x128xf32, #tpu.memory_space<vmem>> -> memref<1x128xf32, #tpu.memory_space<vmem>>
      %400 = tpu.memref_slice %arg6[%39] : memref<2x!tpu.dma_semaphore, #tpu.memory_space<semaphore_mem>> -> memref<1x!tpu.dma_semaphore, #tpu.memory_space<semaphore_mem>>
      %401 = tpu.memref_squeeze %400 : memref<1x!tpu.dma_semaphore, #tpu.memory_space<semaphore_mem>> -> memref<!tpu.dma_semaphore, #tpu.memory_space<semaphore_mem>>
      tpu.enqueue_dma source(%398 : memref<1x128xf32, #tpu.memory_space<any>>) target(%399 : memref<1x128xf32, #tpu.memory_space<vmem>>) target_semaphore(%401 : memref<!tpu.dma_semaphore, #tpu.memory_space<semaphore_mem>>)
      %c45_i32 = arith.constant 45 : i32
      %402 = arith.addi %40, %c45_i32 : i32
      %403 = arith.index_cast %402 : i32 to index
      %404 = memref.load %arg2[%403] : memref<128xi32, #tpu.memory_space<smem>>
      %c45_i32_160 = arith.constant 45 : i32
      %405 = arith.addi %41, %c45_i32_160 : i32
      %c0_i32_161 = arith.constant 0 : i32
      %406 = tpu.memref_slice %arg3[%404, %c0_i32_161] : memref<512x128xf32, #tpu.memory_space<any>> -> memref<1x128xf32, #tpu.memory_space<any>>
      %c0_i32_162 = arith.constant 0 : i32
      %407 = tpu.memref_slice %arg5[%405, %c0_i32_162] : memref<128x128xf32, #tpu.memory_space<vmem>> -> memref<1x128xf32, #tpu.memory_space<vmem>>
      %408 = tpu.memref_slice %arg6[%39] : memref<2x!tpu.dma_semaphore, #tpu.memory_space<semaphore_mem>> -> memref<1x!tpu.dma_semaphore, #tpu.memory_space<semaphore_mem>>
      %409 = tpu.memref_squeeze %408 : memref<1x!tpu.dma_semaphore, #tpu.memory_space<semaphore_mem>> -> memref<!tpu.dma_semaphore, #tpu.memory_space<semaphore_mem>>
      tpu.enqueue_dma source(%406 : memref<1x128xf32, #tpu.memory_space<any>>) target(%407 : memref<1x128xf32, #tpu.memory_space<vmem>>) target_semaphore(%409 : memref<!tpu.dma_semaphore, #tpu.memory_space<semaphore_mem>>)
      %c46_i32 = arith.constant 46 : i32
      %410 = arith.addi %40, %c46_i32 : i32
      %411 = arith.index_cast %410 : i32 to index
      %412 = memref.load %arg2[%411] : memref<128xi32, #tpu.memory_space<smem>>
      %c46_i32_163 = arith.constant 46 : i32
      %413 = arith.addi %41, %c46_i32_163 : i32
      %c0_i32_164 = arith.constant 0 : i32
      %414 = tpu.memref_slice %arg3[%412, %c0_i32_164] : memref<512x128xf32, #tpu.memory_space<any>> -> memref<1x128xf32, #tpu.memory_space<any>>
      %c0_i32_165 = arith.constant 0 : i32
      %415 = tpu.memref_slice %arg5[%413, %c0_i32_165] : memref<128x128xf32, #tpu.memory_space<vmem>> -> memref<1x128xf32, #tpu.memory_space<vmem>>
      %416 = tpu.memref_slice %arg6[%39] : memref<2x!tpu.dma_semaphore, #tpu.memory_space<semaphore_mem>> -> memref<1x!tpu.dma_semaphore, #tpu.memory_space<semaphore_mem>>
      %417 = tpu.memref_squeeze %416 : memref<1x!tpu.dma_semaphore, #tpu.memory_space<semaphore_mem>> -> memref<!tpu.dma_semaphore, #tpu.memory_space<semaphore_mem>>
      tpu.enqueue_dma source(%414 : memref<1x128xf32, #tpu.memory_space<any>>) target(%415 : memref<1x128xf32, #tpu.memory_space<vmem>>) target_semaphore(%417 : memref<!tpu.dma_semaphore, #tpu.memory_space<semaphore_mem>>)
      %c47_i32 = arith.constant 47 : i32
      %418 = arith.addi %40, %c47_i32 : i32
      %419 = arith.index_cast %418 : i32 to index
      %420 = memref.load %arg2[%419] : memref<128xi32, #tpu.memory_space<smem>>
      %c47_i32_166 = arith.constant 47 : i32
      %421 = arith.addi %41, %c47_i32_166 : i32
      %c0_i32_167 = arith.constant 0 : i32
      %422 = tpu.memref_slice %arg3[%420, %c0_i32_167] : memref<512x128xf32, #tpu.memory_space<any>> -> memref<1x128xf32, #tpu.memory_space<any>>
      %c0_i32_168 = arith.constant 0 : i32
      %423 = tpu.memref_slice %arg5[%421, %c0_i32_168] : memref<128x128xf32, #tpu.memory_space<vmem>> -> memref<1x128xf32, #tpu.memory_space<vmem>>
      %424 = tpu.memref_slice %arg6[%39] : memref<2x!tpu.dma_semaphore, #tpu.memory_space<semaphore_mem>> -> memref<1x!tpu.dma_semaphore, #tpu.memory_space<semaphore_mem>>
      %425 = tpu.memref_squeeze %424 : memref<1x!tpu.dma_semaphore, #tpu.memory_space<semaphore_mem>> -> memref<!tpu.dma_semaphore, #tpu.memory_space<semaphore_mem>>
      tpu.enqueue_dma source(%422 : memref<1x128xf32, #tpu.memory_space<any>>) target(%423 : memref<1x128xf32, #tpu.memory_space<vmem>>) target_semaphore(%425 : memref<!tpu.dma_semaphore, #tpu.memory_space<semaphore_mem>>)
      %c48_i32 = arith.constant 48 : i32
      %426 = arith.addi %40, %c48_i32 : i32
      %427 = arith.index_cast %426 : i32 to index
      %428 = memref.load %arg2[%427] : memref<128xi32, #tpu.memory_space<smem>>
      %c48_i32_169 = arith.constant 48 : i32
      %429 = arith.addi %41, %c48_i32_169 : i32
      %c0_i32_170 = arith.constant 0 : i32
      %430 = tpu.memref_slice %arg3[%428, %c0_i32_170] : memref<512x128xf32, #tpu.memory_space<any>> -> memref<1x128xf32, #tpu.memory_space<any>>
      %c0_i32_171 = arith.constant 0 : i32
      %431 = tpu.memref_slice %arg5[%429, %c0_i32_171] : memref<128x128xf32, #tpu.memory_space<vmem>> -> memref<1x128xf32, #tpu.memory_space<vmem>>
      %432 = tpu.memref_slice %arg6[%39] : memref<2x!tpu.dma_semaphore, #tpu.memory_space<semaphore_mem>> -> memref<1x!tpu.dma_semaphore, #tpu.memory_space<semaphore_mem>>
      %433 = tpu.memref_squeeze %432 : memref<1x!tpu.dma_semaphore, #tpu.memory_space<semaphore_mem>> -> memref<!tpu.dma_semaphore, #tpu.memory_space<semaphore_mem>>
      tpu.enqueue_dma source(%430 : memref<1x128xf32, #tpu.memory_space<any>>) target(%431 : memref<1x128xf32, #tpu.memory_space<vmem>>) target_semaphore(%433 : memref<!tpu.dma_semaphore, #tpu.memory_space<semaphore_mem>>)
      %c49_i32 = arith.constant 49 : i32
      %434 = arith.addi %40, %c49_i32 : i32
      %435 = arith.index_cast %434 : i32 to index
      %436 = memref.load %arg2[%435] : memref<128xi32, #tpu.memory_space<smem>>
      %c49_i32_172 = arith.constant 49 : i32
      %437 = arith.addi %41, %c49_i32_172 : i32
      %c0_i32_173 = arith.constant 0 : i32
      %438 = tpu.memref_slice %arg3[%436, %c0_i32_173] : memref<512x128xf32, #tpu.memory_space<any>> -> memref<1x128xf32, #tpu.memory_space<any>>
      %c0_i32_174 = arith.constant 0 : i32
      %439 = tpu.memref_slice %arg5[%437, %c0_i32_174] : memref<128x128xf32, #tpu.memory_space<vmem>> -> memref<1x128xf32, #tpu.memory_space<vmem>>
      %440 = tpu.memref_slice %arg6[%39] : memref<2x!tpu.dma_semaphore, #tpu.memory_space<semaphore_mem>> -> memref<1x!tpu.dma_semaphore, #tpu.memory_space<semaphore_mem>>
      %441 = tpu.memref_squeeze %440 : memref<1x!tpu.dma_semaphore, #tpu.memory_space<semaphore_mem>> -> memref<!tpu.dma_semaphore, #tpu.memory_space<semaphore_mem>>
      tpu.enqueue_dma source(%438 : memref<1x128xf32, #tpu.memory_space<any>>) target(%439 : memref<1x128xf32, #tpu.memory_space<vmem>>) target_semaphore(%441 : memref<!tpu.dma_semaphore, #tpu.memory_space<semaphore_mem>>)
      %c50_i32 = arith.constant 50 : i32
      %442 = arith.addi %40, %c50_i32 : i32
      %443 = arith.index_cast %442 : i32 to index
      %444 = memref.load %arg2[%443] : memref<128xi32, #tpu.memory_space<smem>>
      %c50_i32_175 = arith.constant 50 : i32
      %445 = arith.addi %41, %c50_i32_175 : i32
      %c0_i32_176 = arith.constant 0 : i32
      %446 = tpu.memref_slice %arg3[%444, %c0_i32_176] : memref<512x128xf32, #tpu.memory_space<any>> -> memref<1x128xf32, #tpu.memory_space<any>>
      %c0_i32_177 = arith.constant 0 : i32
      %447 = tpu.memref_slice %arg5[%445, %c0_i32_177] : memref<128x128xf32, #tpu.memory_space<vmem>> -> memref<1x128xf32, #tpu.memory_space<vmem>>
      %448 = tpu.memref_slice %arg6[%39] : memref<2x!tpu.dma_semaphore, #tpu.memory_space<semaphore_mem>> -> memref<1x!tpu.dma_semaphore, #tpu.memory_space<semaphore_mem>>
      %449 = tpu.memref_squeeze %448 : memref<1x!tpu.dma_semaphore, #tpu.memory_space<semaphore_mem>> -> memref<!tpu.dma_semaphore, #tpu.memory_space<semaphore_mem>>
      tpu.enqueue_dma source(%446 : memref<1x128xf32, #tpu.memory_space<any>>) target(%447 : memref<1x128xf32, #tpu.memory_space<vmem>>) target_semaphore(%449 : memref<!tpu.dma_semaphore, #tpu.memory_space<semaphore_mem>>)
      %c51_i32 = arith.constant 51 : i32
      %450 = arith.addi %40, %c51_i32 : i32
      %451 = arith.index_cast %450 : i32 to index
      %452 = memref.load %arg2[%451] : memref<128xi32, #tpu.memory_space<smem>>
      %c51_i32_178 = arith.constant 51 : i32
      %453 = arith.addi %41, %c51_i32_178 : i32
      %c0_i32_179 = arith.constant 0 : i32
      %454 = tpu.memref_slice %arg3[%452, %c0_i32_179] : memref<512x128xf32, #tpu.memory_space<any>> -> memref<1x128xf32, #tpu.memory_space<any>>
      %c0_i32_180 = arith.constant 0 : i32
      %455 = tpu.memref_slice %arg5[%453, %c0_i32_180] : memref<128x128xf32, #tpu.memory_space<vmem>> -> memref<1x128xf32, #tpu.memory_space<vmem>>
      %456 = tpu.memref_slice %arg6[%39] : memref<2x!tpu.dma_semaphore, #tpu.memory_space<semaphore_mem>> -> memref<1x!tpu.dma_semaphore, #tpu.memory_space<semaphore_mem>>
      %457 = tpu.memref_squeeze %456 : memref<1x!tpu.dma_semaphore, #tpu.memory_space<semaphore_mem>> -> memref<!tpu.dma_semaphore, #tpu.memory_space<semaphore_mem>>
      tpu.enqueue_dma source(%454 : memref<1x128xf32, #tpu.memory_space<any>>) target(%455 : memref<1x128xf32, #tpu.memory_space<vmem>>) target_semaphore(%457 : memref<!tpu.dma_semaphore, #tpu.memory_space<semaphore_mem>>)
      %c52_i32 = arith.constant 52 : i32
      %458 = arith.addi %40, %c52_i32 : i32
      %459 = arith.index_cast %458 : i32 to index
      %460 = memref.load %arg2[%459] : memref<128xi32, #tpu.memory_space<smem>>
      %c52_i32_181 = arith.constant 52 : i32
      %461 = arith.addi %41, %c52_i32_181 : i32
      %c0_i32_182 = arith.constant 0 : i32
      %462 = tpu.memref_slice %arg3[%460, %c0_i32_182] : memref<512x128xf32, #tpu.memory_space<any>> -> memref<1x128xf32, #tpu.memory_space<any>>
      %c0_i32_183 = arith.constant 0 : i32
      %463 = tpu.memref_slice %arg5[%461, %c0_i32_183] : memref<128x128xf32, #tpu.memory_space<vmem>> -> memref<1x128xf32, #tpu.memory_space<vmem>>
      %464 = tpu.memref_slice %arg6[%39] : memref<2x!tpu.dma_semaphore, #tpu.memory_space<semaphore_mem>> -> memref<1x!tpu.dma_semaphore, #tpu.memory_space<semaphore_mem>>
      %465 = tpu.memref_squeeze %464 : memref<1x!tpu.dma_semaphore, #tpu.memory_space<semaphore_mem>> -> memref<!tpu.dma_semaphore, #tpu.memory_space<semaphore_mem>>
      tpu.enqueue_dma source(%462 : memref<1x128xf32, #tpu.memory_space<any>>) target(%463 : memref<1x128xf32, #tpu.memory_space<vmem>>) target_semaphore(%465 : memref<!tpu.dma_semaphore, #tpu.memory_space<semaphore_mem>>)
      %c53_i32 = arith.constant 53 : i32
      %466 = arith.addi %40, %c53_i32 : i32
      %467 = arith.index_cast %466 : i32 to index
      %468 = memref.load %arg2[%467] : memref<128xi32, #tpu.memory_space<smem>>
      %c53_i32_184 = arith.constant 53 : i32
      %469 = arith.addi %41, %c53_i32_184 : i32
      %c0_i32_185 = arith.constant 0 : i32
      %470 = tpu.memref_slice %arg3[%468, %c0_i32_185] : memref<512x128xf32, #tpu.memory_space<any>> -> memref<1x128xf32, #tpu.memory_space<any>>
      %c0_i32_186 = arith.constant 0 : i32
      %471 = tpu.memref_slice %arg5[%469, %c0_i32_186] : memref<128x128xf32, #tpu.memory_space<vmem>> -> memref<1x128xf32, #tpu.memory_space<vmem>>
      %472 = tpu.memref_slice %arg6[%39] : memref<2x!tpu.dma_semaphore, #tpu.memory_space<semaphore_mem>> -> memref<1x!tpu.dma_semaphore, #tpu.memory_space<semaphore_mem>>
      %473 = tpu.memref_squeeze %472 : memref<1x!tpu.dma_semaphore, #tpu.memory_space<semaphore_mem>> -> memref<!tpu.dma_semaphore, #tpu.memory_space<semaphore_mem>>
      tpu.enqueue_dma source(%470 : memref<1x128xf32, #tpu.memory_space<any>>) target(%471 : memref<1x128xf32, #tpu.memory_space<vmem>>) target_semaphore(%473 : memref<!tpu.dma_semaphore, #tpu.memory_space<semaphore_mem>>)
      %c54_i32 = arith.constant 54 : i32
      %474 = arith.addi %40, %c54_i32 : i32
      %475 = arith.index_cast %474 : i32 to index
      %476 = memref.load %arg2[%475] : memref<128xi32, #tpu.memory_space<smem>>
      %c54_i32_187 = arith.constant 54 : i32
      %477 = arith.addi %41, %c54_i32_187 : i32
      %c0_i32_188 = arith.constant 0 : i32
      %478 = tpu.memref_slice %arg3[%476, %c0_i32_188] : memref<512x128xf32, #tpu.memory_space<any>> -> memref<1x128xf32, #tpu.memory_space<any>>
      %c0_i32_189 = arith.constant 0 : i32
      %479 = tpu.memref_slice %arg5[%477, %c0_i32_189] : memref<128x128xf32, #tpu.memory_space<vmem>> -> memref<1x128xf32, #tpu.memory_space<vmem>>
      %480 = tpu.memref_slice %arg6[%39] : memref<2x!tpu.dma_semaphore, #tpu.memory_space<semaphore_mem>> -> memref<1x!tpu.dma_semaphore, #tpu.memory_space<semaphore_mem>>
      %481 = tpu.memref_squeeze %480 : memref<1x!tpu.dma_semaphore, #tpu.memory_space<semaphore_mem>> -> memref<!tpu.dma_semaphore, #tpu.memory_space<semaphore_mem>>
      tpu.enqueue_dma source(%478 : memref<1x128xf32, #tpu.memory_space<any>>) target(%479 : memref<1x128xf32, #tpu.memory_space<vmem>>) target_semaphore(%481 : memref<!tpu.dma_semaphore, #tpu.memory_space<semaphore_mem>>)
      %c55_i32 = arith.constant 55 : i32
      %482 = arith.addi %40, %c55_i32 : i32
      %483 = arith.index_cast %482 : i32 to index
      %484 = memref.load %arg2[%483] : memref<128xi32, #tpu.memory_space<smem>>
      %c55_i32_190 = arith.constant 55 : i32
      %485 = arith.addi %41, %c55_i32_190 : i32
      %c0_i32_191 = arith.constant 0 : i32
      %486 = tpu.memref_slice %arg3[%484, %c0_i32_191] : memref<512x128xf32, #tpu.memory_space<any>> -> memref<1x128xf32, #tpu.memory_space<any>>
      %c0_i32_192 = arith.constant 0 : i32
      %487 = tpu.memref_slice %arg5[%485, %c0_i32_192] : memref<128x128xf32, #tpu.memory_space<vmem>> -> memref<1x128xf32, #tpu.memory_space<vmem>>
      %488 = tpu.memref_slice %arg6[%39] : memref<2x!tpu.dma_semaphore, #tpu.memory_space<semaphore_mem>> -> memref<1x!tpu.dma_semaphore, #tpu.memory_space<semaphore_mem>>
      %489 = tpu.memref_squeeze %488 : memref<1x!tpu.dma_semaphore, #tpu.memory_space<semaphore_mem>> -> memref<!tpu.dma_semaphore, #tpu.memory_space<semaphore_mem>>
      tpu.enqueue_dma source(%486 : memref<1x128xf32, #tpu.memory_space<any>>) target(%487 : memref<1x128xf32, #tpu.memory_space<vmem>>) target_semaphore(%489 : memref<!tpu.dma_semaphore, #tpu.memory_space<semaphore_mem>>)
      %c56_i32 = arith.constant 56 : i32
      %490 = arith.addi %40, %c56_i32 : i32
      %491 = arith.index_cast %490 : i32 to index
      %492 = memref.load %arg2[%491] : memref<128xi32, #tpu.memory_space<smem>>
      %c56_i32_193 = arith.constant 56 : i32
      %493 = arith.addi %41, %c56_i32_193 : i32
      %c0_i32_194 = arith.constant 0 : i32
      %494 = tpu.memref_slice %arg3[%492, %c0_i32_194] : memref<512x128xf32, #tpu.memory_space<any>> -> memref<1x128xf32, #tpu.memory_space<any>>
      %c0_i32_195 = arith.constant 0 : i32
      %495 = tpu.memref_slice %arg5[%493, %c0_i32_195] : memref<128x128xf32, #tpu.memory_space<vmem>> -> memref<1x128xf32, #tpu.memory_space<vmem>>
      %496 = tpu.memref_slice %arg6[%39] : memref<2x!tpu.dma_semaphore, #tpu.memory_space<semaphore_mem>> -> memref<1x!tpu.dma_semaphore, #tpu.memory_space<semaphore_mem>>
      %497 = tpu.memref_squeeze %496 : memref<1x!tpu.dma_semaphore, #tpu.memory_space<semaphore_mem>> -> memref<!tpu.dma_semaphore, #tpu.memory_space<semaphore_mem>>
      tpu.enqueue_dma source(%494 : memref<1x128xf32, #tpu.memory_space<any>>) target(%495 : memref<1x128xf32, #tpu.memory_space<vmem>>) target_semaphore(%497 : memref<!tpu.dma_semaphore, #tpu.memory_space<semaphore_mem>>)
      %c57_i32 = arith.constant 57 : i32
      %498 = arith.addi %40, %c57_i32 : i32
      %499 = arith.index_cast %498 : i32 to index
      %500 = memref.load %arg2[%499] : memref<128xi32, #tpu.memory_space<smem>>
      %c57_i32_196 = arith.constant 57 : i32
      %501 = arith.addi %41, %c57_i32_196 : i32
      %c0_i32_197 = arith.constant 0 : i32
      %502 = tpu.memref_slice %arg3[%500, %c0_i32_197] : memref<512x128xf32, #tpu.memory_space<any>> -> memref<1x128xf32, #tpu.memory_space<any>>
      %c0_i32_198 = arith.constant 0 : i32
      %503 = tpu.memref_slice %arg5[%501, %c0_i32_198] : memref<128x128xf32, #tpu.memory_space<vmem>> -> memref<1x128xf32, #tpu.memory_space<vmem>>
      %504 = tpu.memref_slice %arg6[%39] : memref<2x!tpu.dma_semaphore, #tpu.memory_space<semaphore_mem>> -> memref<1x!tpu.dma_semaphore, #tpu.memory_space<semaphore_mem>>
      %505 = tpu.memref_squeeze %504 : memref<1x!tpu.dma_semaphore, #tpu.memory_space<semaphore_mem>> -> memref<!tpu.dma_semaphore, #tpu.memory_space<semaphore_mem>>
      tpu.enqueue_dma source(%502 : memref<1x128xf32, #tpu.memory_space<any>>) target(%503 : memref<1x128xf32, #tpu.memory_space<vmem>>) target_semaphore(%505 : memref<!tpu.dma_semaphore, #tpu.memory_space<semaphore_mem>>)
      %c58_i32 = arith.constant 58 : i32
      %506 = arith.addi %40, %c58_i32 : i32
      %507 = arith.index_cast %506 : i32 to index
      %508 = memref.load %arg2[%507] : memref<128xi32, #tpu.memory_space<smem>>
      %c58_i32_199 = arith.constant 58 : i32
      %509 = arith.addi %41, %c58_i32_199 : i32
      %c0_i32_200 = arith.constant 0 : i32
      %510 = tpu.memref_slice %arg3[%508, %c0_i32_200] : memref<512x128xf32, #tpu.memory_space<any>> -> memref<1x128xf32, #tpu.memory_space<any>>
      %c0_i32_201 = arith.constant 0 : i32
      %511 = tpu.memref_slice %arg5[%509, %c0_i32_201] : memref<128x128xf32, #tpu.memory_space<vmem>> -> memref<1x128xf32, #tpu.memory_space<vmem>>
      %512 = tpu.memref_slice %arg6[%39] : memref<2x!tpu.dma_semaphore, #tpu.memory_space<semaphore_mem>> -> memref<1x!tpu.dma_semaphore, #tpu.memory_space<semaphore_mem>>
      %513 = tpu.memref_squeeze %512 : memref<1x!tpu.dma_semaphore, #tpu.memory_space<semaphore_mem>> -> memref<!tpu.dma_semaphore, #tpu.memory_space<semaphore_mem>>
      tpu.enqueue_dma source(%510 : memref<1x128xf32, #tpu.memory_space<any>>) target(%511 : memref<1x128xf32, #tpu.memory_space<vmem>>) target_semaphore(%513 : memref<!tpu.dma_semaphore, #tpu.memory_space<semaphore_mem>>)
      %c59_i32 = arith.constant 59 : i32
      %514 = arith.addi %40, %c59_i32 : i32
      %515 = arith.index_cast %514 : i32 to index
      %516 = memref.load %arg2[%515] : memref<128xi32, #tpu.memory_space<smem>>
      %c59_i32_202 = arith.constant 59 : i32
      %517 = arith.addi %41, %c59_i32_202 : i32
      %c0_i32_203 = arith.constant 0 : i32
      %518 = tpu.memref_slice %arg3[%516, %c0_i32_203] : memref<512x128xf32, #tpu.memory_space<any>> -> memref<1x128xf32, #tpu.memory_space<any>>
      %c0_i32_204 = arith.constant 0 : i32
      %519 = tpu.memref_slice %arg5[%517, %c0_i32_204] : memref<128x128xf32, #tpu.memory_space<vmem>> -> memref<1x128xf32, #tpu.memory_space<vmem>>
      %520 = tpu.memref_slice %arg6[%39] : memref<2x!tpu.dma_semaphore, #tpu.memory_space<semaphore_mem>> -> memref<1x!tpu.dma_semaphore, #tpu.memory_space<semaphore_mem>>
      %521 = tpu.memref_squeeze %520 : memref<1x!tpu.dma_semaphore, #tpu.memory_space<semaphore_mem>> -> memref<!tpu.dma_semaphore, #tpu.memory_space<semaphore_mem>>
      tpu.enqueue_dma source(%518 : memref<1x128xf32, #tpu.memory_space<any>>) target(%519 : memref<1x128xf32, #tpu.memory_space<vmem>>) target_semaphore(%521 : memref<!tpu.dma_semaphore, #tpu.memory_space<semaphore_mem>>)
      %c60_i32 = arith.constant 60 : i32
      %522 = arith.addi %40, %c60_i32 : i32
      %523 = arith.index_cast %522 : i32 to index
      %524 = memref.load %arg2[%523] : memref<128xi32, #tpu.memory_space<smem>>
      %c60_i32_205 = arith.constant 60 : i32
      %525 = arith.addi %41, %c60_i32_205 : i32
      %c0_i32_206 = arith.constant 0 : i32
      %526 = tpu.memref_slice %arg3[%524, %c0_i32_206] : memref<512x128xf32, #tpu.memory_space<any>> -> memref<1x128xf32, #tpu.memory_space<any>>
      %c0_i32_207 = arith.constant 0 : i32
      %527 = tpu.memref_slice %arg5[%525, %c0_i32_207] : memref<128x128xf32, #tpu.memory_space<vmem>> -> memref<1x128xf32, #tpu.memory_space<vmem>>
      %528 = tpu.memref_slice %arg6[%39] : memref<2x!tpu.dma_semaphore, #tpu.memory_space<semaphore_mem>> -> memref<1x!tpu.dma_semaphore, #tpu.memory_space<semaphore_mem>>
      %529 = tpu.memref_squeeze %528 : memref<1x!tpu.dma_semaphore, #tpu.memory_space<semaphore_mem>> -> memref<!tpu.dma_semaphore, #tpu.memory_space<semaphore_mem>>
      tpu.enqueue_dma source(%526 : memref<1x128xf32, #tpu.memory_space<any>>) target(%527 : memref<1x128xf32, #tpu.memory_space<vmem>>) target_semaphore(%529 : memref<!tpu.dma_semaphore, #tpu.memory_space<semaphore_mem>>)
      %c61_i32 = arith.constant 61 : i32
      %530 = arith.addi %40, %c61_i32 : i32
      %531 = arith.index_cast %530 : i32 to index
      %532 = memref.load %arg2[%531] : memref<128xi32, #tpu.memory_space<smem>>
      %c61_i32_208 = arith.constant 61 : i32
      %533 = arith.addi %41, %c61_i32_208 : i32
      %c0_i32_209 = arith.constant 0 : i32
      %534 = tpu.memref_slice %arg3[%532, %c0_i32_209] : memref<512x128xf32, #tpu.memory_space<any>> -> memref<1x128xf32, #tpu.memory_space<any>>
      %c0_i32_210 = arith.constant 0 : i32
      %535 = tpu.memref_slice %arg5[%533, %c0_i32_210] : memref<128x128xf32, #tpu.memory_space<vmem>> -> memref<1x128xf32, #tpu.memory_space<vmem>>
      %536 = tpu.memref_slice %arg6[%39] : memref<2x!tpu.dma_semaphore, #tpu.memory_space<semaphore_mem>> -> memref<1x!tpu.dma_semaphore, #tpu.memory_space<semaphore_mem>>
      %537 = tpu.memref_squeeze %536 : memref<1x!tpu.dma_semaphore, #tpu.memory_space<semaphore_mem>> -> memref<!tpu.dma_semaphore, #tpu.memory_space<semaphore_mem>>
      tpu.enqueue_dma source(%534 : memref<1x128xf32, #tpu.memory_space<any>>) target(%535 : memref<1x128xf32, #tpu.memory_space<vmem>>) target_semaphore(%537 : memref<!tpu.dma_semaphore, #tpu.memory_space<semaphore_mem>>)
      %c62_i32 = arith.constant 62 : i32
      %538 = arith.addi %40, %c62_i32 : i32
      %539 = arith.index_cast %538 : i32 to index
      %540 = memref.load %arg2[%539] : memref<128xi32, #tpu.memory_space<smem>>
      %c62_i32_211 = arith.constant 62 : i32
      %541 = arith.addi %41, %c62_i32_211 : i32
      %c0_i32_212 = arith.constant 0 : i32
      %542 = tpu.memref_slice %arg3[%540, %c0_i32_212] : memref<512x128xf32, #tpu.memory_space<any>> -> memref<1x128xf32, #tpu.memory_space<any>>
      %c0_i32_213 = arith.constant 0 : i32
      %543 = tpu.memref_slice %arg5[%541, %c0_i32_213] : memref<128x128xf32, #tpu.memory_space<vmem>> -> memref<1x128xf32, #tpu.memory_space<vmem>>
      %544 = tpu.memref_slice %arg6[%39] : memref<2x!tpu.dma_semaphore, #tpu.memory_space<semaphore_mem>> -> memref<1x!tpu.dma_semaphore, #tpu.memory_space<semaphore_mem>>
      %545 = tpu.memref_squeeze %544 : memref<1x!tpu.dma_semaphore, #tpu.memory_space<semaphore_mem>> -> memref<!tpu.dma_semaphore, #tpu.memory_space<semaphore_mem>>
      tpu.enqueue_dma source(%542 : memref<1x128xf32, #tpu.memory_space<any>>) target(%543 : memref<1x128xf32, #tpu.memory_space<vmem>>) target_semaphore(%545 : memref<!tpu.dma_semaphore, #tpu.memory_space<semaphore_mem>>)
      %c63_i32 = arith.constant 63 : i32
      %546 = arith.addi %40, %c63_i32 : i32
      %547 = arith.index_cast %546 : i32 to index
      %548 = memref.load %arg2[%547] : memref<128xi32, #tpu.memory_space<smem>>
      %c63_i32_214 = arith.constant 63 : i32
      %549 = arith.addi %41, %c63_i32_214 : i32
      %c0_i32_215 = arith.constant 0 : i32
      %550 = tpu.memref_slice %arg3[%548, %c0_i32_215] : memref<512x128xf32, #tpu.memory_space<any>> -> memref<1x128xf32, #tpu.memory_space<any>>
      %c0_i32_216 = arith.constant 0 : i32
      %551 = tpu.memref_slice %arg5[%549, %c0_i32_216] : memref<128x128xf32, #tpu.memory_space<vmem>> -> memref<1x128xf32, #tpu.memory_space<vmem>>
      %552 = tpu.memref_slice %arg6[%39] : memref<2x!tpu.dma_semaphore, #tpu.memory_space<semaphore_mem>> -> memref<1x!tpu.dma_semaphore, #tpu.memory_space<semaphore_mem>>
      %553 = tpu.memref_squeeze %552 : memref<1x!tpu.dma_semaphore, #tpu.memory_space<semaphore_mem>> -> memref<!tpu.dma_semaphore, #tpu.memory_space<semaphore_mem>>
      tpu.enqueue_dma source(%550 : memref<1x128xf32, #tpu.memory_space<any>>) target(%551 : memref<1x128xf32, #tpu.memory_space<vmem>>) target_semaphore(%553 : memref<!tpu.dma_semaphore, #tpu.memory_space<semaphore_mem>>)
    } else {
    }
    %c1_i32_1 = arith.constant 1 : i32
    %5 = arith.addi %arg1, %c1_i32_1 : i32
    %c1_i32_2 = arith.constant 1 : i32
    %6 = arith.cmpi slt, %5, %c1_i32_2 : i32
    %7 = arith.extui %6 : i1 to i32
    %c0_i32_3 = arith.constant 0 : i32
    %8 = arith.cmpi ne, %7, %c0_i32_3 : i32
    scf.if %8 {
      %c1_i32_14 = arith.constant 1 : i32
      %30 = arith.addi %1, %c1_i32_14 : i32
      %c1_i32_15 = arith.constant 1 : i32
      %31 = arith.addi %1, %c1_i32_15 : i32
      %c2_i32_16 = arith.constant 2 : i32
      %c0_i32_17 = arith.constant 0 : i32
      %32 = arith.cmpi eq, %c2_i32_16, %c0_i32_17 : i32
      %c1_i32_18 = arith.constant 1 : i32
      %33 = arith.select %32, %c1_i32_18, %c2_i32_16 : i32
      %34 = arith.remsi %31, %33 : i32
      %c0_i32_19 = arith.constant 0 : i32
      %35 = arith.cmpi ne, %34, %c0_i32_19 : i32
      %c0_i32_20 = arith.constant 0 : i32
      %36 = arith.cmpi slt, %34, %c0_i32_20 : i32
      %c0_i32_21 = arith.constant 0 : i32
      %37 = arith.cmpi slt, %33, %c0_i32_21 : i32
      %38 = arith.xori %36, %37 : i1
      %39 = arith.andi %38, %35 : i1
      %40 = arith.addi %34, %33 : i32
      %41 = arith.select %39, %40, %34 : i32
      %c64_i32_22 = arith.constant 64 : i32
      %42 = arith.muli %30, %c64_i32_22 : i32
      %c64_i32_23 = arith.constant 64 : i32
      %43 = arith.muli %41, %c64_i32_23 : i32
      %c0_i32_24 = arith.constant 0 : i32
      %44 = arith.addi %42, %c0_i32_24 : i32
      %45 = arith.index_cast %44 : i32 to index
      %46 = memref.load %arg2[%45] : memref<128xi32, #tpu.memory_space<smem>>
      %c0_i32_25 = arith.constant 0 : i32
      %47 = arith.addi %43, %c0_i32_25 : i32
      %c0_i32_26 = arith.constant 0 : i32
      %48 = tpu.memref_slice %arg3[%46, %c0_i32_26] : memref<512x128xf32, #tpu.memory_space<any>> -> memref<1x128xf32, #tpu.memory_space<any>>
      %c0_i32_27 = arith.constant 0 : i32
      %49 = tpu.memref_slice %arg5[%47, %c0_i32_27] : memref<128x128xf32, #tpu.memory_space<vmem>> -> memref<1x128xf32, #tpu.memory_space<vmem>>
      %50 = tpu.memref_slice %arg6[%41] : memref<2x!tpu.dma_semaphore, #tpu.memory_space<semaphore_mem>> -> memref<1x!tpu.dma_semaphore, #tpu.memory_space<semaphore_mem>>
      %51 = tpu.memref_squeeze %50 : memref<1x!tpu.dma_semaphore, #tpu.memory_space<semaphore_mem>> -> memref<!tpu.dma_semaphore, #tpu.memory_space<semaphore_mem>>
      tpu.enqueue_dma source(%48 : memref<1x128xf32, #tpu.memory_space<any>>) target(%49 : memref<1x128xf32, #tpu.memory_space<vmem>>) target_semaphore(%51 : memref<!tpu.dma_semaphore, #tpu.memory_space<semaphore_mem>>)
      %c1_i32_28 = arith.constant 1 : i32
      %52 = arith.addi %42, %c1_i32_28 : i32
      %53 = arith.index_cast %52 : i32 to index
      %54 = memref.load %arg2[%53] : memref<128xi32, #tpu.memory_space<smem>>
      %c1_i32_29 = arith.constant 1 : i32
      %55 = arith.addi %43, %c1_i32_29 : i32
      %c0_i32_30 = arith.constant 0 : i32
      %56 = tpu.memref_slice %arg3[%54, %c0_i32_30] : memref<512x128xf32, #tpu.memory_space<any>> -> memref<1x128xf32, #tpu.memory_space<any>>
      %c0_i32_31 = arith.constant 0 : i32
      %57 = tpu.memref_slice %arg5[%55, %c0_i32_31] : memref<128x128xf32, #tpu.memory_space<vmem>> -> memref<1x128xf32, #tpu.memory_space<vmem>>
      %58 = tpu.memref_slice %arg6[%41] : memref<2x!tpu.dma_semaphore, #tpu.memory_space<semaphore_mem>> -> memref<1x!tpu.dma_semaphore, #tpu.memory_space<semaphore_mem>>
      %59 = tpu.memref_squeeze %58 : memref<1x!tpu.dma_semaphore, #tpu.memory_space<semaphore_mem>> -> memref<!tpu.dma_semaphore, #tpu.memory_space<semaphore_mem>>
      tpu.enqueue_dma source(%56 : memref<1x128xf32, #tpu.memory_space<any>>) target(%57 : memref<1x128xf32, #tpu.memory_space<vmem>>) target_semaphore(%59 : memref<!tpu.dma_semaphore, #tpu.memory_space<semaphore_mem>>)
      %c2_i32_32 = arith.constant 2 : i32
      %60 = arith.addi %42, %c2_i32_32 : i32
      %61 = arith.index_cast %60 : i32 to index
      %62 = memref.load %arg2[%61] : memref<128xi32, #tpu.memory_space<smem>>
      %c2_i32_33 = arith.constant 2 : i32
      %63 = arith.addi %43, %c2_i32_33 : i32
      %c0_i32_34 = arith.constant 0 : i32
      %64 = tpu.memref_slice %arg3[%62, %c0_i32_34] : memref<512x128xf32, #tpu.memory_space<any>> -> memref<1x128xf32, #tpu.memory_space<any>>
      %c0_i32_35 = arith.constant 0 : i32
      %65 = tpu.memref_slice %arg5[%63, %c0_i32_35] : memref<128x128xf32, #tpu.memory_space<vmem>> -> memref<1x128xf32, #tpu.memory_space<vmem>>
      %66 = tpu.memref_slice %arg6[%41] : memref<2x!tpu.dma_semaphore, #tpu.memory_space<semaphore_mem>> -> memref<1x!tpu.dma_semaphore, #tpu.memory_space<semaphore_mem>>
      %67 = tpu.memref_squeeze %66 : memref<1x!tpu.dma_semaphore, #tpu.memory_space<semaphore_mem>> -> memref<!tpu.dma_semaphore, #tpu.memory_space<semaphore_mem>>
      tpu.enqueue_dma source(%64 : memref<1x128xf32, #tpu.memory_space<any>>) target(%65 : memref<1x128xf32, #tpu.memory_space<vmem>>) target_semaphore(%67 : memref<!tpu.dma_semaphore, #tpu.memory_space<semaphore_mem>>)
      %c3_i32 = arith.constant 3 : i32
      %68 = arith.addi %42, %c3_i32 : i32
      %69 = arith.index_cast %68 : i32 to index
      %70 = memref.load %arg2[%69] : memref<128xi32, #tpu.memory_space<smem>>
      %c3_i32_36 = arith.constant 3 : i32
      %71 = arith.addi %43, %c3_i32_36 : i32
      %c0_i32_37 = arith.constant 0 : i32
      %72 = tpu.memref_slice %arg3[%70, %c0_i32_37] : memref<512x128xf32, #tpu.memory_space<any>> -> memref<1x128xf32, #tpu.memory_space<any>>
      %c0_i32_38 = arith.constant 0 : i32
      %73 = tpu.memref_slice %arg5[%71, %c0_i32_38] : memref<128x128xf32, #tpu.memory_space<vmem>> -> memref<1x128xf32, #tpu.memory_space<vmem>>
      %74 = tpu.memref_slice %arg6[%41] : memref<2x!tpu.dma_semaphore, #tpu.memory_space<semaphore_mem>> -> memref<1x!tpu.dma_semaphore, #tpu.memory_space<semaphore_mem>>
      %75 = tpu.memref_squeeze %74 : memref<1x!tpu.dma_semaphore, #tpu.memory_space<semaphore_mem>> -> memref<!tpu.dma_semaphore, #tpu.memory_space<semaphore_mem>>
      tpu.enqueue_dma source(%72 : memref<1x128xf32, #tpu.memory_space<any>>) target(%73 : memref<1x128xf32, #tpu.memory_space<vmem>>) target_semaphore(%75 : memref<!tpu.dma_semaphore, #tpu.memory_space<semaphore_mem>>)
      %c4_i32 = arith.constant 4 : i32
      %76 = arith.addi %42, %c4_i32 : i32
      %77 = arith.index_cast %76 : i32 to index
      %78 = memref.load %arg2[%77] : memref<128xi32, #tpu.memory_space<smem>>
      %c4_i32_39 = arith.constant 4 : i32
      %79 = arith.addi %43, %c4_i32_39 : i32
      %c0_i32_40 = arith.constant 0 : i32
      %80 = tpu.memref_slice %arg3[%78, %c0_i32_40] : memref<512x128xf32, #tpu.memory_space<any>> -> memref<1x128xf32, #tpu.memory_space<any>>
      %c0_i32_41 = arith.constant 0 : i32
      %81 = tpu.memref_slice %arg5[%79, %c0_i32_41] : memref<128x128xf32, #tpu.memory_space<vmem>> -> memref<1x128xf32, #tpu.memory_space<vmem>>
      %82 = tpu.memref_slice %arg6[%41] : memref<2x!tpu.dma_semaphore, #tpu.memory_space<semaphore_mem>> -> memref<1x!tpu.dma_semaphore, #tpu.memory_space<semaphore_mem>>
      %83 = tpu.memref_squeeze %82 : memref<1x!tpu.dma_semaphore, #tpu.memory_space<semaphore_mem>> -> memref<!tpu.dma_semaphore, #tpu.memory_space<semaphore_mem>>
      tpu.enqueue_dma source(%80 : memref<1x128xf32, #tpu.memory_space<any>>) target(%81 : memref<1x128xf32, #tpu.memory_space<vmem>>) target_semaphore(%83 : memref<!tpu.dma_semaphore, #tpu.memory_space<semaphore_mem>>)
      %c5_i32 = arith.constant 5 : i32
      %84 = arith.addi %42, %c5_i32 : i32
      %85 = arith.index_cast %84 : i32 to index
      %86 = memref.load %arg2[%85] : memref<128xi32, #tpu.memory_space<smem>>
      %c5_i32_42 = arith.constant 5 : i32
      %87 = arith.addi %43, %c5_i32_42 : i32
      %c0_i32_43 = arith.constant 0 : i32
      %88 = tpu.memref_slice %arg3[%86, %c0_i32_43] : memref<512x128xf32, #tpu.memory_space<any>> -> memref<1x128xf32, #tpu.memory_space<any>>
      %c0_i32_44 = arith.constant 0 : i32
      %89 = tpu.memref_slice %arg5[%87, %c0_i32_44] : memref<128x128xf32, #tpu.memory_space<vmem>> -> memref<1x128xf32, #tpu.memory_space<vmem>>
      %90 = tpu.memref_slice %arg6[%41] : memref<2x!tpu.dma_semaphore, #tpu.memory_space<semaphore_mem>> -> memref<1x!tpu.dma_semaphore, #tpu.memory_space<semaphore_mem>>
      %91 = tpu.memref_squeeze %90 : memref<1x!tpu.dma_semaphore, #tpu.memory_space<semaphore_mem>> -> memref<!tpu.dma_semaphore, #tpu.memory_space<semaphore_mem>>
      tpu.enqueue_dma source(%88 : memref<1x128xf32, #tpu.memory_space<any>>) target(%89 : memref<1x128xf32, #tpu.memory_space<vmem>>) target_semaphore(%91 : memref<!tpu.dma_semaphore, #tpu.memory_space<semaphore_mem>>)
      %c6_i32 = arith.constant 6 : i32
      %92 = arith.addi %42, %c6_i32 : i32
      %93 = arith.index_cast %92 : i32 to index
      %94 = memref.load %arg2[%93] : memref<128xi32, #tpu.memory_space<smem>>
      %c6_i32_45 = arith.constant 6 : i32
      %95 = arith.addi %43, %c6_i32_45 : i32
      %c0_i32_46 = arith.constant 0 : i32
      %96 = tpu.memref_slice %arg3[%94, %c0_i32_46] : memref<512x128xf32, #tpu.memory_space<any>> -> memref<1x128xf32, #tpu.memory_space<any>>
      %c0_i32_47 = arith.constant 0 : i32
      %97 = tpu.memref_slice %arg5[%95, %c0_i32_47] : memref<128x128xf32, #tpu.memory_space<vmem>> -> memref<1x128xf32, #tpu.memory_space<vmem>>
      %98 = tpu.memref_slice %arg6[%41] : memref<2x!tpu.dma_semaphore, #tpu.memory_space<semaphore_mem>> -> memref<1x!tpu.dma_semaphore, #tpu.memory_space<semaphore_mem>>
      %99 = tpu.memref_squeeze %98 : memref<1x!tpu.dma_semaphore, #tpu.memory_space<semaphore_mem>> -> memref<!tpu.dma_semaphore, #tpu.memory_space<semaphore_mem>>
      tpu.enqueue_dma source(%96 : memref<1x128xf32, #tpu.memory_space<any>>) target(%97 : memref<1x128xf32, #tpu.memory_space<vmem>>) target_semaphore(%99 : memref<!tpu.dma_semaphore, #tpu.memory_space<semaphore_mem>>)
      %c7_i32 = arith.constant 7 : i32
      %100 = arith.addi %42, %c7_i32 : i32
      %101 = arith.index_cast %100 : i32 to index
      %102 = memref.load %arg2[%101] : memref<128xi32, #tpu.memory_space<smem>>
      %c7_i32_48 = arith.constant 7 : i32
      %103 = arith.addi %43, %c7_i32_48 : i32
      %c0_i32_49 = arith.constant 0 : i32
      %104 = tpu.memref_slice %arg3[%102, %c0_i32_49] : memref<512x128xf32, #tpu.memory_space<any>> -> memref<1x128xf32, #tpu.memory_space<any>>
      %c0_i32_50 = arith.constant 0 : i32
      %105 = tpu.memref_slice %arg5[%103, %c0_i32_50] : memref<128x128xf32, #tpu.memory_space<vmem>> -> memref<1x128xf32, #tpu.memory_space<vmem>>
      %106 = tpu.memref_slice %arg6[%41] : memref<2x!tpu.dma_semaphore, #tpu.memory_space<semaphore_mem>> -> memref<1x!tpu.dma_semaphore, #tpu.memory_space<semaphore_mem>>
      %107 = tpu.memref_squeeze %106 : memref<1x!tpu.dma_semaphore, #tpu.memory_space<semaphore_mem>> -> memref<!tpu.dma_semaphore, #tpu.memory_space<semaphore_mem>>
      tpu.enqueue_dma source(%104 : memref<1x128xf32, #tpu.memory_space<any>>) target(%105 : memref<1x128xf32, #tpu.memory_space<vmem>>) target_semaphore(%107 : memref<!tpu.dma_semaphore, #tpu.memory_space<semaphore_mem>>)
      %c8_i32 = arith.constant 8 : i32
      %108 = arith.addi %42, %c8_i32 : i32
      %109 = arith.index_cast %108 : i32 to index
      %110 = memref.load %arg2[%109] : memref<128xi32, #tpu.memory_space<smem>>
      %c8_i32_51 = arith.constant 8 : i32
      %111 = arith.addi %43, %c8_i32_51 : i32
      %c0_i32_52 = arith.constant 0 : i32
      %112 = tpu.memref_slice %arg3[%110, %c0_i32_52] : memref<512x128xf32, #tpu.memory_space<any>> -> memref<1x128xf32, #tpu.memory_space<any>>
      %c0_i32_53 = arith.constant 0 : i32
      %113 = tpu.memref_slice %arg5[%111, %c0_i32_53] : memref<128x128xf32, #tpu.memory_space<vmem>> -> memref<1x128xf32, #tpu.memory_space<vmem>>
      %114 = tpu.memref_slice %arg6[%41] : memref<2x!tpu.dma_semaphore, #tpu.memory_space<semaphore_mem>> -> memref<1x!tpu.dma_semaphore, #tpu.memory_space<semaphore_mem>>
      %115 = tpu.memref_squeeze %114 : memref<1x!tpu.dma_semaphore, #tpu.memory_space<semaphore_mem>> -> memref<!tpu.dma_semaphore, #tpu.memory_space<semaphore_mem>>
      tpu.enqueue_dma source(%112 : memref<1x128xf32, #tpu.memory_space<any>>) target(%113 : memref<1x128xf32, #tpu.memory_space<vmem>>) target_semaphore(%115 : memref<!tpu.dma_semaphore, #tpu.memory_space<semaphore_mem>>)
      %c9_i32 = arith.constant 9 : i32
      %116 = arith.addi %42, %c9_i32 : i32
      %117 = arith.index_cast %116 : i32 to index
      %118 = memref.load %arg2[%117] : memref<128xi32, #tpu.memory_space<smem>>
      %c9_i32_54 = arith.constant 9 : i32
      %119 = arith.addi %43, %c9_i32_54 : i32
      %c0_i32_55 = arith.constant 0 : i32
      %120 = tpu.memref_slice %arg3[%118, %c0_i32_55] : memref<512x128xf32, #tpu.memory_space<any>> -> memref<1x128xf32, #tpu.memory_space<any>>
      %c0_i32_56 = arith.constant 0 : i32
      %121 = tpu.memref_slice %arg5[%119, %c0_i32_56] : memref<128x128xf32, #tpu.memory_space<vmem>> -> memref<1x128xf32, #tpu.memory_space<vmem>>
      %122 = tpu.memref_slice %arg6[%41] : memref<2x!tpu.dma_semaphore, #tpu.memory_space<semaphore_mem>> -> memref<1x!tpu.dma_semaphore, #tpu.memory_space<semaphore_mem>>
      %123 = tpu.memref_squeeze %122 : memref<1x!tpu.dma_semaphore, #tpu.memory_space<semaphore_mem>> -> memref<!tpu.dma_semaphore, #tpu.memory_space<semaphore_mem>>
      tpu.enqueue_dma source(%120 : memref<1x128xf32, #tpu.memory_space<any>>) target(%121 : memref<1x128xf32, #tpu.memory_space<vmem>>) target_semaphore(%123 : memref<!tpu.dma_semaphore, #tpu.memory_space<semaphore_mem>>)
      %c10_i32 = arith.constant 10 : i32
      %124 = arith.addi %42, %c10_i32 : i32
      %125 = arith.index_cast %124 : i32 to index
      %126 = memref.load %arg2[%125] : memref<128xi32, #tpu.memory_space<smem>>
      %c10_i32_57 = arith.constant 10 : i32
      %127 = arith.addi %43, %c10_i32_57 : i32
      %c0_i32_58 = arith.constant 0 : i32
      %128 = tpu.memref_slice %arg3[%126, %c0_i32_58] : memref<512x128xf32, #tpu.memory_space<any>> -> memref<1x128xf32, #tpu.memory_space<any>>
      %c0_i32_59 = arith.constant 0 : i32
      %129 = tpu.memref_slice %arg5[%127, %c0_i32_59] : memref<128x128xf32, #tpu.memory_space<vmem>> -> memref<1x128xf32, #tpu.memory_space<vmem>>
      %130 = tpu.memref_slice %arg6[%41] : memref<2x!tpu.dma_semaphore, #tpu.memory_space<semaphore_mem>> -> memref<1x!tpu.dma_semaphore, #tpu.memory_space<semaphore_mem>>
      %131 = tpu.memref_squeeze %130 : memref<1x!tpu.dma_semaphore, #tpu.memory_space<semaphore_mem>> -> memref<!tpu.dma_semaphore, #tpu.memory_space<semaphore_mem>>
      tpu.enqueue_dma source(%128 : memref<1x128xf32, #tpu.memory_space<any>>) target(%129 : memref<1x128xf32, #tpu.memory_space<vmem>>) target_semaphore(%131 : memref<!tpu.dma_semaphore, #tpu.memory_space<semaphore_mem>>)
      %c11_i32 = arith.constant 11 : i32
      %132 = arith.addi %42, %c11_i32 : i32
      %133 = arith.index_cast %132 : i32 to index
      %134 = memref.load %arg2[%133] : memref<128xi32, #tpu.memory_space<smem>>
      %c11_i32_60 = arith.constant 11 : i32
      %135 = arith.addi %43, %c11_i32_60 : i32
      %c0_i32_61 = arith.constant 0 : i32
      %136 = tpu.memref_slice %arg3[%134, %c0_i32_61] : memref<512x128xf32, #tpu.memory_space<any>> -> memref<1x128xf32, #tpu.memory_space<any>>
      %c0_i32_62 = arith.constant 0 : i32
      %137 = tpu.memref_slice %arg5[%135, %c0_i32_62] : memref<128x128xf32, #tpu.memory_space<vmem>> -> memref<1x128xf32, #tpu.memory_space<vmem>>
      %138 = tpu.memref_slice %arg6[%41] : memref<2x!tpu.dma_semaphore, #tpu.memory_space<semaphore_mem>> -> memref<1x!tpu.dma_semaphore, #tpu.memory_space<semaphore_mem>>
      %139 = tpu.memref_squeeze %138 : memref<1x!tpu.dma_semaphore, #tpu.memory_space<semaphore_mem>> -> memref<!tpu.dma_semaphore, #tpu.memory_space<semaphore_mem>>
      tpu.enqueue_dma source(%136 : memref<1x128xf32, #tpu.memory_space<any>>) target(%137 : memref<1x128xf32, #tpu.memory_space<vmem>>) target_semaphore(%139 : memref<!tpu.dma_semaphore, #tpu.memory_space<semaphore_mem>>)
      %c12_i32 = arith.constant 12 : i32
      %140 = arith.addi %42, %c12_i32 : i32
      %141 = arith.index_cast %140 : i32 to index
      %142 = memref.load %arg2[%141] : memref<128xi32, #tpu.memory_space<smem>>
      %c12_i32_63 = arith.constant 12 : i32
      %143 = arith.addi %43, %c12_i32_63 : i32
      %c0_i32_64 = arith.constant 0 : i32
      %144 = tpu.memref_slice %arg3[%142, %c0_i32_64] : memref<512x128xf32, #tpu.memory_space<any>> -> memref<1x128xf32, #tpu.memory_space<any>>
      %c0_i32_65 = arith.constant 0 : i32
      %145 = tpu.memref_slice %arg5[%143, %c0_i32_65] : memref<128x128xf32, #tpu.memory_space<vmem>> -> memref<1x128xf32, #tpu.memory_space<vmem>>
      %146 = tpu.memref_slice %arg6[%41] : memref<2x!tpu.dma_semaphore, #tpu.memory_space<semaphore_mem>> -> memref<1x!tpu.dma_semaphore, #tpu.memory_space<semaphore_mem>>
      %147 = tpu.memref_squeeze %146 : memref<1x!tpu.dma_semaphore, #tpu.memory_space<semaphore_mem>> -> memref<!tpu.dma_semaphore, #tpu.memory_space<semaphore_mem>>
      tpu.enqueue_dma source(%144 : memref<1x128xf32, #tpu.memory_space<any>>) target(%145 : memref<1x128xf32, #tpu.memory_space<vmem>>) target_semaphore(%147 : memref<!tpu.dma_semaphore, #tpu.memory_space<semaphore_mem>>)
      %c13_i32 = arith.constant 13 : i32
      %148 = arith.addi %42, %c13_i32 : i32
      %149 = arith.index_cast %148 : i32 to index
      %150 = memref.load %arg2[%149] : memref<128xi32, #tpu.memory_space<smem>>
      %c13_i32_66 = arith.constant 13 : i32
      %151 = arith.addi %43, %c13_i32_66 : i32
      %c0_i32_67 = arith.constant 0 : i32
      %152 = tpu.memref_slice %arg3[%150, %c0_i32_67] : memref<512x128xf32, #tpu.memory_space<any>> -> memref<1x128xf32, #tpu.memory_space<any>>
      %c0_i32_68 = arith.constant 0 : i32
      %153 = tpu.memref_slice %arg5[%151, %c0_i32_68] : memref<128x128xf32, #tpu.memory_space<vmem>> -> memref<1x128xf32, #tpu.memory_space<vmem>>
      %154 = tpu.memref_slice %arg6[%41] : memref<2x!tpu.dma_semaphore, #tpu.memory_space<semaphore_mem>> -> memref<1x!tpu.dma_semaphore, #tpu.memory_space<semaphore_mem>>
      %155 = tpu.memref_squeeze %154 : memref<1x!tpu.dma_semaphore, #tpu.memory_space<semaphore_mem>> -> memref<!tpu.dma_semaphore, #tpu.memory_space<semaphore_mem>>
      tpu.enqueue_dma source(%152 : memref<1x128xf32, #tpu.memory_space<any>>) target(%153 : memref<1x128xf32, #tpu.memory_space<vmem>>) target_semaphore(%155 : memref<!tpu.dma_semaphore, #tpu.memory_space<semaphore_mem>>)
      %c14_i32 = arith.constant 14 : i32
      %156 = arith.addi %42, %c14_i32 : i32
      %157 = arith.index_cast %156 : i32 to index
      %158 = memref.load %arg2[%157] : memref<128xi32, #tpu.memory_space<smem>>
      %c14_i32_69 = arith.constant 14 : i32
      %159 = arith.addi %43, %c14_i32_69 : i32
      %c0_i32_70 = arith.constant 0 : i32
      %160 = tpu.memref_slice %arg3[%158, %c0_i32_70] : memref<512x128xf32, #tpu.memory_space<any>> -> memref<1x128xf32, #tpu.memory_space<any>>
      %c0_i32_71 = arith.constant 0 : i32
      %161 = tpu.memref_slice %arg5[%159, %c0_i32_71] : memref<128x128xf32, #tpu.memory_space<vmem>> -> memref<1x128xf32, #tpu.memory_space<vmem>>
      %162 = tpu.memref_slice %arg6[%41] : memref<2x!tpu.dma_semaphore, #tpu.memory_space<semaphore_mem>> -> memref<1x!tpu.dma_semaphore, #tpu.memory_space<semaphore_mem>>
      %163 = tpu.memref_squeeze %162 : memref<1x!tpu.dma_semaphore, #tpu.memory_space<semaphore_mem>> -> memref<!tpu.dma_semaphore, #tpu.memory_space<semaphore_mem>>
      tpu.enqueue_dma source(%160 : memref<1x128xf32, #tpu.memory_space<any>>) target(%161 : memref<1x128xf32, #tpu.memory_space<vmem>>) target_semaphore(%163 : memref<!tpu.dma_semaphore, #tpu.memory_space<semaphore_mem>>)
      %c15_i32 = arith.constant 15 : i32
      %164 = arith.addi %42, %c15_i32 : i32
      %165 = arith.index_cast %164 : i32 to index
      %166 = memref.load %arg2[%165] : memref<128xi32, #tpu.memory_space<smem>>
      %c15_i32_72 = arith.constant 15 : i32
      %167 = arith.addi %43, %c15_i32_72 : i32
      %c0_i32_73 = arith.constant 0 : i32
      %168 = tpu.memref_slice %arg3[%166, %c0_i32_73] : memref<512x128xf32, #tpu.memory_space<any>> -> memref<1x128xf32, #tpu.memory_space<any>>
      %c0_i32_74 = arith.constant 0 : i32
      %169 = tpu.memref_slice %arg5[%167, %c0_i32_74] : memref<128x128xf32, #tpu.memory_space<vmem>> -> memref<1x128xf32, #tpu.memory_space<vmem>>
      %170 = tpu.memref_slice %arg6[%41] : memref<2x!tpu.dma_semaphore, #tpu.memory_space<semaphore_mem>> -> memref<1x!tpu.dma_semaphore, #tpu.memory_space<semaphore_mem>>
      %171 = tpu.memref_squeeze %170 : memref<1x!tpu.dma_semaphore, #tpu.memory_space<semaphore_mem>> -> memref<!tpu.dma_semaphore, #tpu.memory_space<semaphore_mem>>
      tpu.enqueue_dma source(%168 : memref<1x128xf32, #tpu.memory_space<any>>) target(%169 : memref<1x128xf32, #tpu.memory_space<vmem>>) target_semaphore(%171 : memref<!tpu.dma_semaphore, #tpu.memory_space<semaphore_mem>>)
      %c16_i32 = arith.constant 16 : i32
      %172 = arith.addi %42, %c16_i32 : i32
      %173 = arith.index_cast %172 : i32 to index
      %174 = memref.load %arg2[%173] : memref<128xi32, #tpu.memory_space<smem>>
      %c16_i32_75 = arith.constant 16 : i32
      %175 = arith.addi %43, %c16_i32_75 : i32
      %c0_i32_76 = arith.constant 0 : i32
      %176 = tpu.memref_slice %arg3[%174, %c0_i32_76] : memref<512x128xf32, #tpu.memory_space<any>> -> memref<1x128xf32, #tpu.memory_space<any>>
      %c0_i32_77 = arith.constant 0 : i32
      %177 = tpu.memref_slice %arg5[%175, %c0_i32_77] : memref<128x128xf32, #tpu.memory_space<vmem>> -> memref<1x128xf32, #tpu.memory_space<vmem>>
      %178 = tpu.memref_slice %arg6[%41] : memref<2x!tpu.dma_semaphore, #tpu.memory_space<semaphore_mem>> -> memref<1x!tpu.dma_semaphore, #tpu.memory_space<semaphore_mem>>
      %179 = tpu.memref_squeeze %178 : memref<1x!tpu.dma_semaphore, #tpu.memory_space<semaphore_mem>> -> memref<!tpu.dma_semaphore, #tpu.memory_space<semaphore_mem>>
      tpu.enqueue_dma source(%176 : memref<1x128xf32, #tpu.memory_space<any>>) target(%177 : memref<1x128xf32, #tpu.memory_space<vmem>>) target_semaphore(%179 : memref<!tpu.dma_semaphore, #tpu.memory_space<semaphore_mem>>)
      %c17_i32 = arith.constant 17 : i32
      %180 = arith.addi %42, %c17_i32 : i32
      %181 = arith.index_cast %180 : i32 to index
      %182 = memref.load %arg2[%181] : memref<128xi32, #tpu.memory_space<smem>>
      %c17_i32_78 = arith.constant 17 : i32
      %183 = arith.addi %43, %c17_i32_78 : i32
      %c0_i32_79 = arith.constant 0 : i32
      %184 = tpu.memref_slice %arg3[%182, %c0_i32_79] : memref<512x128xf32, #tpu.memory_space<any>> -> memref<1x128xf32, #tpu.memory_space<any>>
      %c0_i32_80 = arith.constant 0 : i32
      %185 = tpu.memref_slice %arg5[%183, %c0_i32_80] : memref<128x128xf32, #tpu.memory_space<vmem>> -> memref<1x128xf32, #tpu.memory_space<vmem>>
      %186 = tpu.memref_slice %arg6[%41] : memref<2x!tpu.dma_semaphore, #tpu.memory_space<semaphore_mem>> -> memref<1x!tpu.dma_semaphore, #tpu.memory_space<semaphore_mem>>
      %187 = tpu.memref_squeeze %186 : memref<1x!tpu.dma_semaphore, #tpu.memory_space<semaphore_mem>> -> memref<!tpu.dma_semaphore, #tpu.memory_space<semaphore_mem>>
      tpu.enqueue_dma source(%184 : memref<1x128xf32, #tpu.memory_space<any>>) target(%185 : memref<1x128xf32, #tpu.memory_space<vmem>>) target_semaphore(%187 : memref<!tpu.dma_semaphore, #tpu.memory_space<semaphore_mem>>)
      %c18_i32 = arith.constant 18 : i32
      %188 = arith.addi %42, %c18_i32 : i32
      %189 = arith.index_cast %188 : i32 to index
      %190 = memref.load %arg2[%189] : memref<128xi32, #tpu.memory_space<smem>>
      %c18_i32_81 = arith.constant 18 : i32
      %191 = arith.addi %43, %c18_i32_81 : i32
      %c0_i32_82 = arith.constant 0 : i32
      %192 = tpu.memref_slice %arg3[%190, %c0_i32_82] : memref<512x128xf32, #tpu.memory_space<any>> -> memref<1x128xf32, #tpu.memory_space<any>>
      %c0_i32_83 = arith.constant 0 : i32
      %193 = tpu.memref_slice %arg5[%191, %c0_i32_83] : memref<128x128xf32, #tpu.memory_space<vmem>> -> memref<1x128xf32, #tpu.memory_space<vmem>>
      %194 = tpu.memref_slice %arg6[%41] : memref<2x!tpu.dma_semaphore, #tpu.memory_space<semaphore_mem>> -> memref<1x!tpu.dma_semaphore, #tpu.memory_space<semaphore_mem>>
      %195 = tpu.memref_squeeze %194 : memref<1x!tpu.dma_semaphore, #tpu.memory_space<semaphore_mem>> -> memref<!tpu.dma_semaphore, #tpu.memory_space<semaphore_mem>>
      tpu.enqueue_dma source(%192 : memref<1x128xf32, #tpu.memory_space<any>>) target(%193 : memref<1x128xf32, #tpu.memory_space<vmem>>) target_semaphore(%195 : memref<!tpu.dma_semaphore, #tpu.memory_space<semaphore_mem>>)
      %c19_i32 = arith.constant 19 : i32
      %196 = arith.addi %42, %c19_i32 : i32
      %197 = arith.index_cast %196 : i32 to index
      %198 = memref.load %arg2[%197] : memref<128xi32, #tpu.memory_space<smem>>
      %c19_i32_84 = arith.constant 19 : i32
      %199 = arith.addi %43, %c19_i32_84 : i32
      %c0_i32_85 = arith.constant 0 : i32
      %200 = tpu.memref_slice %arg3[%198, %c0_i32_85] : memref<512x128xf32, #tpu.memory_space<any>> -> memref<1x128xf32, #tpu.memory_space<any>>
      %c0_i32_86 = arith.constant 0 : i32
      %201 = tpu.memref_slice %arg5[%199, %c0_i32_86] : memref<128x128xf32, #tpu.memory_space<vmem>> -> memref<1x128xf32, #tpu.memory_space<vmem>>
      %202 = tpu.memref_slice %arg6[%41] : memref<2x!tpu.dma_semaphore, #tpu.memory_space<semaphore_mem>> -> memref<1x!tpu.dma_semaphore, #tpu.memory_space<semaphore_mem>>
      %203 = tpu.memref_squeeze %202 : memref<1x!tpu.dma_semaphore, #tpu.memory_space<semaphore_mem>> -> memref<!tpu.dma_semaphore, #tpu.memory_space<semaphore_mem>>
      tpu.enqueue_dma source(%200 : memref<1x128xf32, #tpu.memory_space<any>>) target(%201 : memref<1x128xf32, #tpu.memory_space<vmem>>) target_semaphore(%203 : memref<!tpu.dma_semaphore, #tpu.memory_space<semaphore_mem>>)
      %c20_i32 = arith.constant 20 : i32
      %204 = arith.addi %42, %c20_i32 : i32
      %205 = arith.index_cast %204 : i32 to index
      %206 = memref.load %arg2[%205] : memref<128xi32, #tpu.memory_space<smem>>
      %c20_i32_87 = arith.constant 20 : i32
      %207 = arith.addi %43, %c20_i32_87 : i32
      %c0_i32_88 = arith.constant 0 : i32
      %208 = tpu.memref_slice %arg3[%206, %c0_i32_88] : memref<512x128xf32, #tpu.memory_space<any>> -> memref<1x128xf32, #tpu.memory_space<any>>
      %c0_i32_89 = arith.constant 0 : i32
      %209 = tpu.memref_slice %arg5[%207, %c0_i32_89] : memref<128x128xf32, #tpu.memory_space<vmem>> -> memref<1x128xf32, #tpu.memory_space<vmem>>
      %210 = tpu.memref_slice %arg6[%41] : memref<2x!tpu.dma_semaphore, #tpu.memory_space<semaphore_mem>> -> memref<1x!tpu.dma_semaphore, #tpu.memory_space<semaphore_mem>>
      %211 = tpu.memref_squeeze %210 : memref<1x!tpu.dma_semaphore, #tpu.memory_space<semaphore_mem>> -> memref<!tpu.dma_semaphore, #tpu.memory_space<semaphore_mem>>
      tpu.enqueue_dma source(%208 : memref<1x128xf32, #tpu.memory_space<any>>) target(%209 : memref<1x128xf32, #tpu.memory_space<vmem>>) target_semaphore(%211 : memref<!tpu.dma_semaphore, #tpu.memory_space<semaphore_mem>>)
      %c21_i32 = arith.constant 21 : i32
      %212 = arith.addi %42, %c21_i32 : i32
      %213 = arith.index_cast %212 : i32 to index
      %214 = memref.load %arg2[%213] : memref<128xi32, #tpu.memory_space<smem>>
      %c21_i32_90 = arith.constant 21 : i32
      %215 = arith.addi %43, %c21_i32_90 : i32
      %c0_i32_91 = arith.constant 0 : i32
      %216 = tpu.memref_slice %arg3[%214, %c0_i32_91] : memref<512x128xf32, #tpu.memory_space<any>> -> memref<1x128xf32, #tpu.memory_space<any>>
      %c0_i32_92 = arith.constant 0 : i32
      %217 = tpu.memref_slice %arg5[%215, %c0_i32_92] : memref<128x128xf32, #tpu.memory_space<vmem>> -> memref<1x128xf32, #tpu.memory_space<vmem>>
      %218 = tpu.memref_slice %arg6[%41] : memref<2x!tpu.dma_semaphore, #tpu.memory_space<semaphore_mem>> -> memref<1x!tpu.dma_semaphore, #tpu.memory_space<semaphore_mem>>
      %219 = tpu.memref_squeeze %218 : memref<1x!tpu.dma_semaphore, #tpu.memory_space<semaphore_mem>> -> memref<!tpu.dma_semaphore, #tpu.memory_space<semaphore_mem>>
      tpu.enqueue_dma source(%216 : memref<1x128xf32, #tpu.memory_space<any>>) target(%217 : memref<1x128xf32, #tpu.memory_space<vmem>>) target_semaphore(%219 : memref<!tpu.dma_semaphore, #tpu.memory_space<semaphore_mem>>)
      %c22_i32 = arith.constant 22 : i32
      %220 = arith.addi %42, %c22_i32 : i32
      %221 = arith.index_cast %220 : i32 to index
      %222 = memref.load %arg2[%221] : memref<128xi32, #tpu.memory_space<smem>>
      %c22_i32_93 = arith.constant 22 : i32
      %223 = arith.addi %43, %c22_i32_93 : i32
      %c0_i32_94 = arith.constant 0 : i32
      %224 = tpu.memref_slice %arg3[%222, %c0_i32_94] : memref<512x128xf32, #tpu.memory_space<any>> -> memref<1x128xf32, #tpu.memory_space<any>>
      %c0_i32_95 = arith.constant 0 : i32
      %225 = tpu.memref_slice %arg5[%223, %c0_i32_95] : memref<128x128xf32, #tpu.memory_space<vmem>> -> memref<1x128xf32, #tpu.memory_space<vmem>>
      %226 = tpu.memref_slice %arg6[%41] : memref<2x!tpu.dma_semaphore, #tpu.memory_space<semaphore_mem>> -> memref<1x!tpu.dma_semaphore, #tpu.memory_space<semaphore_mem>>
      %227 = tpu.memref_squeeze %226 : memref<1x!tpu.dma_semaphore, #tpu.memory_space<semaphore_mem>> -> memref<!tpu.dma_semaphore, #tpu.memory_space<semaphore_mem>>
      tpu.enqueue_dma source(%224 : memref<1x128xf32, #tpu.memory_space<any>>) target(%225 : memref<1x128xf32, #tpu.memory_space<vmem>>) target_semaphore(%227 : memref<!tpu.dma_semaphore, #tpu.memory_space<semaphore_mem>>)
      %c23_i32 = arith.constant 23 : i32
      %228 = arith.addi %42, %c23_i32 : i32
      %229 = arith.index_cast %228 : i32 to index
      %230 = memref.load %arg2[%229] : memref<128xi32, #tpu.memory_space<smem>>
      %c23_i32_96 = arith.constant 23 : i32
      %231 = arith.addi %43, %c23_i32_96 : i32
      %c0_i32_97 = arith.constant 0 : i32
      %232 = tpu.memref_slice %arg3[%230, %c0_i32_97] : memref<512x128xf32, #tpu.memory_space<any>> -> memref<1x128xf32, #tpu.memory_space<any>>
      %c0_i32_98 = arith.constant 0 : i32
      %233 = tpu.memref_slice %arg5[%231, %c0_i32_98] : memref<128x128xf32, #tpu.memory_space<vmem>> -> memref<1x128xf32, #tpu.memory_space<vmem>>
      %234 = tpu.memref_slice %arg6[%41] : memref<2x!tpu.dma_semaphore, #tpu.memory_space<semaphore_mem>> -> memref<1x!tpu.dma_semaphore, #tpu.memory_space<semaphore_mem>>
      %235 = tpu.memref_squeeze %234 : memref<1x!tpu.dma_semaphore, #tpu.memory_space<semaphore_mem>> -> memref<!tpu.dma_semaphore, #tpu.memory_space<semaphore_mem>>
      tpu.enqueue_dma source(%232 : memref<1x128xf32, #tpu.memory_space<any>>) target(%233 : memref<1x128xf32, #tpu.memory_space<vmem>>) target_semaphore(%235 : memref<!tpu.dma_semaphore, #tpu.memory_space<semaphore_mem>>)
      %c24_i32 = arith.constant 24 : i32
      %236 = arith.addi %42, %c24_i32 : i32
      %237 = arith.index_cast %236 : i32 to index
      %238 = memref.load %arg2[%237] : memref<128xi32, #tpu.memory_space<smem>>
      %c24_i32_99 = arith.constant 24 : i32
      %239 = arith.addi %43, %c24_i32_99 : i32
      %c0_i32_100 = arith.constant 0 : i32
      %240 = tpu.memref_slice %arg3[%238, %c0_i32_100] : memref<512x128xf32, #tpu.memory_space<any>> -> memref<1x128xf32, #tpu.memory_space<any>>
      %c0_i32_101 = arith.constant 0 : i32
      %241 = tpu.memref_slice %arg5[%239, %c0_i32_101] : memref<128x128xf32, #tpu.memory_space<vmem>> -> memref<1x128xf32, #tpu.memory_space<vmem>>
      %242 = tpu.memref_slice %arg6[%41] : memref<2x!tpu.dma_semaphore, #tpu.memory_space<semaphore_mem>> -> memref<1x!tpu.dma_semaphore, #tpu.memory_space<semaphore_mem>>
      %243 = tpu.memref_squeeze %242 : memref<1x!tpu.dma_semaphore, #tpu.memory_space<semaphore_mem>> -> memref<!tpu.dma_semaphore, #tpu.memory_space<semaphore_mem>>
      tpu.enqueue_dma source(%240 : memref<1x128xf32, #tpu.memory_space<any>>) target(%241 : memref<1x128xf32, #tpu.memory_space<vmem>>) target_semaphore(%243 : memref<!tpu.dma_semaphore, #tpu.memory_space<semaphore_mem>>)
      %c25_i32 = arith.constant 25 : i32
      %244 = arith.addi %42, %c25_i32 : i32
      %245 = arith.index_cast %244 : i32 to index
      %246 = memref.load %arg2[%245] : memref<128xi32, #tpu.memory_space<smem>>
      %c25_i32_102 = arith.constant 25 : i32
      %247 = arith.addi %43, %c25_i32_102 : i32
      %c0_i32_103 = arith.constant 0 : i32
      %248 = tpu.memref_slice %arg3[%246, %c0_i32_103] : memref<512x128xf32, #tpu.memory_space<any>> -> memref<1x128xf32, #tpu.memory_space<any>>
      %c0_i32_104 = arith.constant 0 : i32
      %249 = tpu.memref_slice %arg5[%247, %c0_i32_104] : memref<128x128xf32, #tpu.memory_space<vmem>> -> memref<1x128xf32, #tpu.memory_space<vmem>>
      %250 = tpu.memref_slice %arg6[%41] : memref<2x!tpu.dma_semaphore, #tpu.memory_space<semaphore_mem>> -> memref<1x!tpu.dma_semaphore, #tpu.memory_space<semaphore_mem>>
      %251 = tpu.memref_squeeze %250 : memref<1x!tpu.dma_semaphore, #tpu.memory_space<semaphore_mem>> -> memref<!tpu.dma_semaphore, #tpu.memory_space<semaphore_mem>>
      tpu.enqueue_dma source(%248 : memref<1x128xf32, #tpu.memory_space<any>>) target(%249 : memref<1x128xf32, #tpu.memory_space<vmem>>) target_semaphore(%251 : memref<!tpu.dma_semaphore, #tpu.memory_space<semaphore_mem>>)
      %c26_i32 = arith.constant 26 : i32
      %252 = arith.addi %42, %c26_i32 : i32
      %253 = arith.index_cast %252 : i32 to index
      %254 = memref.load %arg2[%253] : memref<128xi32, #tpu.memory_space<smem>>
      %c26_i32_105 = arith.constant 26 : i32
      %255 = arith.addi %43, %c26_i32_105 : i32
      %c0_i32_106 = arith.constant 0 : i32
      %256 = tpu.memref_slice %arg3[%254, %c0_i32_106] : memref<512x128xf32, #tpu.memory_space<any>> -> memref<1x128xf32, #tpu.memory_space<any>>
      %c0_i32_107 = arith.constant 0 : i32
      %257 = tpu.memref_slice %arg5[%255, %c0_i32_107] : memref<128x128xf32, #tpu.memory_space<vmem>> -> memref<1x128xf32, #tpu.memory_space<vmem>>
      %258 = tpu.memref_slice %arg6[%41] : memref<2x!tpu.dma_semaphore, #tpu.memory_space<semaphore_mem>> -> memref<1x!tpu.dma_semaphore, #tpu.memory_space<semaphore_mem>>
      %259 = tpu.memref_squeeze %258 : memref<1x!tpu.dma_semaphore, #tpu.memory_space<semaphore_mem>> -> memref<!tpu.dma_semaphore, #tpu.memory_space<semaphore_mem>>
      tpu.enqueue_dma source(%256 : memref<1x128xf32, #tpu.memory_space<any>>) target(%257 : memref<1x128xf32, #tpu.memory_space<vmem>>) target_semaphore(%259 : memref<!tpu.dma_semaphore, #tpu.memory_space<semaphore_mem>>)
      %c27_i32 = arith.constant 27 : i32
      %260 = arith.addi %42, %c27_i32 : i32
      %261 = arith.index_cast %260 : i32 to index
      %262 = memref.load %arg2[%261] : memref<128xi32, #tpu.memory_space<smem>>
      %c27_i32_108 = arith.constant 27 : i32
      %263 = arith.addi %43, %c27_i32_108 : i32
      %c0_i32_109 = arith.constant 0 : i32
      %264 = tpu.memref_slice %arg3[%262, %c0_i32_109] : memref<512x128xf32, #tpu.memory_space<any>> -> memref<1x128xf32, #tpu.memory_space<any>>
      %c0_i32_110 = arith.constant 0 : i32
      %265 = tpu.memref_slice %arg5[%263, %c0_i32_110] : memref<128x128xf32, #tpu.memory_space<vmem>> -> memref<1x128xf32, #tpu.memory_space<vmem>>
      %266 = tpu.memref_slice %arg6[%41] : memref<2x!tpu.dma_semaphore, #tpu.memory_space<semaphore_mem>> -> memref<1x!tpu.dma_semaphore, #tpu.memory_space<semaphore_mem>>
      %267 = tpu.memref_squeeze %266 : memref<1x!tpu.dma_semaphore, #tpu.memory_space<semaphore_mem>> -> memref<!tpu.dma_semaphore, #tpu.memory_space<semaphore_mem>>
      tpu.enqueue_dma source(%264 : memref<1x128xf32, #tpu.memory_space<any>>) target(%265 : memref<1x128xf32, #tpu.memory_space<vmem>>) target_semaphore(%267 : memref<!tpu.dma_semaphore, #tpu.memory_space<semaphore_mem>>)
      %c28_i32 = arith.constant 28 : i32
      %268 = arith.addi %42, %c28_i32 : i32
      %269 = arith.index_cast %268 : i32 to index
      %270 = memref.load %arg2[%269] : memref<128xi32, #tpu.memory_space<smem>>
      %c28_i32_111 = arith.constant 28 : i32
      %271 = arith.addi %43, %c28_i32_111 : i32
      %c0_i32_112 = arith.constant 0 : i32
      %272 = tpu.memref_slice %arg3[%270, %c0_i32_112] : memref<512x128xf32, #tpu.memory_space<any>> -> memref<1x128xf32, #tpu.memory_space<any>>
      %c0_i32_113 = arith.constant 0 : i32
      %273 = tpu.memref_slice %arg5[%271, %c0_i32_113] : memref<128x128xf32, #tpu.memory_space<vmem>> -> memref<1x128xf32, #tpu.memory_space<vmem>>
      %274 = tpu.memref_slice %arg6[%41] : memref<2x!tpu.dma_semaphore, #tpu.memory_space<semaphore_mem>> -> memref<1x!tpu.dma_semaphore, #tpu.memory_space<semaphore_mem>>
      %275 = tpu.memref_squeeze %274 : memref<1x!tpu.dma_semaphore, #tpu.memory_space<semaphore_mem>> -> memref<!tpu.dma_semaphore, #tpu.memory_space<semaphore_mem>>
      tpu.enqueue_dma source(%272 : memref<1x128xf32, #tpu.memory_space<any>>) target(%273 : memref<1x128xf32, #tpu.memory_space<vmem>>) target_semaphore(%275 : memref<!tpu.dma_semaphore, #tpu.memory_space<semaphore_mem>>)
      %c29_i32 = arith.constant 29 : i32
      %276 = arith.addi %42, %c29_i32 : i32
      %277 = arith.index_cast %276 : i32 to index
      %278 = memref.load %arg2[%277] : memref<128xi32, #tpu.memory_space<smem>>
      %c29_i32_114 = arith.constant 29 : i32
      %279 = arith.addi %43, %c29_i32_114 : i32
      %c0_i32_115 = arith.constant 0 : i32
      %280 = tpu.memref_slice %arg3[%278, %c0_i32_115] : memref<512x128xf32, #tpu.memory_space<any>> -> memref<1x128xf32, #tpu.memory_space<any>>
      %c0_i32_116 = arith.constant 0 : i32
      %281 = tpu.memref_slice %arg5[%279, %c0_i32_116] : memref<128x128xf32, #tpu.memory_space<vmem>> -> memref<1x128xf32, #tpu.memory_space<vmem>>
      %282 = tpu.memref_slice %arg6[%41] : memref<2x!tpu.dma_semaphore, #tpu.memory_space<semaphore_mem>> -> memref<1x!tpu.dma_semaphore, #tpu.memory_space<semaphore_mem>>
      %283 = tpu.memref_squeeze %282 : memref<1x!tpu.dma_semaphore, #tpu.memory_space<semaphore_mem>> -> memref<!tpu.dma_semaphore, #tpu.memory_space<semaphore_mem>>
      tpu.enqueue_dma source(%280 : memref<1x128xf32, #tpu.memory_space<any>>) target(%281 : memref<1x128xf32, #tpu.memory_space<vmem>>) target_semaphore(%283 : memref<!tpu.dma_semaphore, #tpu.memory_space<semaphore_mem>>)
      %c30_i32 = arith.constant 30 : i32
      %284 = arith.addi %42, %c30_i32 : i32
      %285 = arith.index_cast %284 : i32 to index
      %286 = memref.load %arg2[%285] : memref<128xi32, #tpu.memory_space<smem>>
      %c30_i32_117 = arith.constant 30 : i32
      %287 = arith.addi %43, %c30_i32_117 : i32
      %c0_i32_118 = arith.constant 0 : i32
      %288 = tpu.memref_slice %arg3[%286, %c0_i32_118] : memref<512x128xf32, #tpu.memory_space<any>> -> memref<1x128xf32, #tpu.memory_space<any>>
      %c0_i32_119 = arith.constant 0 : i32
      %289 = tpu.memref_slice %arg5[%287, %c0_i32_119] : memref<128x128xf32, #tpu.memory_space<vmem>> -> memref<1x128xf32, #tpu.memory_space<vmem>>
      %290 = tpu.memref_slice %arg6[%41] : memref<2x!tpu.dma_semaphore, #tpu.memory_space<semaphore_mem>> -> memref<1x!tpu.dma_semaphore, #tpu.memory_space<semaphore_mem>>
      %291 = tpu.memref_squeeze %290 : memref<1x!tpu.dma_semaphore, #tpu.memory_space<semaphore_mem>> -> memref<!tpu.dma_semaphore, #tpu.memory_space<semaphore_mem>>
      tpu.enqueue_dma source(%288 : memref<1x128xf32, #tpu.memory_space<any>>) target(%289 : memref<1x128xf32, #tpu.memory_space<vmem>>) target_semaphore(%291 : memref<!tpu.dma_semaphore, #tpu.memory_space<semaphore_mem>>)
      %c31_i32 = arith.constant 31 : i32
      %292 = arith.addi %42, %c31_i32 : i32
      %293 = arith.index_cast %292 : i32 to index
      %294 = memref.load %arg2[%293] : memref<128xi32, #tpu.memory_space<smem>>
      %c31_i32_120 = arith.constant 31 : i32
      %295 = arith.addi %43, %c31_i32_120 : i32
      %c0_i32_121 = arith.constant 0 : i32
      %296 = tpu.memref_slice %arg3[%294, %c0_i32_121] : memref<512x128xf32, #tpu.memory_space<any>> -> memref<1x128xf32, #tpu.memory_space<any>>
      %c0_i32_122 = arith.constant 0 : i32
      %297 = tpu.memref_slice %arg5[%295, %c0_i32_122] : memref<128x128xf32, #tpu.memory_space<vmem>> -> memref<1x128xf32, #tpu.memory_space<vmem>>
      %298 = tpu.memref_slice %arg6[%41] : memref<2x!tpu.dma_semaphore, #tpu.memory_space<semaphore_mem>> -> memref<1x!tpu.dma_semaphore, #tpu.memory_space<semaphore_mem>>
      %299 = tpu.memref_squeeze %298 : memref<1x!tpu.dma_semaphore, #tpu.memory_space<semaphore_mem>> -> memref<!tpu.dma_semaphore, #tpu.memory_space<semaphore_mem>>
      tpu.enqueue_dma source(%296 : memref<1x128xf32, #tpu.memory_space<any>>) target(%297 : memref<1x128xf32, #tpu.memory_space<vmem>>) target_semaphore(%299 : memref<!tpu.dma_semaphore, #tpu.memory_space<semaphore_mem>>)
      %c32_i32 = arith.constant 32 : i32
      %300 = arith.addi %42, %c32_i32 : i32
      %301 = arith.index_cast %300 : i32 to index
      %302 = memref.load %arg2[%301] : memref<128xi32, #tpu.memory_space<smem>>
      %c32_i32_123 = arith.constant 32 : i32
      %303 = arith.addi %43, %c32_i32_123 : i32
      %c0_i32_124 = arith.constant 0 : i32
      %304 = tpu.memref_slice %arg3[%302, %c0_i32_124] : memref<512x128xf32, #tpu.memory_space<any>> -> memref<1x128xf32, #tpu.memory_space<any>>
      %c0_i32_125 = arith.constant 0 : i32
      %305 = tpu.memref_slice %arg5[%303, %c0_i32_125] : memref<128x128xf32, #tpu.memory_space<vmem>> -> memref<1x128xf32, #tpu.memory_space<vmem>>
      %306 = tpu.memref_slice %arg6[%41] : memref<2x!tpu.dma_semaphore, #tpu.memory_space<semaphore_mem>> -> memref<1x!tpu.dma_semaphore, #tpu.memory_space<semaphore_mem>>
      %307 = tpu.memref_squeeze %306 : memref<1x!tpu.dma_semaphore, #tpu.memory_space<semaphore_mem>> -> memref<!tpu.dma_semaphore, #tpu.memory_space<semaphore_mem>>
      tpu.enqueue_dma source(%304 : memref<1x128xf32, #tpu.memory_space<any>>) target(%305 : memref<1x128xf32, #tpu.memory_space<vmem>>) target_semaphore(%307 : memref<!tpu.dma_semaphore, #tpu.memory_space<semaphore_mem>>)
      %c33_i32 = arith.constant 33 : i32
      %308 = arith.addi %42, %c33_i32 : i32
      %309 = arith.index_cast %308 : i32 to index
      %310 = memref.load %arg2[%309] : memref<128xi32, #tpu.memory_space<smem>>
      %c33_i32_126 = arith.constant 33 : i32
      %311 = arith.addi %43, %c33_i32_126 : i32
      %c0_i32_127 = arith.constant 0 : i32
      %312 = tpu.memref_slice %arg3[%310, %c0_i32_127] : memref<512x128xf32, #tpu.memory_space<any>> -> memref<1x128xf32, #tpu.memory_space<any>>
      %c0_i32_128 = arith.constant 0 : i32
      %313 = tpu.memref_slice %arg5[%311, %c0_i32_128] : memref<128x128xf32, #tpu.memory_space<vmem>> -> memref<1x128xf32, #tpu.memory_space<vmem>>
      %314 = tpu.memref_slice %arg6[%41] : memref<2x!tpu.dma_semaphore, #tpu.memory_space<semaphore_mem>> -> memref<1x!tpu.dma_semaphore, #tpu.memory_space<semaphore_mem>>
      %315 = tpu.memref_squeeze %314 : memref<1x!tpu.dma_semaphore, #tpu.memory_space<semaphore_mem>> -> memref<!tpu.dma_semaphore, #tpu.memory_space<semaphore_mem>>
      tpu.enqueue_dma source(%312 : memref<1x128xf32, #tpu.memory_space<any>>) target(%313 : memref<1x128xf32, #tpu.memory_space<vmem>>) target_semaphore(%315 : memref<!tpu.dma_semaphore, #tpu.memory_space<semaphore_mem>>)
      %c34_i32 = arith.constant 34 : i32
      %316 = arith.addi %42, %c34_i32 : i32
      %317 = arith.index_cast %316 : i32 to index
      %318 = memref.load %arg2[%317] : memref<128xi32, #tpu.memory_space<smem>>
      %c34_i32_129 = arith.constant 34 : i32
      %319 = arith.addi %43, %c34_i32_129 : i32
      %c0_i32_130 = arith.constant 0 : i32
      %320 = tpu.memref_slice %arg3[%318, %c0_i32_130] : memref<512x128xf32, #tpu.memory_space<any>> -> memref<1x128xf32, #tpu.memory_space<any>>
      %c0_i32_131 = arith.constant 0 : i32
      %321 = tpu.memref_slice %arg5[%319, %c0_i32_131] : memref<128x128xf32, #tpu.memory_space<vmem>> -> memref<1x128xf32, #tpu.memory_space<vmem>>
      %322 = tpu.memref_slice %arg6[%41] : memref<2x!tpu.dma_semaphore, #tpu.memory_space<semaphore_mem>> -> memref<1x!tpu.dma_semaphore, #tpu.memory_space<semaphore_mem>>
      %323 = tpu.memref_squeeze %322 : memref<1x!tpu.dma_semaphore, #tpu.memory_space<semaphore_mem>> -> memref<!tpu.dma_semaphore, #tpu.memory_space<semaphore_mem>>
      tpu.enqueue_dma source(%320 : memref<1x128xf32, #tpu.memory_space<any>>) target(%321 : memref<1x128xf32, #tpu.memory_space<vmem>>) target_semaphore(%323 : memref<!tpu.dma_semaphore, #tpu.memory_space<semaphore_mem>>)
      %c35_i32 = arith.constant 35 : i32
      %324 = arith.addi %42, %c35_i32 : i32
      %325 = arith.index_cast %324 : i32 to index
      %326 = memref.load %arg2[%325] : memref<128xi32, #tpu.memory_space<smem>>
      %c35_i32_132 = arith.constant 35 : i32
      %327 = arith.addi %43, %c35_i32_132 : i32
      %c0_i32_133 = arith.constant 0 : i32
      %328 = tpu.memref_slice %arg3[%326, %c0_i32_133] : memref<512x128xf32, #tpu.memory_space<any>> -> memref<1x128xf32, #tpu.memory_space<any>>
      %c0_i32_134 = arith.constant 0 : i32
      %329 = tpu.memref_slice %arg5[%327, %c0_i32_134] : memref<128x128xf32, #tpu.memory_space<vmem>> -> memref<1x128xf32, #tpu.memory_space<vmem>>
      %330 = tpu.memref_slice %arg6[%41] : memref<2x!tpu.dma_semaphore, #tpu.memory_space<semaphore_mem>> -> memref<1x!tpu.dma_semaphore, #tpu.memory_space<semaphore_mem>>
      %331 = tpu.memref_squeeze %330 : memref<1x!tpu.dma_semaphore, #tpu.memory_space<semaphore_mem>> -> memref<!tpu.dma_semaphore, #tpu.memory_space<semaphore_mem>>
      tpu.enqueue_dma source(%328 : memref<1x128xf32, #tpu.memory_space<any>>) target(%329 : memref<1x128xf32, #tpu.memory_space<vmem>>) target_semaphore(%331 : memref<!tpu.dma_semaphore, #tpu.memory_space<semaphore_mem>>)
      %c36_i32 = arith.constant 36 : i32
      %332 = arith.addi %42, %c36_i32 : i32
      %333 = arith.index_cast %332 : i32 to index
      %334 = memref.load %arg2[%333] : memref<128xi32, #tpu.memory_space<smem>>
      %c36_i32_135 = arith.constant 36 : i32
      %335 = arith.addi %43, %c36_i32_135 : i32
      %c0_i32_136 = arith.constant 0 : i32
      %336 = tpu.memref_slice %arg3[%334, %c0_i32_136] : memref<512x128xf32, #tpu.memory_space<any>> -> memref<1x128xf32, #tpu.memory_space<any>>
      %c0_i32_137 = arith.constant 0 : i32
      %337 = tpu.memref_slice %arg5[%335, %c0_i32_137] : memref<128x128xf32, #tpu.memory_space<vmem>> -> memref<1x128xf32, #tpu.memory_space<vmem>>
      %338 = tpu.memref_slice %arg6[%41] : memref<2x!tpu.dma_semaphore, #tpu.memory_space<semaphore_mem>> -> memref<1x!tpu.dma_semaphore, #tpu.memory_space<semaphore_mem>>
      %339 = tpu.memref_squeeze %338 : memref<1x!tpu.dma_semaphore, #tpu.memory_space<semaphore_mem>> -> memref<!tpu.dma_semaphore, #tpu.memory_space<semaphore_mem>>
      tpu.enqueue_dma source(%336 : memref<1x128xf32, #tpu.memory_space<any>>) target(%337 : memref<1x128xf32, #tpu.memory_space<vmem>>) target_semaphore(%339 : memref<!tpu.dma_semaphore, #tpu.memory_space<semaphore_mem>>)
      %c37_i32 = arith.constant 37 : i32
      %340 = arith.addi %42, %c37_i32 : i32
      %341 = arith.index_cast %340 : i32 to index
      %342 = memref.load %arg2[%341] : memref<128xi32, #tpu.memory_space<smem>>
      %c37_i32_138 = arith.constant 37 : i32
      %343 = arith.addi %43, %c37_i32_138 : i32
      %c0_i32_139 = arith.constant 0 : i32
      %344 = tpu.memref_slice %arg3[%342, %c0_i32_139] : memref<512x128xf32, #tpu.memory_space<any>> -> memref<1x128xf32, #tpu.memory_space<any>>
      %c0_i32_140 = arith.constant 0 : i32
      %345 = tpu.memref_slice %arg5[%343, %c0_i32_140] : memref<128x128xf32, #tpu.memory_space<vmem>> -> memref<1x128xf32, #tpu.memory_space<vmem>>
      %346 = tpu.memref_slice %arg6[%41] : memref<2x!tpu.dma_semaphore, #tpu.memory_space<semaphore_mem>> -> memref<1x!tpu.dma_semaphore, #tpu.memory_space<semaphore_mem>>
      %347 = tpu.memref_squeeze %346 : memref<1x!tpu.dma_semaphore, #tpu.memory_space<semaphore_mem>> -> memref<!tpu.dma_semaphore, #tpu.memory_space<semaphore_mem>>
      tpu.enqueue_dma source(%344 : memref<1x128xf32, #tpu.memory_space<any>>) target(%345 : memref<1x128xf32, #tpu.memory_space<vmem>>) target_semaphore(%347 : memref<!tpu.dma_semaphore, #tpu.memory_space<semaphore_mem>>)
      %c38_i32 = arith.constant 38 : i32
      %348 = arith.addi %42, %c38_i32 : i32
      %349 = arith.index_cast %348 : i32 to index
      %350 = memref.load %arg2[%349] : memref<128xi32, #tpu.memory_space<smem>>
      %c38_i32_141 = arith.constant 38 : i32
      %351 = arith.addi %43, %c38_i32_141 : i32
      %c0_i32_142 = arith.constant 0 : i32
      %352 = tpu.memref_slice %arg3[%350, %c0_i32_142] : memref<512x128xf32, #tpu.memory_space<any>> -> memref<1x128xf32, #tpu.memory_space<any>>
      %c0_i32_143 = arith.constant 0 : i32
      %353 = tpu.memref_slice %arg5[%351, %c0_i32_143] : memref<128x128xf32, #tpu.memory_space<vmem>> -> memref<1x128xf32, #tpu.memory_space<vmem>>
      %354 = tpu.memref_slice %arg6[%41] : memref<2x!tpu.dma_semaphore, #tpu.memory_space<semaphore_mem>> -> memref<1x!tpu.dma_semaphore, #tpu.memory_space<semaphore_mem>>
      %355 = tpu.memref_squeeze %354 : memref<1x!tpu.dma_semaphore, #tpu.memory_space<semaphore_mem>> -> memref<!tpu.dma_semaphore, #tpu.memory_space<semaphore_mem>>
      tpu.enqueue_dma source(%352 : memref<1x128xf32, #tpu.memory_space<any>>) target(%353 : memref<1x128xf32, #tpu.memory_space<vmem>>) target_semaphore(%355 : memref<!tpu.dma_semaphore, #tpu.memory_space<semaphore_mem>>)
      %c39_i32 = arith.constant 39 : i32
      %356 = arith.addi %42, %c39_i32 : i32
      %357 = arith.index_cast %356 : i32 to index
      %358 = memref.load %arg2[%357] : memref<128xi32, #tpu.memory_space<smem>>
      %c39_i32_144 = arith.constant 39 : i32
      %359 = arith.addi %43, %c39_i32_144 : i32
      %c0_i32_145 = arith.constant 0 : i32
      %360 = tpu.memref_slice %arg3[%358, %c0_i32_145] : memref<512x128xf32, #tpu.memory_space<any>> -> memref<1x128xf32, #tpu.memory_space<any>>
      %c0_i32_146 = arith.constant 0 : i32
      %361 = tpu.memref_slice %arg5[%359, %c0_i32_146] : memref<128x128xf32, #tpu.memory_space<vmem>> -> memref<1x128xf32, #tpu.memory_space<vmem>>
      %362 = tpu.memref_slice %arg6[%41] : memref<2x!tpu.dma_semaphore, #tpu.memory_space<semaphore_mem>> -> memref<1x!tpu.dma_semaphore, #tpu.memory_space<semaphore_mem>>
      %363 = tpu.memref_squeeze %362 : memref<1x!tpu.dma_semaphore, #tpu.memory_space<semaphore_mem>> -> memref<!tpu.dma_semaphore, #tpu.memory_space<semaphore_mem>>
      tpu.enqueue_dma source(%360 : memref<1x128xf32, #tpu.memory_space<any>>) target(%361 : memref<1x128xf32, #tpu.memory_space<vmem>>) target_semaphore(%363 : memref<!tpu.dma_semaphore, #tpu.memory_space<semaphore_mem>>)
      %c40_i32 = arith.constant 40 : i32
      %364 = arith.addi %42, %c40_i32 : i32
      %365 = arith.index_cast %364 : i32 to index
      %366 = memref.load %arg2[%365] : memref<128xi32, #tpu.memory_space<smem>>
      %c40_i32_147 = arith.constant 40 : i32
      %367 = arith.addi %43, %c40_i32_147 : i32
      %c0_i32_148 = arith.constant 0 : i32
      %368 = tpu.memref_slice %arg3[%366, %c0_i32_148] : memref<512x128xf32, #tpu.memory_space<any>> -> memref<1x128xf32, #tpu.memory_space<any>>
      %c0_i32_149 = arith.constant 0 : i32
      %369 = tpu.memref_slice %arg5[%367, %c0_i32_149] : memref<128x128xf32, #tpu.memory_space<vmem>> -> memref<1x128xf32, #tpu.memory_space<vmem>>
      %370 = tpu.memref_slice %arg6[%41] : memref<2x!tpu.dma_semaphore, #tpu.memory_space<semaphore_mem>> -> memref<1x!tpu.dma_semaphore, #tpu.memory_space<semaphore_mem>>
      %371 = tpu.memref_squeeze %370 : memref<1x!tpu.dma_semaphore, #tpu.memory_space<semaphore_mem>> -> memref<!tpu.dma_semaphore, #tpu.memory_space<semaphore_mem>>
      tpu.enqueue_dma source(%368 : memref<1x128xf32, #tpu.memory_space<any>>) target(%369 : memref<1x128xf32, #tpu.memory_space<vmem>>) target_semaphore(%371 : memref<!tpu.dma_semaphore, #tpu.memory_space<semaphore_mem>>)
      %c41_i32 = arith.constant 41 : i32
      %372 = arith.addi %42, %c41_i32 : i32
      %373 = arith.index_cast %372 : i32 to index
      %374 = memref.load %arg2[%373] : memref<128xi32, #tpu.memory_space<smem>>
      %c41_i32_150 = arith.constant 41 : i32
      %375 = arith.addi %43, %c41_i32_150 : i32
      %c0_i32_151 = arith.constant 0 : i32
      %376 = tpu.memref_slice %arg3[%374, %c0_i32_151] : memref<512x128xf32, #tpu.memory_space<any>> -> memref<1x128xf32, #tpu.memory_space<any>>
      %c0_i32_152 = arith.constant 0 : i32
      %377 = tpu.memref_slice %arg5[%375, %c0_i32_152] : memref<128x128xf32, #tpu.memory_space<vmem>> -> memref<1x128xf32, #tpu.memory_space<vmem>>
      %378 = tpu.memref_slice %arg6[%41] : memref<2x!tpu.dma_semaphore, #tpu.memory_space<semaphore_mem>> -> memref<1x!tpu.dma_semaphore, #tpu.memory_space<semaphore_mem>>
      %379 = tpu.memref_squeeze %378 : memref<1x!tpu.dma_semaphore, #tpu.memory_space<semaphore_mem>> -> memref<!tpu.dma_semaphore, #tpu.memory_space<semaphore_mem>>
      tpu.enqueue_dma source(%376 : memref<1x128xf32, #tpu.memory_space<any>>) target(%377 : memref<1x128xf32, #tpu.memory_space<vmem>>) target_semaphore(%379 : memref<!tpu.dma_semaphore, #tpu.memory_space<semaphore_mem>>)
      %c42_i32 = arith.constant 42 : i32
      %380 = arith.addi %42, %c42_i32 : i32
      %381 = arith.index_cast %380 : i32 to index
      %382 = memref.load %arg2[%381] : memref<128xi32, #tpu.memory_space<smem>>
      %c42_i32_153 = arith.constant 42 : i32
      %383 = arith.addi %43, %c42_i32_153 : i32
      %c0_i32_154 = arith.constant 0 : i32
      %384 = tpu.memref_slice %arg3[%382, %c0_i32_154] : memref<512x128xf32, #tpu.memory_space<any>> -> memref<1x128xf32, #tpu.memory_space<any>>
      %c0_i32_155 = arith.constant 0 : i32
      %385 = tpu.memref_slice %arg5[%383, %c0_i32_155] : memref<128x128xf32, #tpu.memory_space<vmem>> -> memref<1x128xf32, #tpu.memory_space<vmem>>
      %386 = tpu.memref_slice %arg6[%41] : memref<2x!tpu.dma_semaphore, #tpu.memory_space<semaphore_mem>> -> memref<1x!tpu.dma_semaphore, #tpu.memory_space<semaphore_mem>>
      %387 = tpu.memref_squeeze %386 : memref<1x!tpu.dma_semaphore, #tpu.memory_space<semaphore_mem>> -> memref<!tpu.dma_semaphore, #tpu.memory_space<semaphore_mem>>
      tpu.enqueue_dma source(%384 : memref<1x128xf32, #tpu.memory_space<any>>) target(%385 : memref<1x128xf32, #tpu.memory_space<vmem>>) target_semaphore(%387 : memref<!tpu.dma_semaphore, #tpu.memory_space<semaphore_mem>>)
      %c43_i32 = arith.constant 43 : i32
      %388 = arith.addi %42, %c43_i32 : i32
      %389 = arith.index_cast %388 : i32 to index
      %390 = memref.load %arg2[%389] : memref<128xi32, #tpu.memory_space<smem>>
      %c43_i32_156 = arith.constant 43 : i32
      %391 = arith.addi %43, %c43_i32_156 : i32
      %c0_i32_157 = arith.constant 0 : i32
      %392 = tpu.memref_slice %arg3[%390, %c0_i32_157] : memref<512x128xf32, #tpu.memory_space<any>> -> memref<1x128xf32, #tpu.memory_space<any>>
      %c0_i32_158 = arith.constant 0 : i32
      %393 = tpu.memref_slice %arg5[%391, %c0_i32_158] : memref<128x128xf32, #tpu.memory_space<vmem>> -> memref<1x128xf32, #tpu.memory_space<vmem>>
      %394 = tpu.memref_slice %arg6[%41] : memref<2x!tpu.dma_semaphore, #tpu.memory_space<semaphore_mem>> -> memref<1x!tpu.dma_semaphore, #tpu.memory_space<semaphore_mem>>
      %395 = tpu.memref_squeeze %394 : memref<1x!tpu.dma_semaphore, #tpu.memory_space<semaphore_mem>> -> memref<!tpu.dma_semaphore, #tpu.memory_space<semaphore_mem>>
      tpu.enqueue_dma source(%392 : memref<1x128xf32, #tpu.memory_space<any>>) target(%393 : memref<1x128xf32, #tpu.memory_space<vmem>>) target_semaphore(%395 : memref<!tpu.dma_semaphore, #tpu.memory_space<semaphore_mem>>)
      %c44_i32 = arith.constant 44 : i32
      %396 = arith.addi %42, %c44_i32 : i32
      %397 = arith.index_cast %396 : i32 to index
      %398 = memref.load %arg2[%397] : memref<128xi32, #tpu.memory_space<smem>>
      %c44_i32_159 = arith.constant 44 : i32
      %399 = arith.addi %43, %c44_i32_159 : i32
      %c0_i32_160 = arith.constant 0 : i32
      %400 = tpu.memref_slice %arg3[%398, %c0_i32_160] : memref<512x128xf32, #tpu.memory_space<any>> -> memref<1x128xf32, #tpu.memory_space<any>>
      %c0_i32_161 = arith.constant 0 : i32
      %401 = tpu.memref_slice %arg5[%399, %c0_i32_161] : memref<128x128xf32, #tpu.memory_space<vmem>> -> memref<1x128xf32, #tpu.memory_space<vmem>>
      %402 = tpu.memref_slice %arg6[%41] : memref<2x!tpu.dma_semaphore, #tpu.memory_space<semaphore_mem>> -> memref<1x!tpu.dma_semaphore, #tpu.memory_space<semaphore_mem>>
      %403 = tpu.memref_squeeze %402 : memref<1x!tpu.dma_semaphore, #tpu.memory_space<semaphore_mem>> -> memref<!tpu.dma_semaphore, #tpu.memory_space<semaphore_mem>>
      tpu.enqueue_dma source(%400 : memref<1x128xf32, #tpu.memory_space<any>>) target(%401 : memref<1x128xf32, #tpu.memory_space<vmem>>) target_semaphore(%403 : memref<!tpu.dma_semaphore, #tpu.memory_space<semaphore_mem>>)
      %c45_i32 = arith.constant 45 : i32
      %404 = arith.addi %42, %c45_i32 : i32
      %405 = arith.index_cast %404 : i32 to index
      %406 = memref.load %arg2[%405] : memref<128xi32, #tpu.memory_space<smem>>
      %c45_i32_162 = arith.constant 45 : i32
      %407 = arith.addi %43, %c45_i32_162 : i32
      %c0_i32_163 = arith.constant 0 : i32
      %408 = tpu.memref_slice %arg3[%406, %c0_i32_163] : memref<512x128xf32, #tpu.memory_space<any>> -> memref<1x128xf32, #tpu.memory_space<any>>
      %c0_i32_164 = arith.constant 0 : i32
      %409 = tpu.memref_slice %arg5[%407, %c0_i32_164] : memref<128x128xf32, #tpu.memory_space<vmem>> -> memref<1x128xf32, #tpu.memory_space<vmem>>
      %410 = tpu.memref_slice %arg6[%41] : memref<2x!tpu.dma_semaphore, #tpu.memory_space<semaphore_mem>> -> memref<1x!tpu.dma_semaphore, #tpu.memory_space<semaphore_mem>>
      %411 = tpu.memref_squeeze %410 : memref<1x!tpu.dma_semaphore, #tpu.memory_space<semaphore_mem>> -> memref<!tpu.dma_semaphore, #tpu.memory_space<semaphore_mem>>
      tpu.enqueue_dma source(%408 : memref<1x128xf32, #tpu.memory_space<any>>) target(%409 : memref<1x128xf32, #tpu.memory_space<vmem>>) target_semaphore(%411 : memref<!tpu.dma_semaphore, #tpu.memory_space<semaphore_mem>>)
      %c46_i32 = arith.constant 46 : i32
      %412 = arith.addi %42, %c46_i32 : i32
      %413 = arith.index_cast %412 : i32 to index
      %414 = memref.load %arg2[%413] : memref<128xi32, #tpu.memory_space<smem>>
      %c46_i32_165 = arith.constant 46 : i32
      %415 = arith.addi %43, %c46_i32_165 : i32
      %c0_i32_166 = arith.constant 0 : i32
      %416 = tpu.memref_slice %arg3[%414, %c0_i32_166] : memref<512x128xf32, #tpu.memory_space<any>> -> memref<1x128xf32, #tpu.memory_space<any>>
      %c0_i32_167 = arith.constant 0 : i32
      %417 = tpu.memref_slice %arg5[%415, %c0_i32_167] : memref<128x128xf32, #tpu.memory_space<vmem>> -> memref<1x128xf32, #tpu.memory_space<vmem>>
      %418 = tpu.memref_slice %arg6[%41] : memref<2x!tpu.dma_semaphore, #tpu.memory_space<semaphore_mem>> -> memref<1x!tpu.dma_semaphore, #tpu.memory_space<semaphore_mem>>
      %419 = tpu.memref_squeeze %418 : memref<1x!tpu.dma_semaphore, #tpu.memory_space<semaphore_mem>> -> memref<!tpu.dma_semaphore, #tpu.memory_space<semaphore_mem>>
      tpu.enqueue_dma source(%416 : memref<1x128xf32, #tpu.memory_space<any>>) target(%417 : memref<1x128xf32, #tpu.memory_space<vmem>>) target_semaphore(%419 : memref<!tpu.dma_semaphore, #tpu.memory_space<semaphore_mem>>)
      %c47_i32 = arith.constant 47 : i32
      %420 = arith.addi %42, %c47_i32 : i32
      %421 = arith.index_cast %420 : i32 to index
      %422 = memref.load %arg2[%421] : memref<128xi32, #tpu.memory_space<smem>>
      %c47_i32_168 = arith.constant 47 : i32
      %423 = arith.addi %43, %c47_i32_168 : i32
      %c0_i32_169 = arith.constant 0 : i32
      %424 = tpu.memref_slice %arg3[%422, %c0_i32_169] : memref<512x128xf32, #tpu.memory_space<any>> -> memref<1x128xf32, #tpu.memory_space<any>>
      %c0_i32_170 = arith.constant 0 : i32
      %425 = tpu.memref_slice %arg5[%423, %c0_i32_170] : memref<128x128xf32, #tpu.memory_space<vmem>> -> memref<1x128xf32, #tpu.memory_space<vmem>>
      %426 = tpu.memref_slice %arg6[%41] : memref<2x!tpu.dma_semaphore, #tpu.memory_space<semaphore_mem>> -> memref<1x!tpu.dma_semaphore, #tpu.memory_space<semaphore_mem>>
      %427 = tpu.memref_squeeze %426 : memref<1x!tpu.dma_semaphore, #tpu.memory_space<semaphore_mem>> -> memref<!tpu.dma_semaphore, #tpu.memory_space<semaphore_mem>>
      tpu.enqueue_dma source(%424 : memref<1x128xf32, #tpu.memory_space<any>>) target(%425 : memref<1x128xf32, #tpu.memory_space<vmem>>) target_semaphore(%427 : memref<!tpu.dma_semaphore, #tpu.memory_space<semaphore_mem>>)
      %c48_i32 = arith.constant 48 : i32
      %428 = arith.addi %42, %c48_i32 : i32
      %429 = arith.index_cast %428 : i32 to index
      %430 = memref.load %arg2[%429] : memref<128xi32, #tpu.memory_space<smem>>
      %c48_i32_171 = arith.constant 48 : i32
      %431 = arith.addi %43, %c48_i32_171 : i32
      %c0_i32_172 = arith.constant 0 : i32
      %432 = tpu.memref_slice %arg3[%430, %c0_i32_172] : memref<512x128xf32, #tpu.memory_space<any>> -> memref<1x128xf32, #tpu.memory_space<any>>
      %c0_i32_173 = arith.constant 0 : i32
      %433 = tpu.memref_slice %arg5[%431, %c0_i32_173] : memref<128x128xf32, #tpu.memory_space<vmem>> -> memref<1x128xf32, #tpu.memory_space<vmem>>
      %434 = tpu.memref_slice %arg6[%41] : memref<2x!tpu.dma_semaphore, #tpu.memory_space<semaphore_mem>> -> memref<1x!tpu.dma_semaphore, #tpu.memory_space<semaphore_mem>>
      %435 = tpu.memref_squeeze %434 : memref<1x!tpu.dma_semaphore, #tpu.memory_space<semaphore_mem>> -> memref<!tpu.dma_semaphore, #tpu.memory_space<semaphore_mem>>
      tpu.enqueue_dma source(%432 : memref<1x128xf32, #tpu.memory_space<any>>) target(%433 : memref<1x128xf32, #tpu.memory_space<vmem>>) target_semaphore(%435 : memref<!tpu.dma_semaphore, #tpu.memory_space<semaphore_mem>>)
      %c49_i32 = arith.constant 49 : i32
      %436 = arith.addi %42, %c49_i32 : i32
      %437 = arith.index_cast %436 : i32 to index
      %438 = memref.load %arg2[%437] : memref<128xi32, #tpu.memory_space<smem>>
      %c49_i32_174 = arith.constant 49 : i32
      %439 = arith.addi %43, %c49_i32_174 : i32
      %c0_i32_175 = arith.constant 0 : i32
      %440 = tpu.memref_slice %arg3[%438, %c0_i32_175] : memref<512x128xf32, #tpu.memory_space<any>> -> memref<1x128xf32, #tpu.memory_space<any>>
      %c0_i32_176 = arith.constant 0 : i32
      %441 = tpu.memref_slice %arg5[%439, %c0_i32_176] : memref<128x128xf32, #tpu.memory_space<vmem>> -> memref<1x128xf32, #tpu.memory_space<vmem>>
      %442 = tpu.memref_slice %arg6[%41] : memref<2x!tpu.dma_semaphore, #tpu.memory_space<semaphore_mem>> -> memref<1x!tpu.dma_semaphore, #tpu.memory_space<semaphore_mem>>
      %443 = tpu.memref_squeeze %442 : memref<1x!tpu.dma_semaphore, #tpu.memory_space<semaphore_mem>> -> memref<!tpu.dma_semaphore, #tpu.memory_space<semaphore_mem>>
      tpu.enqueue_dma source(%440 : memref<1x128xf32, #tpu.memory_space<any>>) target(%441 : memref<1x128xf32, #tpu.memory_space<vmem>>) target_semaphore(%443 : memref<!tpu.dma_semaphore, #tpu.memory_space<semaphore_mem>>)
      %c50_i32 = arith.constant 50 : i32
      %444 = arith.addi %42, %c50_i32 : i32
      %445 = arith.index_cast %444 : i32 to index
      %446 = memref.load %arg2[%445] : memref<128xi32, #tpu.memory_space<smem>>
      %c50_i32_177 = arith.constant 50 : i32
      %447 = arith.addi %43, %c50_i32_177 : i32
      %c0_i32_178 = arith.constant 0 : i32
      %448 = tpu.memref_slice %arg3[%446, %c0_i32_178] : memref<512x128xf32, #tpu.memory_space<any>> -> memref<1x128xf32, #tpu.memory_space<any>>
      %c0_i32_179 = arith.constant 0 : i32
      %449 = tpu.memref_slice %arg5[%447, %c0_i32_179] : memref<128x128xf32, #tpu.memory_space<vmem>> -> memref<1x128xf32, #tpu.memory_space<vmem>>
      %450 = tpu.memref_slice %arg6[%41] : memref<2x!tpu.dma_semaphore, #tpu.memory_space<semaphore_mem>> -> memref<1x!tpu.dma_semaphore, #tpu.memory_space<semaphore_mem>>
      %451 = tpu.memref_squeeze %450 : memref<1x!tpu.dma_semaphore, #tpu.memory_space<semaphore_mem>> -> memref<!tpu.dma_semaphore, #tpu.memory_space<semaphore_mem>>
      tpu.enqueue_dma source(%448 : memref<1x128xf32, #tpu.memory_space<any>>) target(%449 : memref<1x128xf32, #tpu.memory_space<vmem>>) target_semaphore(%451 : memref<!tpu.dma_semaphore, #tpu.memory_space<semaphore_mem>>)
      %c51_i32 = arith.constant 51 : i32
      %452 = arith.addi %42, %c51_i32 : i32
      %453 = arith.index_cast %452 : i32 to index
      %454 = memref.load %arg2[%453] : memref<128xi32, #tpu.memory_space<smem>>
      %c51_i32_180 = arith.constant 51 : i32
      %455 = arith.addi %43, %c51_i32_180 : i32
      %c0_i32_181 = arith.constant 0 : i32
      %456 = tpu.memref_slice %arg3[%454, %c0_i32_181] : memref<512x128xf32, #tpu.memory_space<any>> -> memref<1x128xf32, #tpu.memory_space<any>>
      %c0_i32_182 = arith.constant 0 : i32
      %457 = tpu.memref_slice %arg5[%455, %c0_i32_182] : memref<128x128xf32, #tpu.memory_space<vmem>> -> memref<1x128xf32, #tpu.memory_space<vmem>>
      %458 = tpu.memref_slice %arg6[%41] : memref<2x!tpu.dma_semaphore, #tpu.memory_space<semaphore_mem>> -> memref<1x!tpu.dma_semaphore, #tpu.memory_space<semaphore_mem>>
      %459 = tpu.memref_squeeze %458 : memref<1x!tpu.dma_semaphore, #tpu.memory_space<semaphore_mem>> -> memref<!tpu.dma_semaphore, #tpu.memory_space<semaphore_mem>>
      tpu.enqueue_dma source(%456 : memref<1x128xf32, #tpu.memory_space<any>>) target(%457 : memref<1x128xf32, #tpu.memory_space<vmem>>) target_semaphore(%459 : memref<!tpu.dma_semaphore, #tpu.memory_space<semaphore_mem>>)
      %c52_i32 = arith.constant 52 : i32
      %460 = arith.addi %42, %c52_i32 : i32
      %461 = arith.index_cast %460 : i32 to index
      %462 = memref.load %arg2[%461] : memref<128xi32, #tpu.memory_space<smem>>
      %c52_i32_183 = arith.constant 52 : i32
      %463 = arith.addi %43, %c52_i32_183 : i32
      %c0_i32_184 = arith.constant 0 : i32
      %464 = tpu.memref_slice %arg3[%462, %c0_i32_184] : memref<512x128xf32, #tpu.memory_space<any>> -> memref<1x128xf32, #tpu.memory_space<any>>
      %c0_i32_185 = arith.constant 0 : i32
      %465 = tpu.memref_slice %arg5[%463, %c0_i32_185] : memref<128x128xf32, #tpu.memory_space<vmem>> -> memref<1x128xf32, #tpu.memory_space<vmem>>
      %466 = tpu.memref_slice %arg6[%41] : memref<2x!tpu.dma_semaphore, #tpu.memory_space<semaphore_mem>> -> memref<1x!tpu.dma_semaphore, #tpu.memory_space<semaphore_mem>>
      %467 = tpu.memref_squeeze %466 : memref<1x!tpu.dma_semaphore, #tpu.memory_space<semaphore_mem>> -> memref<!tpu.dma_semaphore, #tpu.memory_space<semaphore_mem>>
      tpu.enqueue_dma source(%464 : memref<1x128xf32, #tpu.memory_space<any>>) target(%465 : memref<1x128xf32, #tpu.memory_space<vmem>>) target_semaphore(%467 : memref<!tpu.dma_semaphore, #tpu.memory_space<semaphore_mem>>)
      %c53_i32 = arith.constant 53 : i32
      %468 = arith.addi %42, %c53_i32 : i32
      %469 = arith.index_cast %468 : i32 to index
      %470 = memref.load %arg2[%469] : memref<128xi32, #tpu.memory_space<smem>>
      %c53_i32_186 = arith.constant 53 : i32
      %471 = arith.addi %43, %c53_i32_186 : i32
      %c0_i32_187 = arith.constant 0 : i32
      %472 = tpu.memref_slice %arg3[%470, %c0_i32_187] : memref<512x128xf32, #tpu.memory_space<any>> -> memref<1x128xf32, #tpu.memory_space<any>>
      %c0_i32_188 = arith.constant 0 : i32
      %473 = tpu.memref_slice %arg5[%471, %c0_i32_188] : memref<128x128xf32, #tpu.memory_space<vmem>> -> memref<1x128xf32, #tpu.memory_space<vmem>>
      %474 = tpu.memref_slice %arg6[%41] : memref<2x!tpu.dma_semaphore, #tpu.memory_space<semaphore_mem>> -> memref<1x!tpu.dma_semaphore, #tpu.memory_space<semaphore_mem>>
      %475 = tpu.memref_squeeze %474 : memref<1x!tpu.dma_semaphore, #tpu.memory_space<semaphore_mem>> -> memref<!tpu.dma_semaphore, #tpu.memory_space<semaphore_mem>>
      tpu.enqueue_dma source(%472 : memref<1x128xf32, #tpu.memory_space<any>>) target(%473 : memref<1x128xf32, #tpu.memory_space<vmem>>) target_semaphore(%475 : memref<!tpu.dma_semaphore, #tpu.memory_space<semaphore_mem>>)
      %c54_i32 = arith.constant 54 : i32
      %476 = arith.addi %42, %c54_i32 : i32
      %477 = arith.index_cast %476 : i32 to index
      %478 = memref.load %arg2[%477] : memref<128xi32, #tpu.memory_space<smem>>
      %c54_i32_189 = arith.constant 54 : i32
      %479 = arith.addi %43, %c54_i32_189 : i32
      %c0_i32_190 = arith.constant 0 : i32
      %480 = tpu.memref_slice %arg3[%478, %c0_i32_190] : memref<512x128xf32, #tpu.memory_space<any>> -> memref<1x128xf32, #tpu.memory_space<any>>
      %c0_i32_191 = arith.constant 0 : i32
      %481 = tpu.memref_slice %arg5[%479, %c0_i32_191] : memref<128x128xf32, #tpu.memory_space<vmem>> -> memref<1x128xf32, #tpu.memory_space<vmem>>
      %482 = tpu.memref_slice %arg6[%41] : memref<2x!tpu.dma_semaphore, #tpu.memory_space<semaphore_mem>> -> memref<1x!tpu.dma_semaphore, #tpu.memory_space<semaphore_mem>>
      %483 = tpu.memref_squeeze %482 : memref<1x!tpu.dma_semaphore, #tpu.memory_space<semaphore_mem>> -> memref<!tpu.dma_semaphore, #tpu.memory_space<semaphore_mem>>
      tpu.enqueue_dma source(%480 : memref<1x128xf32, #tpu.memory_space<any>>) target(%481 : memref<1x128xf32, #tpu.memory_space<vmem>>) target_semaphore(%483 : memref<!tpu.dma_semaphore, #tpu.memory_space<semaphore_mem>>)
      %c55_i32 = arith.constant 55 : i32
      %484 = arith.addi %42, %c55_i32 : i32
      %485 = arith.index_cast %484 : i32 to index
      %486 = memref.load %arg2[%485] : memref<128xi32, #tpu.memory_space<smem>>
      %c55_i32_192 = arith.constant 55 : i32
      %487 = arith.addi %43, %c55_i32_192 : i32
      %c0_i32_193 = arith.constant 0 : i32
      %488 = tpu.memref_slice %arg3[%486, %c0_i32_193] : memref<512x128xf32, #tpu.memory_space<any>> -> memref<1x128xf32, #tpu.memory_space<any>>
      %c0_i32_194 = arith.constant 0 : i32
      %489 = tpu.memref_slice %arg5[%487, %c0_i32_194] : memref<128x128xf32, #tpu.memory_space<vmem>> -> memref<1x128xf32, #tpu.memory_space<vmem>>
      %490 = tpu.memref_slice %arg6[%41] : memref<2x!tpu.dma_semaphore, #tpu.memory_space<semaphore_mem>> -> memref<1x!tpu.dma_semaphore, #tpu.memory_space<semaphore_mem>>
      %491 = tpu.memref_squeeze %490 : memref<1x!tpu.dma_semaphore, #tpu.memory_space<semaphore_mem>> -> memref<!tpu.dma_semaphore, #tpu.memory_space<semaphore_mem>>
      tpu.enqueue_dma source(%488 : memref<1x128xf32, #tpu.memory_space<any>>) target(%489 : memref<1x128xf32, #tpu.memory_space<vmem>>) target_semaphore(%491 : memref<!tpu.dma_semaphore, #tpu.memory_space<semaphore_mem>>)
      %c56_i32 = arith.constant 56 : i32
      %492 = arith.addi %42, %c56_i32 : i32
      %493 = arith.index_cast %492 : i32 to index
      %494 = memref.load %arg2[%493] : memref<128xi32, #tpu.memory_space<smem>>
      %c56_i32_195 = arith.constant 56 : i32
      %495 = arith.addi %43, %c56_i32_195 : i32
      %c0_i32_196 = arith.constant 0 : i32
      %496 = tpu.memref_slice %arg3[%494, %c0_i32_196] : memref<512x128xf32, #tpu.memory_space<any>> -> memref<1x128xf32, #tpu.memory_space<any>>
      %c0_i32_197 = arith.constant 0 : i32
      %497 = tpu.memref_slice %arg5[%495, %c0_i32_197] : memref<128x128xf32, #tpu.memory_space<vmem>> -> memref<1x128xf32, #tpu.memory_space<vmem>>
      %498 = tpu.memref_slice %arg6[%41] : memref<2x!tpu.dma_semaphore, #tpu.memory_space<semaphore_mem>> -> memref<1x!tpu.dma_semaphore, #tpu.memory_space<semaphore_mem>>
      %499 = tpu.memref_squeeze %498 : memref<1x!tpu.dma_semaphore, #tpu.memory_space<semaphore_mem>> -> memref<!tpu.dma_semaphore, #tpu.memory_space<semaphore_mem>>
      tpu.enqueue_dma source(%496 : memref<1x128xf32, #tpu.memory_space<any>>) target(%497 : memref<1x128xf32, #tpu.memory_space<vmem>>) target_semaphore(%499 : memref<!tpu.dma_semaphore, #tpu.memory_space<semaphore_mem>>)
      %c57_i32 = arith.constant 57 : i32
      %500 = arith.addi %42, %c57_i32 : i32
      %501 = arith.index_cast %500 : i32 to index
      %502 = memref.load %arg2[%501] : memref<128xi32, #tpu.memory_space<smem>>
      %c57_i32_198 = arith.constant 57 : i32
      %503 = arith.addi %43, %c57_i32_198 : i32
      %c0_i32_199 = arith.constant 0 : i32
      %504 = tpu.memref_slice %arg3[%502, %c0_i32_199] : memref<512x128xf32, #tpu.memory_space<any>> -> memref<1x128xf32, #tpu.memory_space<any>>
      %c0_i32_200 = arith.constant 0 : i32
      %505 = tpu.memref_slice %arg5[%503, %c0_i32_200] : memref<128x128xf32, #tpu.memory_space<vmem>> -> memref<1x128xf32, #tpu.memory_space<vmem>>
      %506 = tpu.memref_slice %arg6[%41] : memref<2x!tpu.dma_semaphore, #tpu.memory_space<semaphore_mem>> -> memref<1x!tpu.dma_semaphore, #tpu.memory_space<semaphore_mem>>
      %507 = tpu.memref_squeeze %506 : memref<1x!tpu.dma_semaphore, #tpu.memory_space<semaphore_mem>> -> memref<!tpu.dma_semaphore, #tpu.memory_space<semaphore_mem>>
      tpu.enqueue_dma source(%504 : memref<1x128xf32, #tpu.memory_space<any>>) target(%505 : memref<1x128xf32, #tpu.memory_space<vmem>>) target_semaphore(%507 : memref<!tpu.dma_semaphore, #tpu.memory_space<semaphore_mem>>)
      %c58_i32 = arith.constant 58 : i32
      %508 = arith.addi %42, %c58_i32 : i32
      %509 = arith.index_cast %508 : i32 to index
      %510 = memref.load %arg2[%509] : memref<128xi32, #tpu.memory_space<smem>>
      %c58_i32_201 = arith.constant 58 : i32
      %511 = arith.addi %43, %c58_i32_201 : i32
      %c0_i32_202 = arith.constant 0 : i32
      %512 = tpu.memref_slice %arg3[%510, %c0_i32_202] : memref<512x128xf32, #tpu.memory_space<any>> -> memref<1x128xf32, #tpu.memory_space<any>>
      %c0_i32_203 = arith.constant 0 : i32
      %513 = tpu.memref_slice %arg5[%511, %c0_i32_203] : memref<128x128xf32, #tpu.memory_space<vmem>> -> memref<1x128xf32, #tpu.memory_space<vmem>>
      %514 = tpu.memref_slice %arg6[%41] : memref<2x!tpu.dma_semaphore, #tpu.memory_space<semaphore_mem>> -> memref<1x!tpu.dma_semaphore, #tpu.memory_space<semaphore_mem>>
      %515 = tpu.memref_squeeze %514 : memref<1x!tpu.dma_semaphore, #tpu.memory_space<semaphore_mem>> -> memref<!tpu.dma_semaphore, #tpu.memory_space<semaphore_mem>>
      tpu.enqueue_dma source(%512 : memref<1x128xf32, #tpu.memory_space<any>>) target(%513 : memref<1x128xf32, #tpu.memory_space<vmem>>) target_semaphore(%515 : memref<!tpu.dma_semaphore, #tpu.memory_space<semaphore_mem>>)
      %c59_i32 = arith.constant 59 : i32
      %516 = arith.addi %42, %c59_i32 : i32
      %517 = arith.index_cast %516 : i32 to index
      %518 = memref.load %arg2[%517] : memref<128xi32, #tpu.memory_space<smem>>
      %c59_i32_204 = arith.constant 59 : i32
      %519 = arith.addi %43, %c59_i32_204 : i32
      %c0_i32_205 = arith.constant 0 : i32
      %520 = tpu.memref_slice %arg3[%518, %c0_i32_205] : memref<512x128xf32, #tpu.memory_space<any>> -> memref<1x128xf32, #tpu.memory_space<any>>
      %c0_i32_206 = arith.constant 0 : i32
      %521 = tpu.memref_slice %arg5[%519, %c0_i32_206] : memref<128x128xf32, #tpu.memory_space<vmem>> -> memref<1x128xf32, #tpu.memory_space<vmem>>
      %522 = tpu.memref_slice %arg6[%41] : memref<2x!tpu.dma_semaphore, #tpu.memory_space<semaphore_mem>> -> memref<1x!tpu.dma_semaphore, #tpu.memory_space<semaphore_mem>>
      %523 = tpu.memref_squeeze %522 : memref<1x!tpu.dma_semaphore, #tpu.memory_space<semaphore_mem>> -> memref<!tpu.dma_semaphore, #tpu.memory_space<semaphore_mem>>
      tpu.enqueue_dma source(%520 : memref<1x128xf32, #tpu.memory_space<any>>) target(%521 : memref<1x128xf32, #tpu.memory_space<vmem>>) target_semaphore(%523 : memref<!tpu.dma_semaphore, #tpu.memory_space<semaphore_mem>>)
      %c60_i32 = arith.constant 60 : i32
      %524 = arith.addi %42, %c60_i32 : i32
      %525 = arith.index_cast %524 : i32 to index
      %526 = memref.load %arg2[%525] : memref<128xi32, #tpu.memory_space<smem>>
      %c60_i32_207 = arith.constant 60 : i32
      %527 = arith.addi %43, %c60_i32_207 : i32
      %c0_i32_208 = arith.constant 0 : i32
      %528 = tpu.memref_slice %arg3[%526, %c0_i32_208] : memref<512x128xf32, #tpu.memory_space<any>> -> memref<1x128xf32, #tpu.memory_space<any>>
      %c0_i32_209 = arith.constant 0 : i32
      %529 = tpu.memref_slice %arg5[%527, %c0_i32_209] : memref<128x128xf32, #tpu.memory_space<vmem>> -> memref<1x128xf32, #tpu.memory_space<vmem>>
      %530 = tpu.memref_slice %arg6[%41] : memref<2x!tpu.dma_semaphore, #tpu.memory_space<semaphore_mem>> -> memref<1x!tpu.dma_semaphore, #tpu.memory_space<semaphore_mem>>
      %531 = tpu.memref_squeeze %530 : memref<1x!tpu.dma_semaphore, #tpu.memory_space<semaphore_mem>> -> memref<!tpu.dma_semaphore, #tpu.memory_space<semaphore_mem>>
      tpu.enqueue_dma source(%528 : memref<1x128xf32, #tpu.memory_space<any>>) target(%529 : memref<1x128xf32, #tpu.memory_space<vmem>>) target_semaphore(%531 : memref<!tpu.dma_semaphore, #tpu.memory_space<semaphore_mem>>)
      %c61_i32 = arith.constant 61 : i32
      %532 = arith.addi %42, %c61_i32 : i32
      %533 = arith.index_cast %532 : i32 to index
      %534 = memref.load %arg2[%533] : memref<128xi32, #tpu.memory_space<smem>>
      %c61_i32_210 = arith.constant 61 : i32
      %535 = arith.addi %43, %c61_i32_210 : i32
      %c0_i32_211 = arith.constant 0 : i32
      %536 = tpu.memref_slice %arg3[%534, %c0_i32_211] : memref<512x128xf32, #tpu.memory_space<any>> -> memref<1x128xf32, #tpu.memory_space<any>>
      %c0_i32_212 = arith.constant 0 : i32
      %537 = tpu.memref_slice %arg5[%535, %c0_i32_212] : memref<128x128xf32, #tpu.memory_space<vmem>> -> memref<1x128xf32, #tpu.memory_space<vmem>>
      %538 = tpu.memref_slice %arg6[%41] : memref<2x!tpu.dma_semaphore, #tpu.memory_space<semaphore_mem>> -> memref<1x!tpu.dma_semaphore, #tpu.memory_space<semaphore_mem>>
      %539 = tpu.memref_squeeze %538 : memref<1x!tpu.dma_semaphore, #tpu.memory_space<semaphore_mem>> -> memref<!tpu.dma_semaphore, #tpu.memory_space<semaphore_mem>>
      tpu.enqueue_dma source(%536 : memref<1x128xf32, #tpu.memory_space<any>>) target(%537 : memref<1x128xf32, #tpu.memory_space<vmem>>) target_semaphore(%539 : memref<!tpu.dma_semaphore, #tpu.memory_space<semaphore_mem>>)
      %c62_i32 = arith.constant 62 : i32
      %540 = arith.addi %42, %c62_i32 : i32
      %541 = arith.index_cast %540 : i32 to index
      %542 = memref.load %arg2[%541] : memref<128xi32, #tpu.memory_space<smem>>
      %c62_i32_213 = arith.constant 62 : i32
      %543 = arith.addi %43, %c62_i32_213 : i32
      %c0_i32_214 = arith.constant 0 : i32
      %544 = tpu.memref_slice %arg3[%542, %c0_i32_214] : memref<512x128xf32, #tpu.memory_space<any>> -> memref<1x128xf32, #tpu.memory_space<any>>
      %c0_i32_215 = arith.constant 0 : i32
      %545 = tpu.memref_slice %arg5[%543, %c0_i32_215] : memref<128x128xf32, #tpu.memory_space<vmem>> -> memref<1x128xf32, #tpu.memory_space<vmem>>
      %546 = tpu.memref_slice %arg6[%41] : memref<2x!tpu.dma_semaphore, #tpu.memory_space<semaphore_mem>> -> memref<1x!tpu.dma_semaphore, #tpu.memory_space<semaphore_mem>>
      %547 = tpu.memref_squeeze %546 : memref<1x!tpu.dma_semaphore, #tpu.memory_space<semaphore_mem>> -> memref<!tpu.dma_semaphore, #tpu.memory_space<semaphore_mem>>
      tpu.enqueue_dma source(%544 : memref<1x128xf32, #tpu.memory_space<any>>) target(%545 : memref<1x128xf32, #tpu.memory_space<vmem>>) target_semaphore(%547 : memref<!tpu.dma_semaphore, #tpu.memory_space<semaphore_mem>>)
      %c63_i32 = arith.constant 63 : i32
      %548 = arith.addi %42, %c63_i32 : i32
      %549 = arith.index_cast %548 : i32 to index
      %550 = memref.load %arg2[%549] : memref<128xi32, #tpu.memory_space<smem>>
      %c63_i32_216 = arith.constant 63 : i32
      %551 = arith.addi %43, %c63_i32_216 : i32
      %c0_i32_217 = arith.constant 0 : i32
      %552 = tpu.memref_slice %arg3[%550, %c0_i32_217] : memref<512x128xf32, #tpu.memory_space<any>> -> memref<1x128xf32, #tpu.memory_space<any>>
      %c0_i32_218 = arith.constant 0 : i32
      %553 = tpu.memref_slice %arg5[%551, %c0_i32_218] : memref<128x128xf32, #tpu.memory_space<vmem>> -> memref<1x128xf32, #tpu.memory_space<vmem>>
      %554 = tpu.memref_slice %arg6[%41] : memref<2x!tpu.dma_semaphore, #tpu.memory_space<semaphore_mem>> -> memref<1x!tpu.dma_semaphore, #tpu.memory_space<semaphore_mem>>
      %555 = tpu.memref_squeeze %554 : memref<1x!tpu.dma_semaphore, #tpu.memory_space<semaphore_mem>> -> memref<!tpu.dma_semaphore, #tpu.memory_space<semaphore_mem>>
      tpu.enqueue_dma source(%552 : memref<1x128xf32, #tpu.memory_space<any>>) target(%553 : memref<1x128xf32, #tpu.memory_space<vmem>>) target_semaphore(%555 : memref<!tpu.dma_semaphore, #tpu.memory_space<semaphore_mem>>)
    } else {
    }
    %c2_i32 = arith.constant 2 : i32
    %c0_i32_4 = arith.constant 0 : i32
    %9 = arith.cmpi eq, %c2_i32, %c0_i32_4 : i32
    %c1_i32_5 = arith.constant 1 : i32
    %10 = arith.select %9, %c1_i32_5, %c2_i32 : i32
    %11 = arith.remsi %1, %10 : i32
    %c0_i32_6 = arith.constant 0 : i32
    %12 = arith.cmpi ne, %11, %c0_i32_6 : i32
    %c0_i32_7 = arith.constant 0 : i32
    %13 = arith.cmpi slt, %11, %c0_i32_7 : i32
    %c0_i32_8 = arith.constant 0 : i32
    %14 = arith.cmpi slt, %10, %c0_i32_8 : i32
    %15 = arith.xori %13, %14 : i1
    %16 = arith.andi %15, %12 : i1
    %17 = arith.addi %11, %10 : i32
    %18 = arith.select %16, %17, %11 : i32
    %c64_i32 = arith.constant 64 : i32
    %19 = arith.muli %18, %c64_i32 : i32
    %20 = tpu.assume_multiple %19, 64 : i32
    %c0_i32_9 = arith.constant 0 : i32
    %c0_i32_10 = arith.constant 0 : i32
    %21 = tpu.memref_slice %arg3[%c0_i32_9, %c0_i32_10] : memref<512x128xf32, #tpu.memory_space<any>> -> memref<64x128xf32, #tpu.memory_space<any>>
    %c0_i32_11 = arith.constant 0 : i32
    %22 = tpu.memref_slice %arg5[%20, %c0_i32_11] : memref<128x128xf32, #tpu.memory_space<vmem>> -> memref<64x128xf32, #tpu.memory_space<vmem>>
    %23 = tpu.memref_slice %arg6[%18] : memref<2x!tpu.dma_semaphore, #tpu.memory_space<semaphore_mem>> -> memref<1x!tpu.dma_semaphore, #tpu.memory_space<semaphore_mem>>
    %24 = tpu.memref_squeeze %23 : memref<1x!tpu.dma_semaphore, #tpu.memory_space<semaphore_mem>> -> memref<!tpu.dma_semaphore, #tpu.memory_space<semaphore_mem>>
    tpu.wait_dma2 semaphore(%24 : memref<!tpu.dma_semaphore, #tpu.memory_space<semaphore_mem>>) src(%21 : memref<64x128xf32, #tpu.memory_space<any>>) dst(%22 : memref<64x128xf32, #tpu.memory_space<vmem>>)
    %25 = arith.index_cast %20 : i32 to index
    %c0 = arith.constant 0 : index
    %26 = vector.load %arg5[%25, %c0] : memref<128x128xf32, #tpu.memory_space<vmem>>, vector<64x128xf32>
    %cst = arith.constant 11.3137083 : f32
    %27 = vector.broadcast %cst : f32 to vector<64x128xf32>
    %28 = arith.mulf %26, %27 : vector<64x128xf32>
    %c0_12 = arith.constant 0 : index
    %c0_13 = arith.constant 0 : index
    %29 = vector.load %arg4[%c0_12, %c0_13] : memref<64x128xf32, #tpu.memory_space<vmem>>, vector<64x128xf32>
    tpu.vector_store %arg4[%c0_12, %c0_13], %28 {strides = array<i32>} : memref<64x128xf32, #tpu.memory_space<vmem>>, vector<64x128xf32>,
    return
  }
  func.func @transform_1(%arg0: i32, %arg1: i32, %arg2: memref<128xi32, #tpu.memory_space<smem>>) -> (i32, i32) {
    %c1_i32 = arith.constant 1 : i32
    %0 = arith.muli %arg0, %c1_i32 : i32
    %1 = arith.addi %0, %arg1 : i32
    %c0_i32 = arith.constant 0 : i32
    %c0_i32_0 = arith.constant 0 : i32
    return %1, %c0_i32 : i32, i32
  }
}

</mosaic_0001>

<bundles_post_ra>
// kernel: tpu_custom_call.1
= control target key start
LH: loop header
LB: loop body
LE: loop exit
PB: predicated region body
PF: predicated region fallthrough
CT: control target
= control target key end

     0   :  { %s6402_s0 = inlined_call_operand.hbm [shape: s32[128], index: 0, kind: input, shape index: {}]   ;;  %s6403_s1 = inlined_call_operand.hbm [shape: f32[512,128], index: 1, kind: input, shape index: {}]   ;;  %s6404_s2 = inlined_call_operand.hbm [shape: f32[128,128], index: 2, kind: output, shape index: {}]  }
   0x1   :  { %s3366_s11 = scalar_lea.hbm %s6402_s0, 16 }
   0x2   :  { %p3367_p0 = scmp.ne.s32.totalorder %s6402_s0, %s3366_s11  ;;  %p3370_p1 = scmp.lt.u32.totalorder %s3366_s11, %s6402_s0 }
   0x4   :  { %p3372_p2 = pnand %p3370_p1, %p3367_p0 }
   0x6   :  { %3375 = shalt.err (!%p3372_p2)  }
   0x7   :  { %s4980_s16 = smov [#allocation5]  }
   0x8   :  { %8 = dma.hbm_to_smem %s6402_s0, 16, %s4980_s16, [#allocation4] }
   0x9   :  { %4956 = dma.done.wait [#allocation4], 16 }
   0xa   :  { %4957 = vsyncadd [#allocation4], 4294967280 }
   0xb   :  { %10 = sfence }
   0xc   :  { %11 = vsyncpa [#allocation7], 0 }
   0xd   :  { %13 = vsyncpa [#allocation7 + $0x1], 0  ;;  %s5012_s19 = smov 0   ;;  %s5014_s20 = smov 0  }
   0xe   :  { %s5016_s21 = smov 0   ;;  %s5018_s22 = smov 0  }
   0xf LB: > { %s28_s0 = sadd.s32 1, %s4974_s21  ;;  %s3042_s23 = sadd.s32 4294967295, %s4978_s22   ;;  %s4978_s22 = sphi %s5018_s22, %s19_s22   ;;  %s4974_s21 = sphi %s5016_s21, %s6417_s21   ;;  %s4970_s20 = sphi %s5014_s20, %s6419_s20   ;;  %s4966_s19 = sphi %s5012_s19, %s6418_s19  }
  0x10   : > { %p30_p3 = scmp.ge.s32.totalorder %s28_s0, 2  ;;  %p46_p4 = scmp.ne.s32.totalorder %s4970_s20, %s4966_s19 }
  0x11   : > { %s37_s24 = sadd.s32 1, %s4970_s20  ;;  %p47_p5 = scmp.eq.s32.totalorder %s3042_s23, 1 }
  0x12   : > { %s6421_s0 = smov (%p30_p3, %s28_s0), 0  ;;  %p41_p6 = scmp.eq.s32.totalorder %s4978_s22, 1 }
  0x13   : > { %6408 = sst [smem:[#allocation269_spill]] %s6421_s0  ;;  %s34_s25 = ssub.s32 %s4974_s21, %s6421_s0 }
  0x14   : > { %p35_p7 = scmp.eq.s32.totalorder %s34_s25, 0  ;;  %p3043_p8 = scmp.ne.s32.totalorder %s34_s25, 0 }
  0x15   : > { %p5042_p9 = por %p47_p5, %p46_p4  ;;  %p3044_p11 = scmp.ge.s32.totalorder %s4978_s22, 2 }
  0x16   : > { %s5047_s27 = scalar_select %p35_p7, %s4970_s20, %s37_s24  }
  0x17   : > { %s6409_s26 = scalar_select %p5042_p9, 1, 0 }
  0x18   : > { %6411 = sst [smem:[#allocation271_spill]] %s5047_s27  ;;  %p5049_p10 = por %p3043_p8, %p41_p6 }
  0x19   : > { %6410 = sst [smem:[#allocation270_spill]] %s6409_s26  ;;  %56 = sbr.rel (%p3044_p11) target bundleno = 1494 (0x5d6), region = 12 }
  0x1a   : > { %s6405_s29 = sand.u32 (!%p3044_p11), 1, %s4970_s20   ;;  %s72_s3 = ssub.s32 (!%p3044_p11), 0, %s4974_s21 }
  0x1b   : > { %s5057_s30 = sshll.u32 (!%p3044_p11), %s6405_s29, 6  ;;  %s3046_s4 = smin.u32 (!%p3044_p11), %s4974_s21, %s72_s3 }
  0x1c   : > { %s74_s5 = sand.u32 (!%p3044_p11), 1, %s3046_s4   ;;  %s5062_s6 = sshll.u32 (!%p3044_p11), %s4974_s21, 6 }
  0x1d   : > { %s85_s7 = sld [smem:[#allocation5 + %s5062_s6]] (!%p3044_p11)  ;;  %s101_s8 = sadd.s32 (!%p3044_p11), 1, %s5062_s6 }
  0x1e   : > { %s118_s9 = sadd.s32 (!%p3044_p11), 2, %s5062_s6  ;;  %p3048_p12 = scmp.lt.s32.totalorder (!%p3044_p11), %s74_s5, 0 }
  0x1f   : > { %s81_s10 = sadd.s32 (!%p3044_p11), 2, %s74_s5  ;;  %s5067_s11 = sld [smem:[#allocation5 + %s101_s8]] (!%p3044_p11) }
  0x20   : > { %s5069_s12 = sld [smem:[#allocation5 + %s118_s9]]  ;;  %s6423_s10 = smov (!%p3048_p12, %s81_s10), %s74_s5 }
  0x21   : > { %s3050_s15 = sshll.u32 %s6423_s10, 6  ;;  %s5082_s4 = scalar_lea.sflag [#allocation3], %s6423_s10 }
  0x22   : > { %s5077_s23 = scalar_lea.vmem [#allocation2], %s3050_s15  ;;  %s5089_s9 = scalar_lea.hbm %s6403_s1, 8192 }
  0x23   : > { %s3051_s13 = sshll.u32 %s85_s7, 4  ;;  %s97_s24 = sshll.u32 %s5077_s23, 4  ;;  %s98_s24 = int_to_ptr.vmem [resolvable:$true] %s97_s24 }
  0x24   : > { %s5075_s18 = scalar_lea.hbm %s6403_s1, %s3051_s13  ;;  %s2385_s25 = scalar_lea.vmem %s5077_s23, 1 [#allocation2] }
  0x25   : > { %s3052_s3 = sshll.u32 %s5067_s11, 4  ;;  %s3376_s5 = scalar_lea.hbm %s5075_s18, 16 }
  0x26   : > { %p3377_p13 = scmp.ne.s32.totalorder %s5075_s18, %s3376_s5  ;;  %p3379_p0 = scmp.lt.u32.totalorder %s5075_s18, %s6403_s1 }
  0x27   : > { %p3380_p1 = scmp.lt.u32.totalorder %s5089_s9, %s3376_s5  ;;  %p3382_p3 = scmp.lt.u32.totalorder %s3376_s5, %s5075_s18 }
  0x29   : > { %p3381_p2 = por %p3380_p1, %p3379_p0 }
  0x2b   : > { %p3383_p4 = por %p3382_p3, %p3381_p2 }
  0x2d   : > { %p3384_p5 = pnand %p3383_p4, %p3377_p13 }
  0x2f   : > { %3387 = shalt.err (!%p3384_p5)  }
  0x30   : > { %s3388_s10 = scalar_lea.vmem %s98_s24, 16  ;;  %s4981_s11 = smov [#allocation2]  }
  0x31   : > { %p3389_p6 = scmp.ne.s32.totalorder %s98_s24, %s3388_s10  ;;  %s3390_s15 = sshll.u32 %s4981_s11, 4  ;;  %s5097_s15 = int_to_ptr.vmem [resolvable:$false] %s3390_s15 }
  0x32   : > { %s5100_s17 = scalar_lea.vmem %s5097_s15, 2048  ;;  %p3393_p7 = scmp.lt.s32.totalorder %s98_s24, %s5097_s15 }
  0x33   : > { %p3394_p8 = scmp.lt.s32.totalorder %s5100_s17, %s3388_s10 }
  0x35   : > { %p3395_p11 = por %p3394_p8, %p3393_p7 }
  0x37   : > { %p3396_p12 = pnand %p3395_p11, %p3389_p6 }
  0x39   : > { %3399 = shalt.err (!%p3396_p12)  }
  0x3a   : > { %100 = dma.hbm_to_vmem [thread:$0]  %s5075_s18, 16, %s98_s24, %s5082_s4 }
  0x3b   : > { %s105_s8 = scalar_lea.hbm %s6403_s1, %s3052_s3  ;;  %s114_s13 = sshll.u32 %s2385_s25, 4  ;;  %s115_s13 = int_to_ptr.vmem [resolvable:$true] %s114_s13 }
  0x3c   : > { %s3054_s16 = sshll.u32 %s5069_s12, 4  ;;  %s3400_s11 = scalar_lea.hbm %s105_s8, 16 }
  0x3d   : > { %p3401_p13 = scmp.ne.s32.totalorder %s105_s8, %s3400_s11  ;;  %p3403_p0 = scmp.lt.u32.totalorder %s105_s8, %s6403_s1 }
  0x3e   : > { %p3404_p1 = scmp.lt.u32.totalorder %s5089_s9, %s3400_s11  ;;  %p3406_p3 = scmp.lt.u32.totalorder %s3400_s11, %s105_s8 }
  0x40   : > { %p3405_p2 = por %p3404_p1, %p3403_p0 }
  0x42   : > { %p3407_p4 = por %p3406_p3, %p3405_p2 }
  0x44   : > { %p3408_p5 = pnand %p3407_p4, %p3401_p13 }
  0x46   : > { %3411 = shalt.err (!%p3408_p5)  }
  0x47   : > { %s3412_s18 = scalar_lea.vmem %s115_s13, 16  ;;  %p3417_p7 = scmp.lt.s32.totalorder %s115_s13, %s5097_s15 }
  0x48   : > { %p3413_p6 = scmp.ne.s32.totalorder %s115_s13, %s3412_s18  ;;  %p3418_p8 = scmp.lt.s32.totalorder %s5100_s17, %s3412_s18 }
  0x4a   : > { %p3419_p11 = por %p3418_p8, %p3417_p7 }
  0x4c   : > { %p3420_p12 = pnand %p3419_p11, %p3413_p6 }
  0x4e   : > { %3423 = shalt.err (!%p3420_p12)  }
  0x4f   : > { %117 = dma.hbm_to_vmem [thread:$0]  %s105_s8, 16, %s115_s13, %s5082_s4 }
  0x50   : > { %s122_s14 = scalar_lea.hbm %s6403_s1, %s3054_s16  ;;  %s2390_s24 = scalar_lea.vmem %s5077_s23, 2 [#allocation2] }
  0x51   : > { %s131_s25 = sshll.u32 %s2390_s24, 4  ;;  %s6413_s3 = sadd.s32 3, %s5062_s6  ;;  %s132_s25 = int_to_ptr.vmem [resolvable:$true] %s131_s25 }
  0x52   : > { %s5123_s10 = sld [smem:[#allocation5 + %s6413_s3]]  ;;  %s2395_s5 = scalar_lea.vmem %s5077_s23, 3 [#allocation2] }
  0x53   : > { %s3424_s7 = scalar_lea.hbm %s122_s14, 16  ;;  %p3427_p0 = scmp.lt.u32.totalorder %s122_s14, %s6403_s1 }
  0x54   : > { %p3425_p13 = scmp.ne.s32.totalorder %s122_s14, %s3424_s7  ;;  %p3428_p1 = scmp.lt.u32.totalorder %s5089_s9, %s3424_s7 }
  0x55   : > { %p3430_p3 = scmp.lt.u32.totalorder %s3424_s7, %s122_s14 }
  0x56   : > { %p3429_p2 = por %p3428_p1, %p3427_p0 }
  0x58   : > { %p3431_p4 = por %p3430_p3, %p3429_p2 }
  0x5a   : > { %p3432_p5 = pnand %p3431_p4, %p3425_p13 }
  0x5c   : > { %3435 = shalt.err (!%p3432_p5)  }
  0x5d   : > { %s3436_s8 = scalar_lea.vmem %s132_s25, 16  ;;  %p3441_p7 = scmp.lt.s32.totalorder %s132_s25, %s5097_s15 }
  0x5e   : > { %p3437_p6 = scmp.ne.s32.totalorder %s132_s25, %s3436_s8  ;;  %p3442_p8 = scmp.lt.s32.totalorder %s5100_s17, %s3436_s8 }
  0x60   : > { %p3443_p11 = por %p3442_p8, %p3441_p7 }
  0x62   : > { %p3444_p12 = pnand %p3443_p11, %p3437_p6 }
  0x64   : > { %3447 = shalt.err (!%p3444_p12)  }
  0x65   : > { %134 = dma.hbm_to_vmem [thread:$0]  %s122_s14, 16, %s132_s25, %s5082_s4 }
  0x66   : > { %s148_s13 = sshll.u32 %s2395_s5, 4  ;;  %s152_s16 = sadd.s32 4, %s5062_s6  ;;  %s149_s13 = int_to_ptr.vmem [resolvable:$true] %s148_s13 }
  0x67   : > { %s5134_s29 = sld [smem:[#allocation5 + %s152_s16]]  ;;  %s2400_s12 = scalar_lea.vmem %s5077_s23, 4 [#allocation2] }
  0x68   : > { %s169_s24 = sadd.s32 5, %s5062_s6  ;;  %s3056_s3 = sshll.u32 %s5123_s10, 4 }
  0x69   : > { %s165_s7 = sshll.u32 %s2400_s12, 4  ;;  %s139_s8 = scalar_lea.hbm %s6403_s1, %s3056_s3  ;;  %s5142_s7 = int_to_ptr.vmem [resolvable:$true] %s165_s7 }
  0x6a   : > { %s3448_s0 = scalar_lea.hbm %s139_s8, 16  ;;  %p3451_p0 = scmp.lt.u32.totalorder %s139_s8, %s6403_s1 }
  0x6b   : > { %p3449_p13 = scmp.ne.s32.totalorder %s139_s8, %s3448_s0  ;;  %p3452_p1 = scmp.lt.u32.totalorder %s5089_s9, %s3448_s0 }
  0x6c   : > { %p3454_p3 = scmp.lt.u32.totalorder %s3448_s0, %s139_s8 }
  0x6d   : > { %p3453_p2 = por %p3452_p1, %p3451_p0 }
  0x6f   : > { %p3455_p4 = por %p3454_p3, %p3453_p2 }
  0x71   : > { %p3456_p5 = pnand %p3455_p4, %p3449_p13 }
  0x73   : > { %3459 = shalt.err (!%p3456_p5)  }
  0x74   : > { %s3460_s14 = scalar_lea.vmem %s149_s13, 16  ;;  %p3465_p7 = scmp.lt.s32.totalorder %s149_s13, %s5097_s15 }
  0x75   : > { %p3461_p6 = scmp.ne.s32.totalorder %s149_s13, %s3460_s14  ;;  %p3466_p8 = scmp.lt.s32.totalorder %s5100_s17, %s3460_s14 }
  0x77   : > { %p3467_p11 = por %p3466_p8, %p3465_p7 }
  0x79   : > { %p3468_p12 = pnand %p3467_p11, %p3461_p6 }
  0x7b   : > { %3471 = shalt.err (!%p3468_p12)  }
  0x7c   : > { %151 = dma.hbm_to_vmem [thread:$0]  %s139_s8, 16, %s149_s13, %s5082_s4 }
  0x7d   : > { %s5151_s26 = sld [smem:[#allocation5 + %s169_s24]]  ;;  %s2405_s0 = scalar_lea.vmem %s5077_s23, 5 [#allocation2] }
  0x7e   : > { %s3058_s27 = sshll.u32 %s5134_s29, 4  ;;  %s182_s25 = sshll.u32 %s2405_s0, 4  ;;  %s5158_s25 = int_to_ptr.vmem [resolvable:$true] %s182_s25 }
  0x7f   : > { %s156_s16 = scalar_lea.hbm %s6403_s1, %s3058_s27 }
  0x80   : > { %s3472_s12 = scalar_lea.hbm %s156_s16, 16  ;;  %p3475_p0 = scmp.lt.u32.totalorder %s156_s16, %s6403_s1 }
  0x81   : > { %p3473_p13 = scmp.ne.s32.totalorder %s156_s16, %s3472_s12  ;;  %p3476_p1 = scmp.lt.u32.totalorder %s5089_s9, %s3472_s12 }
  0x82   : > { %p3478_p3 = scmp.lt.u32.totalorder %s3472_s12, %s156_s16 }
  0x83   : > { %p3477_p2 = por %p3476_p1, %p3475_p0 }
  0x85   : > { %p3479_p4 = por %p3478_p3, %p3477_p2 }
  0x87   : > { %p3480_p5 = pnand %p3479_p4, %p3473_p13 }
  0x89   : > { %3483 = shalt.err (!%p3480_p5)  }
  0x8a   : > { %s3484_s13 = scalar_lea.vmem %s5142_s7, 16  ;;  %p3489_p7 = scmp.lt.s32.totalorder %s5142_s7, %s5097_s15 }
  0x8b   : > { %p3485_p6 = scmp.ne.s32.totalorder %s5142_s7, %s3484_s13  ;;  %p3490_p8 = scmp.lt.s32.totalorder %s5100_s17, %s3484_s13 }
  0x8d   : > { %p3491_p11 = por %p3490_p8, %p3489_p7 }
  0x8f   : > { %p3492_p12 = pnand %p3491_p11, %p3485_p6 }
  0x91   : > { %3495 = shalt.err (!%p3492_p12)  }
  0x92   : > { %168 = dma.hbm_to_vmem [thread:$0]  %s156_s16, 16, %s5142_s7, %s5082_s4 }
  0x93   : > { %s186_s29 = sadd.s32 6, %s5062_s6  ;;  %s2410_s24 = scalar_lea.vmem %s5077_s23, 6 [#allocation2] }
  0x94   : > { %s5173_s18 = sld [smem:[#allocation5 + %s186_s29]]  ;;  %s199_s8 = sshll.u32 %s2410_s24, 4  ;;  %s5176_s8 = int_to_ptr.vmem [resolvable:$true] %s199_s8 }
  0x95   : > { %s3060_s14 = sshll.u32 %s5151_s26, 4  ;;  %s203_s5 = sadd.s32 7, %s5062_s6 }
  0x96   : > { %s173_s10 = scalar_lea.hbm %s6403_s1, %s3060_s14 }
  0x97   : > { %s3496_s12 = scalar_lea.hbm %s173_s10, 16  ;;  %p3499_p0 = scmp.lt.u32.totalorder %s173_s10, %s6403_s1 }
  0x98   : > { %p3497_p13 = scmp.ne.s32.totalorder %s173_s10, %s3496_s12  ;;  %p3500_p1 = scmp.lt.u32.totalorder %s5089_s9, %s3496_s12 }
  0x99   : > { %p3502_p3 = scmp.lt.u32.totalorder %s3496_s12, %s173_s10 }
  0x9a   : > { %p3501_p2 = por %p3500_p1, %p3499_p0 }
  0x9c   : > { %p3503_p4 = por %p3502_p3, %p3501_p2 }
  0x9e   : > { %p3504_p5 = pnand %p3503_p4, %p3497_p13 }
  0xa0   : > { %3507 = shalt.err (!%p3504_p5)  }
  0xa1   : > { %s3508_s7 = scalar_lea.vmem %s5158_s25, 16  ;;  %p3513_p7 = scmp.lt.s32.totalorder %s5158_s25, %s5097_s15 }
  0xa2   : > { %p3509_p6 = scmp.ne.s32.totalorder %s5158_s25, %s3508_s7  ;;  %p3514_p8 = scmp.lt.s32.totalorder %s5100_s17, %s3508_s7 }
  0xa4   : > { %p3515_p11 = por %p3514_p8, %p3513_p7 }
  0xa6   : > { %p3516_p12 = pnand %p3515_p11, %p3509_p6 }
  0xa8   : > { %3519 = shalt.err (!%p3516_p12)  }
  0xa9   : > { %185 = dma.hbm_to_vmem [thread:$0]  %s173_s10, 16, %s5158_s25, %s5082_s4 }
  0xaa   : > { %s5193_s26 = sld [smem:[#allocation5 + %s203_s5]]  ;;  %s2415_s16 = scalar_lea.vmem %s5077_s23, 7 [#allocation2] }
  0xab   : > { %s216_s13 = sshll.u32 %s2415_s16, 4  ;;  %s220_s29 = sadd.s32 8, %s5062_s6  ;;  %s5198_s13 = int_to_ptr.vmem [resolvable:$true] %s216_s13 }
  0xac   : > { %s3062_s24 = sshll.u32 %s5173_s18, 4  ;;  %s5203_s12 = sld [smem:[#allocation5 + %s220_s29]] }
  0xad   : > { %s190_s27 = scalar_lea.hbm %s6403_s1, %s3062_s24 }
  0xae   : > { %s3520_s3 = scalar_lea.hbm %s190_s27, 16  ;;  %p3523_p0 = scmp.lt.u32.totalorder %s190_s27, %s6403_s1 }
  0xaf   : > { %p3521_p13 = scmp.ne.s32.totalorder %s190_s27, %s3520_s3  ;;  %p3524_p1 = scmp.lt.u32.totalorder %s5089_s9, %s3520_s3 }
  0xb0   : > { %p3526_p3 = scmp.lt.u32.totalorder %s3520_s3, %s190_s27 }
  0xb1   : > { %p3525_p2 = por %p3524_p1, %p3523_p0 }
  0xb3   : > { %p3527_p4 = por %p3526_p3, %p3525_p2 }
  0xb5   : > { %p3528_p5 = pnand %p3527_p4, %p3521_p13 }
  0xb7   : > { %3531 = shalt.err (!%p3528_p5)  }
  0xb8   : > { %s3532_s25 = scalar_lea.vmem %s5176_s8, 16  ;;  %p3537_p7 = scmp.lt.s32.totalorder %s5176_s8, %s5097_s15 }
  0xb9   : > { %p3533_p6 = scmp.ne.s32.totalorder %s5176_s8, %s3532_s25  ;;  %p3538_p8 = scmp.lt.s32.totalorder %s5100_s17, %s3532_s25 }
  0xbb   : > { %p3539_p11 = por %p3538_p8, %p3537_p7 }
  0xbd   : > { %p3540_p12 = pnand %p3539_p11, %p3533_p6 }
  0xbf   : > { %3543 = shalt.err (!%p3540_p12)  }
  0xc0   : > { %202 = dma.hbm_to_vmem [thread:$0]  %s190_s27, 16, %s5176_s8, %s5082_s4 }
  0xc1   : > { %s2420_s18 = scalar_lea.vmem %s5077_s23, 8 [#allocation2]  ;;  %s237_s10 = sadd.s32 9, %s5062_s6 }
  0xc2   : > { %s3064_s5 = sshll.u32 %s5193_s26, 4  ;;  %s233_s16 = sshll.u32 %s2420_s18, 4  ;;  %s5222_s16 = int_to_ptr.vmem [resolvable:$true] %s233_s16 }
  0xc3   : > { %s207_s14 = scalar_lea.hbm %s6403_s1, %s3064_s5 }
  0xc4   : > { %s3544_s0 = scalar_lea.hbm %s207_s14, 16  ;;  %p3547_p0 = scmp.lt.u32.totalorder %s207_s14, %s6403_s1 }
  0xc5   : > { %p3545_p13 = scmp.ne.s32.totalorder %s207_s14, %s3544_s0  ;;  %p3548_p1 = scmp.lt.u32.totalorder %s5089_s9, %s3544_s0 }
  0xc6   : > { %p3550_p3 = scmp.lt.u32.totalorder %s3544_s0, %s207_s14 }
  0xc7   : > { %p3549_p2 = por %p3548_p1, %p3547_p0 }
  0xc9   : > { %p3551_p4 = por %p3550_p3, %p3549_p2 }
  0xcb   : > { %p3552_p5 = pnand %p3551_p4, %p3545_p13 }
  0xcd   : > { %3555 = shalt.err (!%p3552_p5)  }
  0xce   : > { %s3556_s8 = scalar_lea.vmem %s5198_s13, 16  ;;  %p3561_p7 = scmp.lt.s32.totalorder %s5198_s13, %s5097_s15 }
  0xcf   : > { %p3557_p6 = scmp.ne.s32.totalorder %s5198_s13, %s3556_s8  ;;  %p3562_p8 = scmp.lt.s32.totalorder %s5100_s17, %s3556_s8 }
  0xd1   : > { %p3563_p11 = por %p3562_p8, %p3561_p7 }
  0xd3   : > { %p3564_p12 = pnand %p3563_p11, %p3557_p6 }
  0xd5   : > { %3567 = shalt.err (!%p3564_p12)  }
  0xd6   : > { %219 = dma.hbm_to_vmem [thread:$0]  %s207_s14, 16, %s5198_s13, %s5082_s4 }
  0xd7   : > { %s3066_s26 = sshll.u32 %s5203_s12, 4  ;;  %s5236_s27 = sld [smem:[#allocation5 + %s237_s10]] }
  0xd8   : > { %s224_s18 = scalar_lea.hbm %s6403_s1, %s3066_s26  ;;  %s2425_s5 = scalar_lea.vmem %s5077_s23, 9 [#allocation2] }
  0xd9   : > { %s3568_s29 = scalar_lea.hbm %s224_s18, 16  ;;  %p3571_p0 = scmp.lt.u32.totalorder %s224_s18, %s6403_s1 }
  0xda   : > { %p3569_p13 = scmp.ne.s32.totalorder %s224_s18, %s3568_s29  ;;  %p3572_p1 = scmp.lt.u32.totalorder %s5089_s9, %s3568_s29 }
  0xdb   : > { %p3574_p3 = scmp.lt.u32.totalorder %s3568_s29, %s224_s18 }
  0xdc   : > { %p3573_p2 = por %p3572_p1, %p3571_p0 }
  0xde   : > { %p3575_p4 = por %p3574_p3, %p3573_p2 }
  0xe0   : > { %p3576_p5 = pnand %p3575_p4, %p3569_p13 }
  0xe2   : > { %3579 = shalt.err (!%p3576_p5)  }
  0xe3   : > { %s3580_s13 = scalar_lea.vmem %s5222_s16, 16  ;;  %p3585_p7 = scmp.lt.s32.totalorder %s5222_s16, %s5097_s15 }
  0xe4   : > { %p3581_p6 = scmp.ne.s32.totalorder %s5222_s16, %s3580_s13  ;;  %p3586_p8 = scmp.lt.s32.totalorder %s5100_s17, %s3580_s13 }
  0xe6   : > { %p3587_p11 = por %p3586_p8, %p3585_p7 }
  0xe8   : > { %p3588_p12 = pnand %p3587_p11, %p3581_p6 }
  0xea   : > { %3591 = shalt.err (!%p3588_p12)  }
  0xeb   : > { %236 = dma.hbm_to_vmem [thread:$0]  %s224_s18, 16, %s5222_s16, %s5082_s4 }
  0xec   : > { %s250_s12 = sshll.u32 %s2425_s5, 4  ;;  %s254_s10 = sadd.s32 10, %s5062_s6  ;;  %s251_s12 = int_to_ptr.vmem [resolvable:$true] %s250_s12 }
  0xed   : > { %s5254_s14 = sld [smem:[#allocation5 + %s254_s10]]  ;;  %s2430_s3 = scalar_lea.vmem %s5077_s23, 10 [#allocation2] }
  0xee   : > { %s271_s11 = sadd.s32 11, %s5062_s6  ;;  %s3068_s8 = sshll.u32 %s5236_s27, 4 }
  0xef   : > { %s267_s26 = sshll.u32 %s2430_s3, 4  ;;  %s241_s29 = scalar_lea.hbm %s6403_s1, %s3068_s8  ;;  %s5262_s26 = int_to_ptr.vmem [resolvable:$true] %s267_s26 }
  0xf0   : > { %s3592_s24 = scalar_lea.hbm %s241_s29, 16  ;;  %p3595_p0 = scmp.lt.u32.totalorder %s241_s29, %s6403_s1 }
  0xf1   : > { %p3593_p13 = scmp.ne.s32.totalorder %s241_s29, %s3592_s24  ;;  %p3596_p1 = scmp.lt.u32.totalorder %s5089_s9, %s3592_s24 }
  0xf2   : > { %p3598_p3 = scmp.lt.u32.totalorder %s3592_s24, %s241_s29 }
  0xf3   : > { %p3597_p2 = por %p3596_p1, %p3595_p0 }
  0xf5   : > { %p3599_p4 = por %p3598_p3, %p3597_p2 }
  0xf7   : > { %p3600_p5 = pnand %p3599_p4, %p3593_p13 }
  0xf9   : > { %3603 = shalt.err (!%p3600_p5)  }
  0xfa   : > { %s3604_s16 = scalar_lea.vmem %s251_s12, 16  ;;  %p3609_p7 = scmp.lt.s32.totalorder %s251_s12, %s5097_s15 }
  0xfb   : > { %p3605_p6 = scmp.ne.s32.totalorder %s251_s12, %s3604_s16  ;;  %p3610_p8 = scmp.lt.s32.totalorder %s5100_s17, %s3604_s16 }
  0xfd   : > { %p3611_p11 = por %p3610_p8, %p3609_p7 }
  0xff   : > { %p3612_p12 = pnand %p3611_p11, %p3605_p6 }
 0x101   : > { %3615 = shalt.err (!%p3612_p12)  }
 0x102   : > { %253 = dma.hbm_to_vmem [thread:$0]  %s241_s29, 16, %s251_s12, %s5082_s4 }
 0x103   : > { %s5271_s27 = sld [smem:[#allocation5 + %s271_s11]]  ;;  %s2435_s18 = scalar_lea.vmem %s5077_s23, 11 [#allocation2] }
 0x104   : > { %s3070_s5 = sshll.u32 %s5254_s14, 4  ;;  %s284_s10 = sshll.u32 %s2435_s18, 4  ;;  %s5278_s10 = int_to_ptr.vmem [resolvable:$true] %s284_s10 }
 0x105   : > { %s258_s7 = scalar_lea.hbm %s6403_s1, %s3070_s5 }
 0x106   : > { %s3616_s25 = scalar_lea.hbm %s258_s7, 16  ;;  %p3619_p0 = scmp.lt.u32.totalorder %s258_s7, %s6403_s1 }
 0x107   : > { %p3617_p13 = scmp.ne.s32.totalorder %s258_s7, %s3616_s25  ;;  %p3620_p1 = scmp.lt.u32.totalorder %s5089_s9, %s3616_s25 }
 0x108   : > { %p3622_p3 = scmp.lt.u32.totalorder %s3616_s25, %s258_s7 }
 0x109   : > { %p3621_p2 = por %p3620_p1, %p3619_p0 }
 0x10b   : > { %p3623_p4 = por %p3622_p3, %p3621_p2 }
 0x10d   : > { %p3624_p5 = pnand %p3623_p4, %p3617_p13 }
 0x10f   : > { %3627 = shalt.err (!%p3624_p5)  }
 0x110   : > { %s3628_s12 = scalar_lea.vmem %s5262_s26, 16  ;;  %p3633_p7 = scmp.lt.s32.totalorder %s5262_s26, %s5097_s15 }
 0x111   : > { %p3629_p6 = scmp.ne.s32.totalorder %s5262_s26, %s3628_s12  ;;  %p3634_p8 = scmp.lt.s32.totalorder %s5100_s17, %s3628_s12 }
 0x113   : > { %p3635_p11 = por %p3634_p8, %p3633_p7 }
 0x115   : > { %p3636_p12 = pnand %p3635_p11, %p3629_p6 }
 0x117   : > { %3639 = shalt.err (!%p3636_p12)  }
 0x118   : > { %270 = dma.hbm_to_vmem [thread:$0]  %s258_s7, 16, %s5262_s26, %s5082_s4 }
 0x119   : > { %s288_s14 = sadd.s32 12, %s5062_s6  ;;  %s2440_s11 = scalar_lea.vmem %s5077_s23, 12 [#allocation2] }
 0x11a   : > { %s5293_s29 = sld [smem:[#allocation5 + %s288_s14]]  ;;  %s301_s13 = sshll.u32 %s2440_s11, 4  ;;  %s5296_s13 = int_to_ptr.vmem [resolvable:$true] %s301_s13 }
 0x11b   : > { %s3072_s16 = sshll.u32 %s5271_s27, 4  ;;  %s305_s8 = sadd.s32 13, %s5062_s6 }
 0x11c   : > { %s275_s3 = scalar_lea.hbm %s6403_s1, %s3072_s16 }
 0x11d   : > { %s3640_s25 = scalar_lea.hbm %s275_s3, 16  ;;  %p3643_p0 = scmp.lt.u32.totalorder %s275_s3, %s6403_s1 }
 0x11e   : > { %p3641_p13 = scmp.ne.s32.totalorder %s275_s3, %s3640_s25  ;;  %p3644_p1 = scmp.lt.u32.totalorder %s5089_s9, %s3640_s25 }
 0x11f   : > { %p3646_p3 = scmp.lt.u32.totalorder %s3640_s25, %s275_s3 }
 0x120   : > { %p3645_p2 = por %p3644_p1, %p3643_p0 }
 0x122   : > { %p3647_p4 = por %p3646_p3, %p3645_p2 }
 0x124   : > { %p3648_p5 = pnand %p3647_p4, %p3641_p13 }
 0x126   : > { %3651 = shalt.err (!%p3648_p5)  }
 0x127   : > { %s3652_s26 = scalar_lea.vmem %s5278_s10, 16  ;;  %p3657_p7 = scmp.lt.s32.totalorder %s5278_s10, %s5097_s15 }
 0x128   : > { %p3653_p6 = scmp.ne.s32.totalorder %s5278_s10, %s3652_s26  ;;  %p3658_p8 = scmp.lt.s32.totalorder %s5100_s17, %s3652_s26 }
 0x12a   : > { %p3659_p11 = por %p3658_p8, %p3657_p7 }
 0x12c   : > { %p3660_p12 = pnand %p3659_p11, %p3653_p6 }
 0x12e   : > { %3663 = shalt.err (!%p3660_p12)  }
 0x12f   : > { %287 = dma.hbm_to_vmem [thread:$0]  %s275_s3, 16, %s5278_s10, %s5082_s4 }
 0x130   : > { %s5313_s27 = sld [smem:[#allocation5 + %s305_s8]]  ;;  %s2445_s7 = scalar_lea.vmem %s5077_s23, 13 [#allocation2] }
 0x131   : > { %s318_s12 = sshll.u32 %s2445_s7, 4  ;;  %s322_s14 = sadd.s32 14, %s5062_s6  ;;  %s5318_s12 = int_to_ptr.vmem [resolvable:$true] %s318_s12 }
 0x132   : > { %s3074_s11 = sshll.u32 %s5293_s29, 4  ;;  %s5323_s25 = sld [smem:[#allocation5 + %s322_s14]] }
 0x133   : > { %s292_s5 = scalar_lea.hbm %s6403_s1, %s3074_s11 }
 0x134   : > { %s3664_s24 = scalar_lea.hbm %s292_s5, 16  ;;  %p3667_p0 = scmp.lt.u32.totalorder %s292_s5, %s6403_s1 }
 0x135   : > { %p3665_p13 = scmp.ne.s32.totalorder %s292_s5, %s3664_s24  ;;  %p3668_p1 = scmp.lt.u32.totalorder %s5089_s9, %s3664_s24 }
 0x136   : > { %p3670_p3 = scmp.lt.u32.totalorder %s3664_s24, %s292_s5 }
 0x137   : > { %p3669_p2 = por %p3668_p1, %p3667_p0 }
 0x139   : > { %p3671_p4 = por %p3670_p3, %p3669_p2 }
 0x13b   : > { %p3672_p5 = pnand %p3671_p4, %p3665_p13 }
 0x13d   : > { %3675 = shalt.err (!%p3672_p5)  }
 0x13e   : > { %s3676_s10 = scalar_lea.vmem %s5296_s13, 16  ;;  %p3681_p7 = scmp.lt.s32.totalorder %s5296_s13, %s5097_s15 }
 0x13f   : > { %p3677_p6 = scmp.ne.s32.totalorder %s5296_s13, %s3676_s10  ;;  %p3682_p8 = scmp.lt.s32.totalorder %s5100_s17, %s3676_s10 }
 0x141   : > { %p3683_p11 = por %p3682_p8, %p3681_p7 }
 0x143   : > { %p3684_p12 = pnand %p3683_p11, %p3677_p6 }
 0x145   : > { %3687 = shalt.err (!%p3684_p12)  }
 0x146   : > { %304 = dma.hbm_to_vmem [thread:$0]  %s292_s5, 16, %s5296_s13, %s5082_s4 }
 0x147   : > { %s2450_s29 = scalar_lea.vmem %s5077_s23, 14 [#allocation2]  ;;  %s339_s3 = sadd.s32 15, %s5062_s6 }
 0x148   : > { %s3076_s8 = sshll.u32 %s5313_s27, 4  ;;  %s335_s7 = sshll.u32 %s2450_s29, 4  ;;  %s5342_s7 = int_to_ptr.vmem [resolvable:$true] %s335_s7 }
 0x149   : > { %s309_s16 = scalar_lea.hbm %s6403_s1, %s3076_s8 }
 0x14a   : > { %s3688_s18 = scalar_lea.hbm %s309_s16, 16  ;;  %p3691_p0 = scmp.lt.u32.totalorder %s309_s16, %s6403_s1 }
 0x14b   : > { %p3689_p13 = scmp.ne.s32.totalorder %s309_s16, %s3688_s18  ;;  %p3692_p1 = scmp.lt.u32.totalorder %s5089_s9, %s3688_s18 }
 0x14c   : > { %p3694_p3 = scmp.lt.u32.totalorder %s3688_s18, %s309_s16 }
 0x14d   : > { %p3693_p2 = por %p3692_p1, %p3691_p0 }
 0x14f   : > { %p3695_p4 = por %p3694_p3, %p3693_p2 }
 0x151   : > { %p3696_p5 = pnand %p3695_p4, %p3689_p13 }
 0x153   : > { %3699 = shalt.err (!%p3696_p5)  }
 0x154   : > { %s3700_s13 = scalar_lea.vmem %s5318_s12, 16  ;;  %p3705_p7 = scmp.lt.s32.totalorder %s5318_s12, %s5097_s15 }
 0x155   : > { %p3701_p6 = scmp.ne.s32.totalorder %s5318_s12, %s3700_s13  ;;  %p3706_p8 = scmp.lt.s32.totalorder %s5100_s17, %s3700_s13 }
 0x157   : > { %p3707_p11 = por %p3706_p8, %p3705_p7 }
 0x159   : > { %p3708_p12 = pnand %p3707_p11, %p3701_p6 }
 0x15b   : > { %3711 = shalt.err (!%p3708_p12)  }
 0x15c   : > { %321 = dma.hbm_to_vmem [thread:$0]  %s309_s16, 16, %s5318_s12, %s5082_s4 }
 0x15d   : > { %s3078_s27 = sshll.u32 %s5323_s25, 4  ;;  %s5356_s5 = sld [smem:[#allocation5 + %s339_s3]] }
 0x15e   : > { %s326_s29 = scalar_lea.hbm %s6403_s1, %s3078_s27  ;;  %s2455_s8 = scalar_lea.vmem %s5077_s23, 15 [#allocation2] }
 0x15f   : > { %s3712_s14 = scalar_lea.hbm %s326_s29, 16  ;;  %p3715_p0 = scmp.lt.u32.totalorder %s326_s29, %s6403_s1 }
 0x160   : > { %p3713_p13 = scmp.ne.s32.totalorder %s326_s29, %s3712_s14  ;;  %p3716_p1 = scmp.lt.u32.totalorder %s5089_s9, %s3712_s14 }
 0x161   : > { %p3718_p3 = scmp.lt.u32.totalorder %s3712_s14, %s326_s29 }
 0x162   : > { %p3717_p2 = por %p3716_p1, %p3715_p0 }
 0x164   : > { %p3719_p4 = por %p3718_p3, %p3717_p2 }
 0x166   : > { %p3720_p5 = pnand %p3719_p4, %p3713_p13 }
 0x168   : > { %3723 = shalt.err (!%p3720_p5)  }
 0x169   : > { %s3724_s12 = scalar_lea.vmem %s5342_s7, 16  ;;  %p3729_p7 = scmp.lt.s32.totalorder %s5342_s7, %s5097_s15 }
 0x16a   : > { %p3725_p6 = scmp.ne.s32.totalorder %s5342_s7, %s3724_s12  ;;  %p3730_p8 = scmp.lt.s32.totalorder %s5100_s17, %s3724_s12 }
 0x16c   : > { %p3731_p11 = por %p3730_p8, %p3729_p7 }
 0x16e   : > { %p3732_p12 = pnand %p3731_p11, %p3725_p6 }
 0x170   : > { %3735 = shalt.err (!%p3732_p12)  }
 0x171   : > { %338 = dma.hbm_to_vmem [thread:$0]  %s326_s29, 16, %s5342_s7, %s5082_s4 }
 0x172   : > { %s352_s25 = sshll.u32 %s2455_s8, 4  ;;  %s356_s3 = sadd.s32 16, %s5062_s6  ;;  %s353_s25 = int_to_ptr.vmem [resolvable:$true] %s352_s25 }
 0x173   : > { %s5374_s16 = sld [smem:[#allocation5 + %s356_s3]]  ;;  %s2460_s24 = scalar_lea.vmem %s5077_s23, 16 [#allocation2] }
 0x174   : > { %s373_s0 = sadd.s32 17, %s5062_s6  ;;  %s3080_s13 = sshll.u32 %s5356_s5, 4 }
 0x175   : > { %s369_s27 = sshll.u32 %s2460_s24, 4  ;;  %s343_s14 = scalar_lea.hbm %s6403_s1, %s3080_s13  ;;  %s5382_s27 = int_to_ptr.vmem [resolvable:$true] %s369_s27 }
 0x176   : > { %s3736_s11 = scalar_lea.hbm %s343_s14, 16  ;;  %p3739_p0 = scmp.lt.u32.totalorder %s343_s14, %s6403_s1 }
 0x177   : > { %p3737_p13 = scmp.ne.s32.totalorder %s343_s14, %s3736_s11  ;;  %p3740_p1 = scmp.lt.u32.totalorder %s5089_s9, %s3736_s11 }
 0x178   : > { %p3742_p3 = scmp.lt.u32.totalorder %s3736_s11, %s343_s14 }
 0x179   : > { %p3741_p2 = por %p3740_p1, %p3739_p0 }
 0x17b   : > { %p3743_p4 = por %p3742_p3, %p3741_p2 }
 0x17d   : > { %p3744_p5 = pnand %p3743_p4, %p3737_p13 }
 0x17f   : > { %3747 = shalt.err (!%p3744_p5)  }
 0x180   : > { %s3748_s7 = scalar_lea.vmem %s353_s25, 16  ;;  %p3753_p7 = scmp.lt.s32.totalorder %s353_s25, %s5097_s15 }
 0x181   : > { %p3749_p6 = scmp.ne.s32.totalorder %s353_s25, %s3748_s7  ;;  %p3754_p8 = scmp.lt.s32.totalorder %s5100_s17, %s3748_s7 }
 0x183   : > { %p3755_p11 = por %p3754_p8, %p3753_p7 }
 0x185   : > { %p3756_p12 = pnand %p3755_p11, %p3749_p6 }
 0x187   : > { %3759 = shalt.err (!%p3756_p12)  }
 0x188   : > { %355 = dma.hbm_to_vmem [thread:$0]  %s343_s14, 16, %s353_s25, %s5082_s4 }
 0x189   : > { %s5391_s5 = sld [smem:[#allocation5 + %s373_s0]]  ;;  %s2465_s29 = scalar_lea.vmem %s5077_s23, 17 [#allocation2] }
 0x18a   : > { %s3082_s8 = sshll.u32 %s5374_s16, 4  ;;  %s386_s3 = sshll.u32 %s2465_s29, 4  ;;  %s5398_s3 = int_to_ptr.vmem [resolvable:$true] %s386_s3 }
 0x18b   : > { %s360_s26 = scalar_lea.hbm %s6403_s1, %s3082_s8 }
 0x18c   : > { %s3760_s10 = scalar_lea.hbm %s360_s26, 16  ;;  %p3763_p0 = scmp.lt.u32.totalorder %s360_s26, %s6403_s1 }
 0x18d   : > { %p3761_p13 = scmp.ne.s32.totalorder %s360_s26, %s3760_s10  ;;  %p3764_p1 = scmp.lt.u32.totalorder %s5089_s9, %s3760_s10 }
 0x18e   : > { %p3766_p3 = scmp.lt.u32.totalorder %s3760_s10, %s360_s26 }
 0x18f   : > { %p3765_p2 = por %p3764_p1, %p3763_p0 }
 0x191   : > { %p3767_p4 = por %p3766_p3, %p3765_p2 }
 0x193   : > { %p3768_p5 = pnand %p3767_p4, %p3761_p13 }
 0x195   : > { %3771 = shalt.err (!%p3768_p5)  }
 0x196   : > { %s3772_s25 = scalar_lea.vmem %s5382_s27, 16  ;;  %p3777_p7 = scmp.lt.s32.totalorder %s5382_s27, %s5097_s15 }
 0x197   : > { %p3773_p6 = scmp.ne.s32.totalorder %s5382_s27, %s3772_s25  ;;  %p3778_p8 = scmp.lt.s32.totalorder %s5100_s17, %s3772_s25 }
 0x199   : > { %p3779_p11 = por %p3778_p8, %p3777_p7 }
 0x19b   : > { %p3780_p12 = pnand %p3779_p11, %p3773_p6 }
 0x19d   : > { %3783 = shalt.err (!%p3780_p12)  }
 0x19e   : > { %372 = dma.hbm_to_vmem [thread:$0]  %s360_s26, 16, %s5382_s27, %s5082_s4 }
 0x19f   : > { %s390_s16 = sadd.s32 18, %s5062_s6  ;;  %s2470_s0 = scalar_lea.vmem %s5077_s23, 18 [#allocation2] }
 0x1a0   : > { %s5413_s14 = sld [smem:[#allocation5 + %s390_s16]]  ;;  %s403_s12 = sshll.u32 %s2470_s0, 4  ;;  %s5416_s12 = int_to_ptr.vmem [resolvable:$true] %s403_s12 }
 0x1a1   : > { %s3084_s7 = sshll.u32 %s5391_s5, 4  ;;  %s407_s13 = sadd.s32 19, %s5062_s6 }
 0x1a2   : > { %s377_s24 = scalar_lea.hbm %s6403_s1, %s3084_s7 }
 0x1a3   : > { %s3784_s10 = scalar_lea.hbm %s377_s24, 16  ;;  %p3787_p0 = scmp.lt.u32.totalorder %s377_s24, %s6403_s1 }
 0x1a4   : > { %p3785_p13 = scmp.ne.s32.totalorder %s377_s24, %s3784_s10  ;;  %p3788_p1 = scmp.lt.u32.totalorder %s5089_s9, %s3784_s10 }
 0x1a5   : > { %p3790_p3 = scmp.lt.u32.totalorder %s3784_s10, %s377_s24 }
 0x1a6   : > { %p3789_p2 = por %p3788_p1, %p3787_p0 }
 0x1a8   : > { %p3791_p4 = por %p3790_p3, %p3789_p2 }
 0x1aa   : > { %p3792_p5 = pnand %p3791_p4, %p3785_p13 }
 0x1ac   : > { %3795 = shalt.err (!%p3792_p5)  }
 0x1ad   : > { %s3796_s27 = scalar_lea.vmem %s5398_s3, 16  ;;  %p3801_p7 = scmp.lt.s32.totalorder %s5398_s3, %s5097_s15 }
 0x1ae   : > { %p3797_p6 = scmp.ne.s32.totalorder %s5398_s3, %s3796_s27  ;;  %p3802_p8 = scmp.lt.s32.totalorder %s5100_s17, %s3796_s27 }
 0x1b0   : > { %p3803_p11 = por %p3802_p8, %p3801_p7 }
 0x1b2   : > { %p3804_p12 = pnand %p3803_p11, %p3797_p6 }
 0x1b4   : > { %3807 = shalt.err (!%p3804_p12)  }
 0x1b5   : > { %389 = dma.hbm_to_vmem [thread:$0]  %s377_s24, 16, %s5398_s3, %s5082_s4 }
 0x1b6   : > { %s5433_s5 = sld [smem:[#allocation5 + %s407_s13]]  ;;  %s2475_s26 = scalar_lea.vmem %s5077_s23, 19 [#allocation2] }
 0x1b7   : > { %s420_s25 = sshll.u32 %s2475_s26, 4  ;;  %s424_s16 = sadd.s32 20, %s5062_s6  ;;  %s5438_s25 = int_to_ptr.vmem [resolvable:$true] %s420_s25 }
 0x1b8   : > { %s3086_s0 = sshll.u32 %s5413_s14, 4  ;;  %s5443_s10 = sld [smem:[#allocation5 + %s424_s16]] }
 0x1b9   : > { %s394_s8 = scalar_lea.hbm %s6403_s1, %s3086_s0 }
 0x1ba   : > { %s3808_s11 = scalar_lea.hbm %s394_s8, 16  ;;  %p3811_p0 = scmp.lt.u32.totalorder %s394_s8, %s6403_s1 }
 0x1bb   : > { %p3809_p13 = scmp.ne.s32.totalorder %s394_s8, %s3808_s11  ;;  %p3812_p1 = scmp.lt.u32.totalorder %s5089_s9, %s3808_s11 }
 0x1bc   : > { %p3814_p3 = scmp.lt.u32.totalorder %s3808_s11, %s394_s8 }
 0x1bd   : > { %p3813_p2 = por %p3812_p1, %p3811_p0 }
 0x1bf   : > { %p3815_p4 = por %p3814_p3, %p3813_p2 }
 0x1c1   : > { %p3816_p5 = pnand %p3815_p4, %p3809_p13 }
 0x1c3   : > { %3819 = shalt.err (!%p3816_p5)  }
 0x1c4   : > { %s3820_s3 = scalar_lea.vmem %s5416_s12, 16  ;;  %p3825_p7 = scmp.lt.s32.totalorder %s5416_s12, %s5097_s15 }
 0x1c5   : > { %p3821_p6 = scmp.ne.s32.totalorder %s5416_s12, %s3820_s3  ;;  %p3826_p8 = scmp.lt.s32.totalorder %s5100_s17, %s3820_s3 }
 0x1c7   : > { %p3827_p11 = por %p3826_p8, %p3825_p7 }
 0x1c9   : > { %p3828_p12 = pnand %p3827_p11, %p3821_p6 }
 0x1cb   : > { %3831 = shalt.err (!%p3828_p12)  }
 0x1cc   : > { %406 = dma.hbm_to_vmem [thread:$0]  %s394_s8, 16, %s5416_s12, %s5082_s4 }
 0x1cd   : > { %s2480_s14 = scalar_lea.vmem %s5077_s23, 20 [#allocation2]  ;;  %s441_s24 = sadd.s32 21, %s5062_s6 }
 0x1ce   : > { %s3088_s13 = sshll.u32 %s5433_s5, 4  ;;  %s437_s26 = sshll.u32 %s2480_s14, 4  ;;  %s5462_s26 = int_to_ptr.vmem [resolvable:$true] %s437_s26 }
 0x1cf   : > { %s411_s7 = scalar_lea.hbm %s6403_s1, %s3088_s13 }
 0x1d0   : > { %s3832_s29 = scalar_lea.hbm %s411_s7, 16  ;;  %p3835_p0 = scmp.lt.u32.totalorder %s411_s7, %s6403_s1 }
 0x1d1   : > { %p3833_p13 = scmp.ne.s32.totalorder %s411_s7, %s3832_s29  ;;  %p3836_p1 = scmp.lt.u32.totalorder %s5089_s9, %s3832_s29 }
 0x1d2   : > { %p3838_p3 = scmp.lt.u32.totalorder %s3832_s29, %s411_s7 }
 0x1d3   : > { %p3837_p2 = por %p3836_p1, %p3835_p0 }
 0x1d5   : > { %p3839_p4 = por %p3838_p3, %p3837_p2 }
 0x1d7   : > { %p3840_p5 = pnand %p3839_p4, %p3833_p13 }
 0x1d9   : > { %3843 = shalt.err (!%p3840_p5)  }
 0x1da   : > { %s3844_s12 = scalar_lea.vmem %s5438_s25, 16  ;;  %p3849_p7 = scmp.lt.s32.totalorder %s5438_s25, %s5097_s15 }
 0x1db   : > { %p3845_p6 = scmp.ne.s32.totalorder %s5438_s25, %s3844_s12  ;;  %p3850_p8 = scmp.lt.s32.totalorder %s5100_s17, %s3844_s12 }
 0x1dd   : > { %p3851_p11 = por %p3850_p8, %p3849_p7 }
 0x1df   : > { %p3852_p12 = pnand %p3851_p11, %p3845_p6 }
 0x1e1   : > { %3855 = shalt.err (!%p3852_p12)  }
 0x1e2   : > { %423 = dma.hbm_to_vmem [thread:$0]  %s411_s7, 16, %s5438_s25, %s5082_s4 }
 0x1e3   : > { %s3090_s5 = sshll.u32 %s5443_s10, 4  ;;  %s5476_s8 = sld [smem:[#allocation5 + %s441_s24]] }
 0x1e4   : > { %s428_s14 = scalar_lea.hbm %s6403_s1, %s3090_s5  ;;  %s2485_s13 = scalar_lea.vmem %s5077_s23, 21 [#allocation2] }
 0x1e5   : > { %s3856_s16 = scalar_lea.hbm %s428_s14, 16  ;;  %p3859_p0 = scmp.lt.u32.totalorder %s428_s14, %s6403_s1 }
 0x1e6   : > { %p3857_p13 = scmp.ne.s32.totalorder %s428_s14, %s3856_s16  ;;  %p3860_p1 = scmp.lt.u32.totalorder %s5089_s9, %s3856_s16 }
 0x1e7   : > { %p3862_p3 = scmp.lt.u32.totalorder %s3856_s16, %s428_s14 }
 0x1e8   : > { %p3861_p2 = por %p3860_p1, %p3859_p0 }
 0x1ea   : > { %p3863_p4 = por %p3862_p3, %p3861_p2 }
 0x1ec   : > { %p3864_p5 = pnand %p3863_p4, %p3857_p13 }
 0x1ee   : > { %3867 = shalt.err (!%p3864_p5)  }
 0x1ef   : > { %s3868_s25 = scalar_lea.vmem %s5462_s26, 16  ;;  %p3873_p7 = scmp.lt.s32.totalorder %s5462_s26, %s5097_s15 }
 0x1f0   : > { %p3869_p6 = scmp.ne.s32.totalorder %s5462_s26, %s3868_s25  ;;  %p3874_p8 = scmp.lt.s32.totalorder %s5100_s17, %s3868_s25 }
 0x1f2   : > { %p3875_p11 = por %p3874_p8, %p3873_p7 }
 0x1f4   : > { %p3876_p12 = pnand %p3875_p11, %p3869_p6 }
 0x1f6   : > { %3879 = shalt.err (!%p3876_p12)  }
 0x1f7   : > { %440 = dma.hbm_to_vmem [thread:$0]  %s428_s14, 16, %s5462_s26, %s5082_s4 }
 0x1f8   : > { %s454_s10 = sshll.u32 %s2485_s13, 4  ;;  %s458_s24 = sadd.s32 22, %s5062_s6  ;;  %s455_s10 = int_to_ptr.vmem [resolvable:$true] %s454_s10 }
 0x1f9   : > { %s5494_s7 = sld [smem:[#allocation5 + %s458_s24]]  ;;  %s2490_s11 = scalar_lea.vmem %s5077_s23, 22 [#allocation2] }
 0x1fa   : > { %s475_s18 = sadd.s32 23, %s5062_s6  ;;  %s3092_s12 = sshll.u32 %s5476_s8, 4 }
 0x1fb   : > { %s471_s5 = sshll.u32 %s2490_s11, 4  ;;  %s445_s16 = scalar_lea.hbm %s6403_s1, %s3092_s12  ;;  %s5502_s5 = int_to_ptr.vmem [resolvable:$true] %s471_s5 }
 0x1fc   : > { %s3880_s0 = scalar_lea.hbm %s445_s16, 16  ;;  %p3883_p0 = scmp.lt.u32.totalorder %s445_s16, %s6403_s1 }
 0x1fd   : > { %p3881_p13 = scmp.ne.s32.totalorder %s445_s16, %s3880_s0  ;;  %p3884_p1 = scmp.lt.u32.totalorder %s5089_s9, %s3880_s0 }
 0x1fe   : > { %p3886_p3 = scmp.lt.u32.totalorder %s3880_s0, %s445_s16 }
 0x1ff   : > { %p3885_p2 = por %p3884_p1, %p3883_p0 }
 0x201   : > { %p3887_p4 = por %p3886_p3, %p3885_p2 }
 0x203   : > { %p3888_p5 = pnand %p3887_p4, %p3881_p13 }
 0x205   : > { %3891 = shalt.err (!%p3888_p5)  }
 0x206   : > { %s3892_s26 = scalar_lea.vmem %s455_s10, 16  ;;  %p3897_p7 = scmp.lt.s32.totalorder %s455_s10, %s5097_s15 }
 0x207   : > { %p3893_p6 = scmp.ne.s32.totalorder %s455_s10, %s3892_s26  ;;  %p3898_p8 = scmp.lt.s32.totalorder %s5100_s17, %s3892_s26 }
 0x209   : > { %p3899_p11 = por %p3898_p8, %p3897_p7 }
 0x20b   : > { %p3900_p12 = pnand %p3899_p11, %p3893_p6 }
 0x20d   : > { %3903 = shalt.err (!%p3900_p12)  }
 0x20e   : > { %457 = dma.hbm_to_vmem [thread:$0]  %s445_s16, 16, %s455_s10, %s5082_s4 }
 0x20f   : > { %s5511_s8 = sld [smem:[#allocation5 + %s475_s18]]  ;;  %s2495_s14 = scalar_lea.vmem %s5077_s23, 23 [#allocation2] }
 0x210   : > { %s3094_s13 = sshll.u32 %s5494_s7, 4  ;;  %s488_s24 = sshll.u32 %s2495_s14, 4  ;;  %s5518_s24 = int_to_ptr.vmem [resolvable:$true] %s488_s24 }
 0x211   : > { %s462_s27 = scalar_lea.hbm %s6403_s1, %s3094_s13 }
 0x212   : > { %s3904_s3 = scalar_lea.hbm %s462_s27, 16  ;;  %p3907_p0 = scmp.lt.u32.totalorder %s462_s27, %s6403_s1 }
 0x213   : > { %p3905_p13 = scmp.ne.s32.totalorder %s462_s27, %s3904_s3  ;;  %p3908_p1 = scmp.lt.u32.totalorder %s5089_s9, %s3904_s3 }
 0x214   : > { %p3910_p3 = scmp.lt.u32.totalorder %s3904_s3, %s462_s27 }
 0x215   : > { %p3909_p2 = por %p3908_p1, %p3907_p0 }
 0x217   : > { %p3911_p4 = por %p3910_p3, %p3909_p2 }
 0x219   : > { %p3912_p5 = pnand %p3911_p4, %p3905_p13 }
 0x21b   : > { %3915 = shalt.err (!%p3912_p5)  }
 0x21c   : > { %s3916_s10 = scalar_lea.vmem %s5502_s5, 16  ;;  %p3921_p7 = scmp.lt.s32.totalorder %s5502_s5, %s5097_s15 }
 0x21d   : > { %p3917_p6 = scmp.ne.s32.totalorder %s5502_s5, %s3916_s10  ;;  %p3922_p8 = scmp.lt.s32.totalorder %s5100_s17, %s3916_s10 }
 0x21f   : > { %p3923_p11 = por %p3922_p8, %p3921_p7 }
 0x221   : > { %p3924_p12 = pnand %p3923_p11, %p3917_p6 }
 0x223   : > { %3927 = shalt.err (!%p3924_p12)  }
 0x224   : > { %474 = dma.hbm_to_vmem [thread:$0]  %s462_s27, 16, %s5502_s5, %s5082_s4 }
 0x225   : > { %s492_s7 = sadd.s32 24, %s5062_s6  ;;  %s2500_s18 = scalar_lea.vmem %s5077_s23, 24 [#allocation2] }
 0x226   : > { %s5533_s16 = sld [smem:[#allocation5 + %s492_s7]]  ;;  %s505_s25 = sshll.u32 %s2500_s18, 4  ;;  %s5536_s25 = int_to_ptr.vmem [resolvable:$true] %s505_s25 }
 0x227   : > { %s3096_s26 = sshll.u32 %s5511_s8, 4  ;;  %s509_s12 = sadd.s32 25, %s5062_s6 }
 0x228   : > { %s479_s11 = scalar_lea.hbm %s6403_s1, %s3096_s26 }
 0x229   : > { %s3928_s3 = scalar_lea.hbm %s479_s11, 16  ;;  %p3931_p0 = scmp.lt.u32.totalorder %s479_s11, %s6403_s1 }
 0x22a   : > { %p3929_p13 = scmp.ne.s32.totalorder %s479_s11, %s3928_s3  ;;  %p3932_p1 = scmp.lt.u32.totalorder %s5089_s9, %s3928_s3 }
 0x22b   : > { %p3934_p3 = scmp.lt.u32.totalorder %s3928_s3, %s479_s11 }
 0x22c   : > { %p3933_p2 = por %p3932_p1, %p3931_p0 }
 0x22e   : > { %p3935_p4 = por %p3934_p3, %p3933_p2 }
 0x230   : > { %p3936_p5 = pnand %p3935_p4, %p3929_p13 }
 0x232   : > { %3939 = shalt.err (!%p3936_p5)  }
 0x233   : > { %s3940_s5 = scalar_lea.vmem %s5518_s24, 16  ;;  %p3945_p7 = scmp.lt.s32.totalorder %s5518_s24, %s5097_s15 }
 0x234   : > { %p3941_p6 = scmp.ne.s32.totalorder %s5518_s24, %s3940_s5  ;;  %p3946_p8 = scmp.lt.s32.totalorder %s5100_s17, %s3940_s5 }
 0x236   : > { %p3947_p11 = por %p3946_p8, %p3945_p7 }
 0x238   : > { %p3948_p12 = pnand %p3947_p11, %p3941_p6 }
 0x23a   : > { %3951 = shalt.err (!%p3948_p12)  }
 0x23b   : > { %491 = dma.hbm_to_vmem [thread:$0]  %s479_s11, 16, %s5518_s24, %s5082_s4 }
 0x23c   : > { %s5553_s8 = sld [smem:[#allocation5 + %s509_s12]]  ;;  %s2505_s27 = scalar_lea.vmem %s5077_s23, 25 [#allocation2] }
 0x23d   : > { %s522_s10 = sshll.u32 %s2505_s27, 4  ;;  %s526_s7 = sadd.s32 26, %s5062_s6  ;;  %s5558_s10 = int_to_ptr.vmem [resolvable:$true] %s522_s10 }
 0x23e   : > { %s3098_s18 = sshll.u32 %s5533_s16, 4  ;;  %s5563_s3 = sld [smem:[#allocation5 + %s526_s7]] }
 0x23f   : > { %s496_s13 = scalar_lea.hbm %s6403_s1, %s3098_s18 }
 0x240   : > { %s3952_s0 = scalar_lea.hbm %s496_s13, 16  ;;  %p3955_p0 = scmp.lt.u32.totalorder %s496_s13, %s6403_s1 }
 0x241   : > { %p3953_p13 = scmp.ne.s32.totalorder %s496_s13, %s3952_s0  ;;  %p3956_p1 = scmp.lt.u32.totalorder %s5089_s9, %s3952_s0 }
 0x242   : > { %p3958_p3 = scmp.lt.u32.totalorder %s3952_s0, %s496_s13 }
 0x243   : > { %p3957_p2 = por %p3956_p1, %p3955_p0 }
 0x245   : > { %p3959_p4 = por %p3958_p3, %p3957_p2 }
 0x247   : > { %p3960_p5 = pnand %p3959_p4, %p3953_p13 }
 0x249   : > { %3963 = shalt.err (!%p3960_p5)  }
 0x24a   : > { %s3964_s24 = scalar_lea.vmem %s5536_s25, 16  ;;  %p3969_p7 = scmp.lt.s32.totalorder %s5536_s25, %s5097_s15 }
 0x24b   : > { %p3965_p6 = scmp.ne.s32.totalorder %s5536_s25, %s3964_s24  ;;  %p3970_p8 = scmp.lt.s32.totalorder %s5100_s17, %s3964_s24 }
 0x24d   : > { %p3971_p11 = por %p3970_p8, %p3969_p7 }
 0x24f   : > { %p3972_p12 = pnand %p3971_p11, %p3965_p6 }
 0x251   : > { %3975 = shalt.err (!%p3972_p12)  }
 0x252   : > { %508 = dma.hbm_to_vmem [thread:$0]  %s496_s13, 16, %s5536_s25, %s5082_s4 }
 0x253   : > { %s2510_s16 = scalar_lea.vmem %s5077_s23, 26 [#allocation2]  ;;  %s543_s11 = sadd.s32 27, %s5062_s6 }
 0x254   : > { %s3100_s12 = sshll.u32 %s5553_s8, 4  ;;  %s539_s27 = sshll.u32 %s2510_s16, 4  ;;  %s5582_s27 = int_to_ptr.vmem [resolvable:$true] %s539_s27 }
 0x255   : > { %s513_s26 = scalar_lea.hbm %s6403_s1, %s3100_s12 }
 0x256   : > { %s3976_s14 = scalar_lea.hbm %s513_s26, 16  ;;  %p3979_p0 = scmp.lt.u32.totalorder %s513_s26, %s6403_s1 }
 0x257   : > { %p3977_p13 = scmp.ne.s32.totalorder %s513_s26, %s3976_s14  ;;  %p3980_p1 = scmp.lt.u32.totalorder %s5089_s9, %s3976_s14 }
 0x258   : > { %p3982_p3 = scmp.lt.u32.totalorder %s3976_s14, %s513_s26 }
 0x259   : > { %p3981_p2 = por %p3980_p1, %p3979_p0 }
 0x25b   : > { %p3983_p4 = por %p3982_p3, %p3981_p2 }
 0x25d   : > { %p3984_p5 = pnand %p3983_p4, %p3977_p13 }
 0x25f   : > { %3987 = shalt.err (!%p3984_p5)  }
 0x260   : > { %s3988_s25 = scalar_lea.vmem %s5558_s10, 16  ;;  %p3993_p7 = scmp.lt.s32.totalorder %s5558_s10, %s5097_s15 }
 0x261   : > { %p3989_p6 = scmp.ne.s32.totalorder %s5558_s10, %s3988_s25  ;;  %p3994_p8 = scmp.lt.s32.totalorder %s5100_s17, %s3988_s25 }
 0x263   : > { %p3995_p11 = por %p3994_p8, %p3993_p7 }
 0x265   : > { %p3996_p12 = pnand %p3995_p11, %p3989_p6 }
 0x267   : > { %3999 = shalt.err (!%p3996_p12)  }
 0x268   : > { %525 = dma.hbm_to_vmem [thread:$0]  %s513_s26, 16, %s5558_s10, %s5082_s4 }
 0x269   : > { %s3102_s8 = sshll.u32 %s5563_s3, 4  ;;  %s5596_s13 = sld [smem:[#allocation5 + %s543_s11]] }
 0x26a   : > { %s530_s16 = scalar_lea.hbm %s6403_s1, %s3102_s8  ;;  %s2515_s12 = scalar_lea.vmem %s5077_s23, 27 [#allocation2] }
 0x26b   : > { %s4000_s7 = scalar_lea.hbm %s530_s16, 16  ;;  %p4003_p0 = scmp.lt.u32.totalorder %s530_s16, %s6403_s1 }
 0x26c   : > { %p4001_p13 = scmp.ne.s32.totalorder %s530_s16, %s4000_s7  ;;  %p4004_p1 = scmp.lt.u32.totalorder %s5089_s9, %s4000_s7 }
 0x26d   : > { %p4006_p3 = scmp.lt.u32.totalorder %s4000_s7, %s530_s16 }
 0x26e   : > { %p4005_p2 = por %p4004_p1, %p4003_p0 }
 0x270   : > { %p4007_p4 = por %p4006_p3, %p4005_p2 }
 0x272   : > { %p4008_p5 = pnand %p4007_p4, %p4001_p13 }
 0x274   : > { %4011 = shalt.err (!%p4008_p5)  }
 0x275   : > { %s4012_s10 = scalar_lea.vmem %s5582_s27, 16  ;;  %p4017_p7 = scmp.lt.s32.totalorder %s5582_s27, %s5097_s15 }
 0x276   : > { %p4013_p6 = scmp.ne.s32.totalorder %s5582_s27, %s4012_s10  ;;  %p4018_p8 = scmp.lt.s32.totalorder %s5100_s17, %s4012_s10 }
 0x278   : > { %p4019_p11 = por %p4018_p8, %p4017_p7 }
 0x27a   : > { %p4020_p12 = pnand %p4019_p11, %p4013_p6 }
 0x27c   : > { %4023 = shalt.err (!%p4020_p12)  }
 0x27d   : > { %542 = dma.hbm_to_vmem [thread:$0]  %s530_s16, 16, %s5582_s27, %s5082_s4 }
 0x27e   : > { %s556_s3 = sshll.u32 %s2515_s12, 4  ;;  %s560_s11 = sadd.s32 28, %s5062_s6  ;;  %s557_s3 = int_to_ptr.vmem [resolvable:$true] %s556_s3 }
 0x27f   : > { %s5614_s26 = sld [smem:[#allocation5 + %s560_s11]]  ;;  %s2520_s0 = scalar_lea.vmem %s5077_s23, 28 [#allocation2] }
 0x280   : > { %s577_s29 = sadd.s32 29, %s5062_s6  ;;  %s3104_s25 = sshll.u32 %s5596_s13, 4 }
 0x281   : > { %s573_s8 = sshll.u32 %s2520_s0, 4  ;;  %s547_s7 = scalar_lea.hbm %s6403_s1, %s3104_s25  ;;  %s5622_s8 = int_to_ptr.vmem [resolvable:$true] %s573_s8 }
 0x282   : > { %s4024_s18 = scalar_lea.hbm %s547_s7, 16  ;;  %p4027_p0 = scmp.lt.u32.totalorder %s547_s7, %s6403_s1 }
 0x283   : > { %p4025_p13 = scmp.ne.s32.totalorder %s547_s7, %s4024_s18  ;;  %p4028_p1 = scmp.lt.u32.totalorder %s5089_s9, %s4024_s18 }
 0x284   : > { %p4030_p3 = scmp.lt.u32.totalorder %s4024_s18, %s547_s7 }
 0x285   : > { %p4029_p2 = por %p4028_p1, %p4027_p0 }
 0x287   : > { %p4031_p4 = por %p4030_p3, %p4029_p2 }
 0x289   : > { %p4032_p5 = pnand %p4031_p4, %p4025_p13 }
 0x28b   : > { %4035 = shalt.err (!%p4032_p5)  }
 0x28c   : > { %s4036_s27 = scalar_lea.vmem %s557_s3, 16  ;;  %p4041_p7 = scmp.lt.s32.totalorder %s557_s3, %s5097_s15 }
 0x28d   : > { %p4037_p6 = scmp.ne.s32.totalorder %s557_s3, %s4036_s27  ;;  %p4042_p8 = scmp.lt.s32.totalorder %s5100_s17, %s4036_s27 }
 0x28f   : > { %p4043_p11 = por %p4042_p8, %p4041_p7 }
 0x291   : > { %p4044_p12 = pnand %p4043_p11, %p4037_p6 }
 0x293   : > { %4047 = shalt.err (!%p4044_p12)  }
 0x294   : > { %559 = dma.hbm_to_vmem [thread:$0]  %s547_s7, 16, %s557_s3, %s5082_s4 }
 0x295   : > { %s5631_s13 = sld [smem:[#allocation5 + %s577_s29]]  ;;  %s2525_s16 = scalar_lea.vmem %s5077_s23, 29 [#allocation2] }
 0x296   : > { %s3106_s12 = sshll.u32 %s5614_s26, 4  ;;  %s590_s11 = sshll.u32 %s2525_s16, 4  ;;  %s5638_s11 = int_to_ptr.vmem [resolvable:$true] %s590_s11 }
 0x297   : > { %s564_s5 = scalar_lea.hbm %s6403_s1, %s3106_s12 }
 0x298   : > { %s4048_s24 = scalar_lea.hbm %s564_s5, 16  ;;  %p4051_p0 = scmp.lt.u32.totalorder %s564_s5, %s6403_s1 }
 0x299   : > { %p4049_p13 = scmp.ne.s32.totalorder %s564_s5, %s4048_s24  ;;  %p4052_p1 = scmp.lt.u32.totalorder %s5089_s9, %s4048_s24 }
 0x29a   : > { %p4054_p3 = scmp.lt.u32.totalorder %s4048_s24, %s564_s5 }
 0x29b   : > { %p4053_p2 = por %p4052_p1, %p4051_p0 }
 0x29d   : > { %p4055_p4 = por %p4054_p3, %p4053_p2 }
 0x29f   : > { %p4056_p5 = pnand %p4055_p4, %p4049_p13 }
 0x2a1   : > { %4059 = shalt.err (!%p4056_p5)  }
 0x2a2   : > { %s4060_s3 = scalar_lea.vmem %s5622_s8, 16  ;;  %p4065_p7 = scmp.lt.s32.totalorder %s5622_s8, %s5097_s15 }
 0x2a3   : > { %p4061_p6 = scmp.ne.s32.totalorder %s5622_s8, %s4060_s3  ;;  %p4066_p8 = scmp.lt.s32.totalorder %s5100_s17, %s4060_s3 }
 0x2a5   : > { %p4067_p11 = por %p4066_p8, %p4065_p7 }
 0x2a7   : > { %p4068_p12 = pnand %p4067_p11, %p4061_p6 }
 0x2a9   : > { %4071 = shalt.err (!%p4068_p12)  }
 0x2aa   : > { %576 = dma.hbm_to_vmem [thread:$0]  %s564_s5, 16, %s5622_s8, %s5082_s4 }
 0x2ab   : > { %s594_s26 = sadd.s32 30, %s5062_s6  ;;  %s2530_s29 = scalar_lea.vmem %s5077_s23, 30 [#allocation2] }
 0x2ac   : > { %s5653_s7 = sld [smem:[#allocation5 + %s594_s26]]  ;;  %s607_s10 = sshll.u32 %s2530_s29, 4  ;;  %s5656_s10 = int_to_ptr.vmem [resolvable:$true] %s607_s10 }
 0x2ad   : > { %s3108_s27 = sshll.u32 %s5631_s13, 4  ;;  %s611_s25 = sadd.s32 31, %s5062_s6 }
 0x2ae   : > { %s581_s0 = scalar_lea.hbm %s6403_s1, %s3108_s27 }
 0x2af   : > { %s4072_s24 = scalar_lea.hbm %s581_s0, 16  ;;  %p4075_p0 = scmp.lt.u32.totalorder %s581_s0, %s6403_s1 }
 0x2b0   : > { %p4073_p13 = scmp.ne.s32.totalorder %s581_s0, %s4072_s24  ;;  %p4076_p1 = scmp.lt.u32.totalorder %s5089_s9, %s4072_s24 }
 0x2b1   : > { %p4078_p3 = scmp.lt.u32.totalorder %s4072_s24, %s581_s0 }
 0x2b2   : > { %p4077_p2 = por %p4076_p1, %p4075_p0 }
 0x2b4   : > { %p4079_p4 = por %p4078_p3, %p4077_p2 }
 0x2b6   : > { %p4080_p5 = pnand %p4079_p4, %p4073_p13 }
 0x2b8   : > { %4083 = shalt.err (!%p4080_p5)  }
 0x2b9   : > { %s4084_s8 = scalar_lea.vmem %s5638_s11, 16  ;;  %p4089_p7 = scmp.lt.s32.totalorder %s5638_s11, %s5097_s15 }
 0x2ba   : > { %p4085_p6 = scmp.ne.s32.totalorder %s5638_s11, %s4084_s8  ;;  %p4090_p8 = scmp.lt.s32.totalorder %s5100_s17, %s4084_s8 }
 0x2bc   : > { %p4091_p11 = por %p4090_p8, %p4089_p7 }
 0x2be   : > { %p4092_p12 = pnand %p4091_p11, %p4085_p6 }
 0x2c0   : > { %4095 = shalt.err (!%p4092_p12)  }
 0x2c1   : > { %593 = dma.hbm_to_vmem [thread:$0]  %s581_s0, 16, %s5638_s11, %s5082_s4 }
 0x2c2   : > { %s5673_s13 = sld [smem:[#allocation5 + %s611_s25]]  ;;  %s2535_s5 = scalar_lea.vmem %s5077_s23, 31 [#allocation2] }
 0x2c3   : > { %s624_s3 = sshll.u32 %s2535_s5, 4  ;;  %s628_s26 = sadd.s32 32, %s5062_s6  ;;  %s5678_s3 = int_to_ptr.vmem [resolvable:$true] %s624_s3 }
 0x2c4   : > { %s3110_s29 = sshll.u32 %s5653_s7, 4  ;;  %s5683_s24 = sld [smem:[#allocation5 + %s628_s26]] }
 0x2c5   : > { %s598_s12 = scalar_lea.hbm %s6403_s1, %s3110_s29 }
 0x2c6   : > { %s4096_s18 = scalar_lea.hbm %s598_s12, 16  ;;  %p4099_p0 = scmp.lt.u32.totalorder %s598_s12, %s6403_s1 }
 0x2c7   : > { %p4097_p13 = scmp.ne.s32.totalorder %s598_s12, %s4096_s18  ;;  %p4100_p1 = scmp.lt.u32.totalorder %s5089_s9, %s4096_s18 }
 0x2c8   : > { %p4102_p3 = scmp.lt.u32.totalorder %s4096_s18, %s598_s12 }
 0x2c9   : > { %p4101_p2 = por %p4100_p1, %p4099_p0 }
 0x2cb   : > { %p4103_p4 = por %p4102_p3, %p4101_p2 }
 0x2cd   : > { %p4104_p5 = pnand %p4103_p4, %p4097_p13 }
 0x2cf   : > { %4107 = shalt.err (!%p4104_p5)  }
 0x2d0   : > { %s4108_s11 = scalar_lea.vmem %s5656_s10, 16  ;;  %p4113_p7 = scmp.lt.s32.totalorder %s5656_s10, %s5097_s15 }
 0x2d1   : > { %p4109_p6 = scmp.ne.s32.totalorder %s5656_s10, %s4108_s11  ;;  %p4114_p8 = scmp.lt.s32.totalorder %s5100_s17, %s4108_s11 }
 0x2d3   : > { %p4115_p11 = por %p4114_p8, %p4113_p7 }
 0x2d5   : > { %p4116_p12 = pnand %p4115_p11, %p4109_p6 }
 0x2d7   : > { %4119 = shalt.err (!%p4116_p12)  }
 0x2d8   : > { %610 = dma.hbm_to_vmem [thread:$0]  %s598_s12, 16, %s5656_s10, %s5082_s4 }
 0x2d9   : > { %s2540_s7 = scalar_lea.vmem %s5077_s23, 32 [#allocation2]  ;;  %s645_s0 = sadd.s32 33, %s5062_s6 }
 0x2da   : > { %s3112_s25 = sshll.u32 %s5673_s13, 4  ;;  %s641_s5 = sshll.u32 %s2540_s7, 4  ;;  %s5702_s5 = int_to_ptr.vmem [resolvable:$true] %s641_s5 }
 0x2db   : > { %s615_s27 = scalar_lea.hbm %s6403_s1, %s3112_s25 }
 0x2dc   : > { %s4120_s16 = scalar_lea.hbm %s615_s27, 16  ;;  %p4123_p0 = scmp.lt.u32.totalorder %s615_s27, %s6403_s1 }
 0x2dd   : > { %p4121_p13 = scmp.ne.s32.totalorder %s615_s27, %s4120_s16  ;;  %p4124_p1 = scmp.lt.u32.totalorder %s5089_s9, %s4120_s16 }
 0x2de   : > { %p4126_p3 = scmp.lt.u32.totalorder %s4120_s16, %s615_s27 }
 0x2df   : > { %p4125_p2 = por %p4124_p1, %p4123_p0 }
 0x2e1   : > { %p4127_p4 = por %p4126_p3, %p4125_p2 }
 0x2e3   : > { %p4128_p5 = pnand %p4127_p4, %p4121_p13 }
 0x2e5   : > { %4131 = shalt.err (!%p4128_p5)  }
 0x2e6   : > { %s4132_s10 = scalar_lea.vmem %s5678_s3, 16  ;;  %p4137_p7 = scmp.lt.s32.totalorder %s5678_s3, %s5097_s15 }
 0x2e7   : > { %p4133_p6 = scmp.ne.s32.totalorder %s5678_s3, %s4132_s10  ;;  %p4138_p8 = scmp.lt.s32.totalorder %s5100_s17, %s4132_s10 }
 0x2e9   : > { %p4139_p11 = por %p4138_p8, %p4137_p7 }
 0x2eb   : > { %p4140_p12 = pnand %p4139_p11, %p4133_p6 }
 0x2ed   : > { %4143 = shalt.err (!%p4140_p12)  }
 0x2ee   : > { %627 = dma.hbm_to_vmem [thread:$0]  %s615_s27, 16, %s5678_s3, %s5082_s4 }
 0x2ef   : > { %s3114_s13 = sshll.u32 %s5683_s24, 4  ;;  %s5716_s12 = sld [smem:[#allocation5 + %s645_s0]] }
 0x2f0   : > { %s632_s7 = scalar_lea.hbm %s6403_s1, %s3114_s13  ;;  %s2545_s25 = scalar_lea.vmem %s5077_s23, 33 [#allocation2] }
 0x2f1   : > { %s4144_s26 = scalar_lea.hbm %s632_s7, 16  ;;  %p4147_p0 = scmp.lt.u32.totalorder %s632_s7, %s6403_s1 }
 0x2f2   : > { %p4145_p13 = scmp.ne.s32.totalorder %s632_s7, %s4144_s26  ;;  %p4148_p1 = scmp.lt.u32.totalorder %s5089_s9, %s4144_s26 }
 0x2f3   : > { %p4150_p3 = scmp.lt.u32.totalorder %s4144_s26, %s632_s7 }
 0x2f4   : > { %p4149_p2 = por %p4148_p1, %p4147_p0 }
 0x2f6   : > { %p4151_p4 = por %p4150_p3, %p4149_p2 }
 0x2f8   : > { %p4152_p5 = pnand %p4151_p4, %p4145_p13 }
 0x2fa   : > { %4155 = shalt.err (!%p4152_p5)  }
 0x2fb   : > { %s4156_s3 = scalar_lea.vmem %s5702_s5, 16  ;;  %p4161_p7 = scmp.lt.s32.totalorder %s5702_s5, %s5097_s15 }
 0x2fc   : > { %p4157_p6 = scmp.ne.s32.totalorder %s5702_s5, %s4156_s3  ;;  %p4162_p8 = scmp.lt.s32.totalorder %s5100_s17, %s4156_s3 }
 0x2fe   : > { %p4163_p11 = por %p4162_p8, %p4161_p7 }
 0x300   : > { %p4164_p12 = pnand %p4163_p11, %p4157_p6 }
 0x302   : > { %4167 = shalt.err (!%p4164_p12)  }
 0x303   : > { %644 = dma.hbm_to_vmem [thread:$0]  %s632_s7, 16, %s5702_s5, %s5082_s4 }
 0x304   : > { %s658_s24 = sshll.u32 %s2545_s25, 4  ;;  %s662_s0 = sadd.s32 34, %s5062_s6  ;;  %s659_s24 = int_to_ptr.vmem [resolvable:$true] %s658_s24 }
 0x305   : > { %s5734_s27 = sld [smem:[#allocation5 + %s662_s0]]  ;;  %s2550_s18 = scalar_lea.vmem %s5077_s23, 34 [#allocation2] }
 0x306   : > { %s679_s14 = sadd.s32 35, %s5062_s6  ;;  %s3116_s10 = sshll.u32 %s5716_s12, 4 }
 0x307   : > { %s675_s13 = sshll.u32 %s2550_s18, 4  ;;  %s649_s26 = scalar_lea.hbm %s6403_s1, %s3116_s10  ;;  %s5742_s13 = int_to_ptr.vmem [resolvable:$true] %s675_s13 }
 0x308   : > { %s4168_s29 = scalar_lea.hbm %s649_s26, 16  ;;  %p4171_p0 = scmp.lt.u32.totalorder %s649_s26, %s6403_s1 }
 0x309   : > { %p4169_p13 = scmp.ne.s32.totalorder %s649_s26, %s4168_s29  ;;  %p4172_p1 = scmp.lt.u32.totalorder %s5089_s9, %s4168_s29 }
 0x30a   : > { %p4174_p3 = scmp.lt.u32.totalorder %s4168_s29, %s649_s26 }
 0x30b   : > { %p4173_p2 = por %p4172_p1, %p4171_p0 }
 0x30d   : > { %p4175_p4 = por %p4174_p3, %p4173_p2 }
 0x30f   : > { %p4176_p5 = pnand %p4175_p4, %p4169_p13 }
 0x311   : > { %4179 = shalt.err (!%p4176_p5)  }
 0x312   : > { %s4180_s5 = scalar_lea.vmem %s659_s24, 16  ;;  %p4185_p7 = scmp.lt.s32.totalorder %s659_s24, %s5097_s15 }
 0x313   : > { %p4181_p6 = scmp.ne.s32.totalorder %s659_s24, %s4180_s5  ;;  %p4186_p8 = scmp.lt.s32.totalorder %s5100_s17, %s4180_s5 }
 0x315   : > { %p4187_p11 = por %p4186_p8, %p4185_p7 }
 0x317   : > { %p4188_p12 = pnand %p4187_p11, %p4181_p6 }
 0x319   : > { %4191 = shalt.err (!%p4188_p12)  }
 0x31a   : > { %661 = dma.hbm_to_vmem [thread:$0]  %s649_s26, 16, %s659_s24, %s5082_s4 }
 0x31b   : > { %s5751_s12 = sld [smem:[#allocation5 + %s679_s14]]  ;;  %s2555_s7 = scalar_lea.vmem %s5077_s23, 35 [#allocation2] }
 0x31c   : > { %s3118_s25 = sshll.u32 %s5734_s27, 4  ;;  %s692_s0 = sshll.u32 %s2555_s7, 4  ;;  %s5758_s0 = int_to_ptr.vmem [resolvable:$true] %s692_s0 }
 0x31d   : > { %s666_s8 = scalar_lea.hbm %s6403_s1, %s3118_s25 }
 0x31e   : > { %s4192_s11 = scalar_lea.hbm %s666_s8, 16  ;;  %p4195_p0 = scmp.lt.u32.totalorder %s666_s8, %s6403_s1 }
 0x31f   : > { %p4193_p13 = scmp.ne.s32.totalorder %s666_s8, %s4192_s11  ;;  %p4196_p1 = scmp.lt.u32.totalorder %s5089_s9, %s4192_s11 }
 0x320   : > { %p4198_p3 = scmp.lt.u32.totalorder %s4192_s11, %s666_s8 }
 0x321   : > { %p4197_p2 = por %p4196_p1, %p4195_p0 }
 0x323   : > { %p4199_p4 = por %p4198_p3, %p4197_p2 }
 0x325   : > { %p4200_p5 = pnand %p4199_p4, %p4193_p13 }
 0x327   : > { %4203 = shalt.err (!%p4200_p5)  }
 0x328   : > { %s4204_s24 = scalar_lea.vmem %s5742_s13, 16  ;;  %p4209_p7 = scmp.lt.s32.totalorder %s5742_s13, %s5097_s15 }
 0x329   : > { %p4205_p6 = scmp.ne.s32.totalorder %s5742_s13, %s4204_s24  ;;  %p4210_p8 = scmp.lt.s32.totalorder %s5100_s17, %s4204_s24 }
 0x32b   : > { %p4211_p11 = por %p4210_p8, %p4209_p7 }
 0x32d   : > { %p4212_p12 = pnand %p4211_p11, %p4205_p6 }
 0x32f   : > { %4215 = shalt.err (!%p4212_p12)  }
 0x330   : > { %678 = dma.hbm_to_vmem [thread:$0]  %s666_s8, 16, %s5742_s13, %s5082_s4 }
 0x331   : > { %s696_s27 = sadd.s32 36, %s5062_s6  ;;  %s2560_s14 = scalar_lea.vmem %s5077_s23, 36 [#allocation2] }
 0x332   : > { %s5773_s26 = sld [smem:[#allocation5 + %s696_s27]]  ;;  %s709_s3 = sshll.u32 %s2560_s14, 4  ;;  %s5776_s3 = int_to_ptr.vmem [resolvable:$true] %s709_s3 }
 0x333   : > { %s3120_s5 = sshll.u32 %s5751_s12, 4  ;;  %s713_s10 = sadd.s32 37, %s5062_s6 }
 0x334   : > { %s683_s18 = scalar_lea.hbm %s6403_s1, %s3120_s5 }
 0x335   : > { %s4216_s11 = scalar_lea.hbm %s683_s18, 16  ;;  %p4219_p0 = scmp.lt.u32.totalorder %s683_s18, %s6403_s1 }
 0x336   : > { %p4217_p13 = scmp.ne.s32.totalorder %s683_s18, %s4216_s11  ;;  %p4220_p1 = scmp.lt.u32.totalorder %s5089_s9, %s4216_s11 }
 0x337   : > { %p4222_p3 = scmp.lt.u32.totalorder %s4216_s11, %s683_s18 }
 0x338   : > { %p4221_p2 = por %p4220_p1, %p4219_p0 }
 0x33a   : > { %p4223_p4 = por %p4222_p3, %p4221_p2 }
 0x33c   : > { %p4224_p5 = pnand %p4223_p4, %p4217_p13 }
 0x33e   : > { %4227 = shalt.err (!%p4224_p5)  }
 0x33f   : > { %s4228_s13 = scalar_lea.vmem %s5758_s0, 16  ;;  %p4233_p7 = scmp.lt.s32.totalorder %s5758_s0, %s5097_s15 }
 0x340   : > { %p4229_p6 = scmp.ne.s32.totalorder %s5758_s0, %s4228_s13  ;;  %p4234_p8 = scmp.lt.s32.totalorder %s5100_s17, %s4228_s13 }
 0x342   : > { %p4235_p11 = por %p4234_p8, %p4233_p7 }
 0x344   : > { %p4236_p12 = pnand %p4235_p11, %p4229_p6 }
 0x346   : > { %4239 = shalt.err (!%p4236_p12)  }
 0x347   : > { %695 = dma.hbm_to_vmem [thread:$0]  %s683_s18, 16, %s5758_s0, %s5082_s4 }
 0x348   : > { %s5793_s12 = sld [smem:[#allocation5 + %s713_s10]]  ;;  %s2565_s8 = scalar_lea.vmem %s5077_s23, 37 [#allocation2] }
 0x349   : > { %s726_s24 = sshll.u32 %s2565_s8, 4  ;;  %s730_s27 = sadd.s32 38, %s5062_s6  ;;  %s5798_s24 = int_to_ptr.vmem [resolvable:$true] %s726_s24 }
 0x34a   : > { %s3122_s14 = sshll.u32 %s5773_s26, 4  ;;  %s5803_s11 = sld [smem:[#allocation5 + %s730_s27]] }
 0x34b   : > { %s700_s25 = scalar_lea.hbm %s6403_s1, %s3122_s14 }
 0x34c   : > { %s4240_s29 = scalar_lea.hbm %s700_s25, 16  ;;  %p4243_p0 = scmp.lt.u32.totalorder %s700_s25, %s6403_s1 }
 0x34d   : > { %p4241_p13 = scmp.ne.s32.totalorder %s700_s25, %s4240_s29  ;;  %p4244_p1 = scmp.lt.u32.totalorder %s5089_s9, %s4240_s29 }
 0x34e   : > { %p4246_p3 = scmp.lt.u32.totalorder %s4240_s29, %s700_s25 }
 0x34f   : > { %p4245_p2 = por %p4244_p1, %p4243_p0 }
 0x351   : > { %p4247_p4 = por %p4246_p3, %p4245_p2 }
 0x353   : > { %p4248_p5 = pnand %p4247_p4, %p4241_p13 }
 0x355   : > { %4251 = shalt.err (!%p4248_p5)  }
 0x356   : > { %s4252_s0 = scalar_lea.vmem %s5776_s3, 16  ;;  %p4257_p7 = scmp.lt.s32.totalorder %s5776_s3, %s5097_s15 }
 0x357   : > { %p4253_p6 = scmp.ne.s32.totalorder %s5776_s3, %s4252_s0  ;;  %p4258_p8 = scmp.lt.s32.totalorder %s5100_s17, %s4252_s0 }
 0x359   : > { %p4259_p11 = por %p4258_p8, %p4257_p7 }
 0x35b   : > { %p4260_p12 = pnand %p4259_p11, %p4253_p6 }
 0x35d   : > { %4263 = shalt.err (!%p4260_p12)  }
 0x35e   : > { %712 = dma.hbm_to_vmem [thread:$0]  %s700_s25, 16, %s5776_s3, %s5082_s4 }
 0x35f   : > { %s2570_s26 = scalar_lea.vmem %s5077_s23, 38 [#allocation2]  ;;  %s747_s18 = sadd.s32 39, %s5062_s6 }
 0x360   : > { %s3124_s10 = sshll.u32 %s5793_s12, 4  ;;  %s743_s8 = sshll.u32 %s2570_s26, 4  ;;  %s5822_s8 = int_to_ptr.vmem [resolvable:$true] %s743_s8 }
 0x361   : > { %s717_s5 = scalar_lea.hbm %s6403_s1, %s3124_s10 }
 0x362   : > { %s4264_s7 = scalar_lea.hbm %s717_s5, 16  ;;  %p4267_p0 = scmp.lt.u32.totalorder %s717_s5, %s6403_s1 }
 0x363   : > { %p4265_p13 = scmp.ne.s32.totalorder %s717_s5, %s4264_s7  ;;  %p4268_p1 = scmp.lt.u32.totalorder %s5089_s9, %s4264_s7 }
 0x364   : > { %p4270_p3 = scmp.lt.u32.totalorder %s4264_s7, %s717_s5 }
 0x365   : > { %p4269_p2 = por %p4268_p1, %p4267_p0 }
 0x367   : > { %p4271_p4 = por %p4270_p3, %p4269_p2 }
 0x369   : > { %p4272_p5 = pnand %p4271_p4, %p4265_p13 }
 0x36b   : > { %4275 = shalt.err (!%p4272_p5)  }
 0x36c   : > { %s4276_s3 = scalar_lea.vmem %s5798_s24, 16  ;;  %p4281_p7 = scmp.lt.s32.totalorder %s5798_s24, %s5097_s15 }
 0x36d   : > { %p4277_p6 = scmp.ne.s32.totalorder %s5798_s24, %s4276_s3  ;;  %p4282_p8 = scmp.lt.s32.totalorder %s5100_s17, %s4276_s3 }
 0x36f   : > { %p4283_p11 = por %p4282_p8, %p4281_p7 }
 0x371   : > { %p4284_p12 = pnand %p4283_p11, %p4277_p6 }
 0x373   : > { %4287 = shalt.err (!%p4284_p12)  }
 0x374   : > { %729 = dma.hbm_to_vmem [thread:$0]  %s717_s5, 16, %s5798_s24, %s5082_s4 }
 0x375   : > { %s3126_s12 = sshll.u32 %s5803_s11, 4  ;;  %s5836_s25 = sld [smem:[#allocation5 + %s747_s18]] }
 0x376   : > { %s734_s26 = scalar_lea.hbm %s6403_s1, %s3126_s12  ;;  %s2575_s10 = scalar_lea.vmem %s5077_s23, 39 [#allocation2] }
 0x377   : > { %s4288_s27 = scalar_lea.hbm %s734_s26, 16  ;;  %p4291_p0 = scmp.lt.u32.totalorder %s734_s26, %s6403_s1 }
 0x378   : > { %p4289_p13 = scmp.ne.s32.totalorder %s734_s26, %s4288_s27  ;;  %p4292_p1 = scmp.lt.u32.totalorder %s5089_s9, %s4288_s27 }
 0x379   : > { %p4294_p3 = scmp.lt.u32.totalorder %s4288_s27, %s734_s26 }
 0x37a   : > { %p4293_p2 = por %p4292_p1, %p4291_p0 }
 0x37c   : > { %p4295_p4 = por %p4294_p3, %p4293_p2 }
 0x37e   : > { %p4296_p5 = pnand %p4295_p4, %p4289_p13 }
 0x380   : > { %4299 = shalt.err (!%p4296_p5)  }
 0x381   : > { %s4300_s24 = scalar_lea.vmem %s5822_s8, 16  ;;  %p4305_p7 = scmp.lt.s32.totalorder %s5822_s8, %s5097_s15 }
 0x382   : > { %p4301_p6 = scmp.ne.s32.totalorder %s5822_s8, %s4300_s24  ;;  %p4306_p8 = scmp.lt.s32.totalorder %s5100_s17, %s4300_s24 }
 0x384   : > { %p4307_p11 = por %p4306_p8, %p4305_p7 }
 0x386   : > { %p4308_p12 = pnand %p4307_p11, %p4301_p6 }
 0x388   : > { %4311 = shalt.err (!%p4308_p12)  }
 0x389   : > { %746 = dma.hbm_to_vmem [thread:$0]  %s734_s26, 16, %s5822_s8, %s5082_s4 }
 0x38a   : > { %s760_s11 = sshll.u32 %s2575_s10, 4  ;;  %s764_s18 = sadd.s32 40, %s5062_s6  ;;  %s761_s11 = int_to_ptr.vmem [resolvable:$true] %s760_s11 }
 0x38b   : > { %s5854_s5 = sld [smem:[#allocation5 + %s764_s18]]  ;;  %s2580_s29 = scalar_lea.vmem %s5077_s23, 40 [#allocation2] }
 0x38c   : > { %s781_s16 = sadd.s32 41, %s5062_s6  ;;  %s3128_s3 = sshll.u32 %s5836_s25, 4 }
 0x38d   : > { %s777_s12 = sshll.u32 %s2580_s29, 4  ;;  %s751_s27 = scalar_lea.hbm %s6403_s1, %s3128_s3  ;;  %s5862_s12 = int_to_ptr.vmem [resolvable:$true] %s777_s12 }
 0x38e   : > { %s4312_s14 = scalar_lea.hbm %s751_s27, 16  ;;  %p4315_p0 = scmp.lt.u32.totalorder %s751_s27, %s6403_s1 }
 0x38f   : > { %p4313_p13 = scmp.ne.s32.totalorder %s751_s27, %s4312_s14  ;;  %p4316_p1 = scmp.lt.u32.totalorder %s5089_s9, %s4312_s14 }
 0x390   : > { %p4318_p3 = scmp.lt.u32.totalorder %s4312_s14, %s751_s27 }
 0x391   : > { %p4317_p2 = por %p4316_p1, %p4315_p0 }
 0x393   : > { %p4319_p4 = por %p4318_p3, %p4317_p2 }
 0x395   : > { %p4320_p5 = pnand %p4319_p4, %p4313_p13 }
 0x397   : > { %4323 = shalt.err (!%p4320_p5)  }
 0x398   : > { %s4324_s8 = scalar_lea.vmem %s761_s11, 16  ;;  %p4329_p7 = scmp.lt.s32.totalorder %s761_s11, %s5097_s15 }
 0x399   : > { %p4325_p6 = scmp.ne.s32.totalorder %s761_s11, %s4324_s8  ;;  %p4330_p8 = scmp.lt.s32.totalorder %s5100_s17, %s4324_s8 }
 0x39b   : > { %p4331_p11 = por %p4330_p8, %p4329_p7 }
 0x39d   : > { %p4332_p12 = pnand %p4331_p11, %p4325_p6 }
 0x39f   : > { %4335 = shalt.err (!%p4332_p12)  }
 0x3a0   : > { %763 = dma.hbm_to_vmem [thread:$0]  %s751_s27, 16, %s761_s11, %s5082_s4 }
 0x3a1   : > { %s5871_s25 = sld [smem:[#allocation5 + %s781_s16]]  ;;  %s2585_s26 = scalar_lea.vmem %s5077_s23, 41 [#allocation2] }
 0x3a2   : > { %s3130_s10 = sshll.u32 %s5854_s5, 4  ;;  %s794_s18 = sshll.u32 %s2585_s26, 4  ;;  %s5878_s18 = int_to_ptr.vmem [resolvable:$true] %s794_s18 }
 0x3a3   : > { %s768_s13 = scalar_lea.hbm %s6403_s1, %s3130_s10 }
 0x3a4   : > { %s4336_s0 = scalar_lea.hbm %s768_s13, 16  ;;  %p4339_p0 = scmp.lt.u32.totalorder %s768_s13, %s6403_s1 }
 0x3a5   : > { %p4337_p13 = scmp.ne.s32.totalorder %s768_s13, %s4336_s0  ;;  %p4340_p1 = scmp.lt.u32.totalorder %s5089_s9, %s4336_s0 }
 0x3a6   : > { %p4342_p3 = scmp.lt.u32.totalorder %s4336_s0, %s768_s13 }
 0x3a7   : > { %p4341_p2 = por %p4340_p1, %p4339_p0 }
 0x3a9   : > { %p4343_p4 = por %p4342_p3, %p4341_p2 }
 0x3ab   : > { %p4344_p5 = pnand %p4343_p4, %p4337_p13 }
 0x3ad   : > { %4347 = shalt.err (!%p4344_p5)  }
 0x3ae   : > { %s4348_s11 = scalar_lea.vmem %s5862_s12, 16  ;;  %p4353_p7 = scmp.lt.s32.totalorder %s5862_s12, %s5097_s15 }
 0x3af   : > { %p4349_p6 = scmp.ne.s32.totalorder %s5862_s12, %s4348_s11  ;;  %p4354_p8 = scmp.lt.s32.totalorder %s5100_s17, %s4348_s11 }
 0x3b1   : > { %p4355_p11 = por %p4354_p8, %p4353_p7 }
 0x3b3   : > { %p4356_p12 = pnand %p4355_p11, %p4349_p6 }
 0x3b5   : > { %4359 = shalt.err (!%p4356_p12)  }
 0x3b6   : > { %780 = dma.hbm_to_vmem [thread:$0]  %s768_s13, 16, %s5862_s12, %s5082_s4 }
 0x3b7   : > { %s798_s5 = sadd.s32 42, %s5062_s6  ;;  %s2590_s16 = scalar_lea.vmem %s5077_s23, 42 [#allocation2] }
 0x3b8   : > { %s5893_s27 = sld [smem:[#allocation5 + %s798_s5]]  ;;  %s811_s24 = sshll.u32 %s2590_s16, 4  ;;  %s5896_s24 = int_to_ptr.vmem [resolvable:$true] %s811_s24 }
 0x3b9   : > { %s3132_s8 = sshll.u32 %s5871_s25, 4  ;;  %s815_s3 = sadd.s32 43, %s5062_s6 }
 0x3ba   : > { %s785_s29 = scalar_lea.hbm %s6403_s1, %s3132_s8 }
 0x3bb   : > { %s4360_s0 = scalar_lea.hbm %s785_s29, 16  ;;  %p4363_p0 = scmp.lt.u32.totalorder %s785_s29, %s6403_s1 }
 0x3bc   : > { %p4361_p13 = scmp.ne.s32.totalorder %s785_s29, %s4360_s0  ;;  %p4364_p1 = scmp.lt.u32.totalorder %s5089_s9, %s4360_s0 }
 0x3bd   : > { %p4366_p3 = scmp.lt.u32.totalorder %s4360_s0, %s785_s29 }
 0x3be   : > { %p4365_p2 = por %p4364_p1, %p4363_p0 }
 0x3c0   : > { %p4367_p4 = por %p4366_p3, %p4365_p2 }
 0x3c2   : > { %p4368_p5 = pnand %p4367_p4, %p4361_p13 }
 0x3c4   : > { %4371 = shalt.err (!%p4368_p5)  }
 0x3c5   : > { %s4372_s12 = scalar_lea.vmem %s5878_s18, 16  ;;  %p4377_p7 = scmp.lt.s32.totalorder %s5878_s18, %s5097_s15 }
 0x3c6   : > { %p4373_p6 = scmp.ne.s32.totalorder %s5878_s18, %s4372_s12  ;;  %p4378_p8 = scmp.lt.s32.totalorder %s5100_s17, %s4372_s12 }
 0x3c8   : > { %p4379_p11 = por %p4378_p8, %p4377_p7 }
 0x3ca   : > { %p4380_p12 = pnand %p4379_p11, %p4373_p6 }
 0x3cc   : > { %4383 = shalt.err (!%p4380_p12)  }
 0x3cd   : > { %797 = dma.hbm_to_vmem [thread:$0]  %s785_s29, 16, %s5878_s18, %s5082_s4 }
 0x3ce   : > { %s5913_s25 = sld [smem:[#allocation5 + %s815_s3]]  ;;  %s2595_s13 = scalar_lea.vmem %s5077_s23, 43 [#allocation2] }
 0x3cf   : > { %s828_s11 = sshll.u32 %s2595_s13, 4  ;;  %s832_s5 = sadd.s32 44, %s5062_s6  ;;  %s5918_s11 = int_to_ptr.vmem [resolvable:$true] %s828_s11 }
 0x3d0   : > { %s3134_s16 = sshll.u32 %s5893_s27, 4  ;;  %s5923_s0 = sld [smem:[#allocation5 + %s832_s5]] }
 0x3d1   : > { %s802_s10 = scalar_lea.hbm %s6403_s1, %s3134_s16 }
 0x3d2   : > { %s4384_s14 = scalar_lea.hbm %s802_s10, 16  ;;  %p4387_p0 = scmp.lt.u32.totalorder %s802_s10, %s6403_s1 }
 0x3d3   : > { %p4385_p13 = scmp.ne.s32.totalorder %s802_s10, %s4384_s14  ;;  %p4388_p1 = scmp.lt.u32.totalorder %s5089_s9, %s4384_s14 }
 0x3d4   : > { %p4390_p3 = scmp.lt.u32.totalorder %s4384_s14, %s802_s10 }
 0x3d5   : > { %p4389_p2 = por %p4388_p1, %p4387_p0 }
 0x3d7   : > { %p4391_p4 = por %p4390_p3, %p4389_p2 }
 0x3d9   : > { %p4392_p5 = pnand %p4391_p4, %p4385_p13 }
 0x3db   : > { %4395 = shalt.err (!%p4392_p5)  }
 0x3dc   : > { %s4396_s18 = scalar_lea.vmem %s5896_s24, 16  ;;  %p4401_p7 = scmp.lt.s32.totalorder %s5896_s24, %s5097_s15 }
 0x3dd   : > { %p4397_p6 = scmp.ne.s32.totalorder %s5896_s24, %s4396_s18  ;;  %p4402_p8 = scmp.lt.s32.totalorder %s5100_s17, %s4396_s18 }
 0x3df   : > { %p4403_p11 = por %p4402_p8, %p4401_p7 }
 0x3e1   : > { %p4404_p12 = pnand %p4403_p11, %p4397_p6 }
 0x3e3   : > { %4407 = shalt.err (!%p4404_p12)  }
 0x3e4   : > { %814 = dma.hbm_to_vmem [thread:$0]  %s802_s10, 16, %s5896_s24, %s5082_s4 }
 0x3e5   : > { %s2600_s27 = scalar_lea.vmem %s5077_s23, 44 [#allocation2]  ;;  %s849_s29 = sadd.s32 45, %s5062_s6 }
 0x3e6   : > { %s3136_s3 = sshll.u32 %s5913_s25, 4  ;;  %s845_s13 = sshll.u32 %s2600_s27, 4  ;;  %s5942_s13 = int_to_ptr.vmem [resolvable:$true] %s845_s13 }
 0x3e7   : > { %s819_s8 = scalar_lea.hbm %s6403_s1, %s3136_s3 }
 0x3e8   : > { %s4408_s26 = scalar_lea.hbm %s819_s8, 16  ;;  %p4411_p0 = scmp.lt.u32.totalorder %s819_s8, %s6403_s1 }
 0x3e9   : > { %p4409_p13 = scmp.ne.s32.totalorder %s819_s8, %s4408_s26  ;;  %p4412_p1 = scmp.lt.u32.totalorder %s5089_s9, %s4408_s26 }
 0x3ea   : > { %p4414_p3 = scmp.lt.u32.totalorder %s4408_s26, %s819_s8 }
 0x3eb   : > { %p4413_p2 = por %p4412_p1, %p4411_p0 }
 0x3ed   : > { %p4415_p4 = por %p4414_p3, %p4413_p2 }
 0x3ef   : > { %p4416_p5 = pnand %p4415_p4, %p4409_p13 }
 0x3f1   : > { %4419 = shalt.err (!%p4416_p5)  }
 0x3f2   : > { %s4420_s24 = scalar_lea.vmem %s5918_s11, 16  ;;  %p4425_p7 = scmp.lt.s32.totalorder %s5918_s11, %s5097_s15 }
 0x3f3   : > { %p4421_p6 = scmp.ne.s32.totalorder %s5918_s11, %s4420_s24  ;;  %p4426_p8 = scmp.lt.s32.totalorder %s5100_s17, %s4420_s24 }
 0x3f5   : > { %p4427_p11 = por %p4426_p8, %p4425_p7 }
 0x3f7   : > { %p4428_p12 = pnand %p4427_p11, %p4421_p6 }
 0x3f9   : > { %4431 = shalt.err (!%p4428_p12)  }
 0x3fa   : > { %831 = dma.hbm_to_vmem [thread:$0]  %s819_s8, 16, %s5918_s11, %s5082_s4 }
 0x3fb   : > { %s3138_s25 = sshll.u32 %s5923_s0, 4  ;;  %s5956_s10 = sld [smem:[#allocation5 + %s849_s29]] }
 0x3fc   : > { %s836_s27 = scalar_lea.hbm %s6403_s1, %s3138_s25  ;;  %s2605_s3 = scalar_lea.vmem %s5077_s23, 45 [#allocation2] }
 0x3fd   : > { %s4432_s5 = scalar_lea.hbm %s836_s27, 16  ;;  %p4435_p0 = scmp.lt.u32.totalorder %s836_s27, %s6403_s1 }
 0x3fe   : > { %p4433_p13 = scmp.ne.s32.totalorder %s836_s27, %s4432_s5  ;;  %p4436_p1 = scmp.lt.u32.totalorder %s5089_s9, %s4432_s5 }
 0x3ff   : > { %p4438_p3 = scmp.lt.u32.totalorder %s4432_s5, %s836_s27 }
 0x400   : > { %p4437_p2 = por %p4436_p1, %p4435_p0 }
 0x402   : > { %p4439_p4 = por %p4438_p3, %p4437_p2 }
 0x404   : > { %p4440_p5 = pnand %p4439_p4, %p4433_p13 }
 0x406   : > { %4443 = shalt.err (!%p4440_p5)  }
 0x407   : > { %s4444_s11 = scalar_lea.vmem %s5942_s13, 16  ;;  %p4449_p7 = scmp.lt.s32.totalorder %s5942_s13, %s5097_s15 }
 0x408   : > { %p4445_p6 = scmp.ne.s32.totalorder %s5942_s13, %s4444_s11  ;;  %p4450_p8 = scmp.lt.s32.totalorder %s5100_s17, %s4444_s11 }
 0x40a   : > { %p4451_p11 = por %p4450_p8, %p4449_p7 }
 0x40c   : > { %p4452_p12 = pnand %p4451_p11, %p4445_p6 }
 0x40e   : > { %4455 = shalt.err (!%p4452_p12)  }
 0x40f   : > { %848 = dma.hbm_to_vmem [thread:$0]  %s836_s27, 16, %s5942_s13, %s5082_s4 }
 0x410   : > { %s862_s0 = sshll.u32 %s2605_s3, 4  ;;  %s866_s29 = sadd.s32 46, %s5062_s6  ;;  %s863_s0 = int_to_ptr.vmem [resolvable:$true] %s862_s0 }
 0x411   : > { %s5974_s8 = sld [smem:[#allocation5 + %s866_s29]]  ;;  %s2610_s14 = scalar_lea.vmem %s5077_s23, 46 [#allocation2] }
 0x412   : > { %s883_s7 = sadd.s32 47, %s5062_s6  ;;  %s3140_s24 = sshll.u32 %s5956_s10, 4 }
 0x413   : > { %s879_s25 = sshll.u32 %s2610_s14, 4  ;;  %s853_s5 = scalar_lea.hbm %s6403_s1, %s3140_s24  ;;  %s5982_s25 = int_to_ptr.vmem [resolvable:$true] %s879_s25 }
 0x414   : > { %s4456_s16 = scalar_lea.hbm %s853_s5, 16  ;;  %p4459_p0 = scmp.lt.u32.totalorder %s853_s5, %s6403_s1 }
 0x415   : > { %p4457_p13 = scmp.ne.s32.totalorder %s853_s5, %s4456_s16  ;;  %p4460_p1 = scmp.lt.u32.totalorder %s5089_s9, %s4456_s16 }
 0x416   : > { %p4462_p3 = scmp.lt.u32.totalorder %s4456_s16, %s853_s5 }
 0x417   : > { %p4461_p2 = por %p4460_p1, %p4459_p0 }
 0x419   : > { %p4463_p4 = por %p4462_p3, %p4461_p2 }
 0x41b   : > { %p4464_p5 = pnand %p4463_p4, %p4457_p13 }
 0x41d   : > { %4467 = shalt.err (!%p4464_p5)  }
 0x41e   : > { %s4468_s13 = scalar_lea.vmem %s863_s0, 16  ;;  %p4473_p7 = scmp.lt.s32.totalorder %s863_s0, %s5097_s15 }
 0x41f   : > { %p4469_p6 = scmp.ne.s32.totalorder %s863_s0, %s4468_s13  ;;  %p4474_p8 = scmp.lt.s32.totalorder %s5100_s17, %s4468_s13 }
 0x421   : > { %p4475_p11 = por %p4474_p8, %p4473_p7 }
 0x423   : > { %p4476_p12 = pnand %p4475_p11, %p4469_p6 }
 0x425   : > { %4479 = shalt.err (!%p4476_p12)  }
 0x426   : > { %865 = dma.hbm_to_vmem [thread:$0]  %s853_s5, 16, %s863_s0, %s5082_s4 }
 0x427   : > { %s5991_s10 = sld [smem:[#allocation5 + %s883_s7]]  ;;  %s2615_s27 = scalar_lea.vmem %s5077_s23, 47 [#allocation2] }
 0x428   : > { %s3142_s3 = sshll.u32 %s5974_s8, 4  ;;  %s896_s29 = sshll.u32 %s2615_s27, 4  ;;  %s5998_s29 = int_to_ptr.vmem [resolvable:$true] %s896_s29 }
 0x429   : > { %s870_s12 = scalar_lea.hbm %s6403_s1, %s3142_s3 }
 0x42a   : > { %s4480_s18 = scalar_lea.hbm %s870_s12, 16  ;;  %p4483_p0 = scmp.lt.u32.totalorder %s870_s12, %s6403_s1 }
 0x42b   : > { %p4481_p13 = scmp.ne.s32.totalorder %s870_s12, %s4480_s18  ;;  %p4484_p1 = scmp.lt.u32.totalorder %s5089_s9, %s4480_s18 }
 0x42c   : > { %p4486_p3 = scmp.lt.u32.totalorder %s4480_s18, %s870_s12 }
 0x42d   : > { %p4485_p2 = por %p4484_p1, %p4483_p0 }
 0x42f   : > { %p4487_p4 = por %p4486_p3, %p4485_p2 }
 0x431   : > { %p4488_p5 = pnand %p4487_p4, %p4481_p13 }
 0x433   : > { %4491 = shalt.err (!%p4488_p5)  }
 0x434   : > { %s4492_s0 = scalar_lea.vmem %s5982_s25, 16  ;;  %p4497_p7 = scmp.lt.s32.totalorder %s5982_s25, %s5097_s15 }
 0x435   : > { %p4493_p6 = scmp.ne.s32.totalorder %s5982_s25, %s4492_s0  ;;  %p4498_p8 = scmp.lt.s32.totalorder %s5100_s17, %s4492_s0 }
 0x437   : > { %p4499_p11 = por %p4498_p8, %p4497_p7 }
 0x439   : > { %p4500_p12 = pnand %p4499_p11, %p4493_p6 }
 0x43b   : > { %4503 = shalt.err (!%p4500_p12)  }
 0x43c   : > { %882 = dma.hbm_to_vmem [thread:$0]  %s870_s12, 16, %s5982_s25, %s5082_s4 }
 0x43d   : > { %s900_s8 = sadd.s32 48, %s5062_s6  ;;  %s2620_s7 = scalar_lea.vmem %s5077_s23, 48 [#allocation2] }
 0x43e   : > { %s6013_s5 = sld [smem:[#allocation5 + %s900_s8]]  ;;  %s913_s11 = sshll.u32 %s2620_s7, 4  ;;  %s6016_s11 = int_to_ptr.vmem [resolvable:$true] %s913_s11 }
 0x43f   : > { %s3144_s13 = sshll.u32 %s5991_s10, 4  ;;  %s917_s24 = sadd.s32 49, %s5062_s6 }
 0x440   : > { %s887_s14 = scalar_lea.hbm %s6403_s1, %s3144_s13 }
 0x441   : > { %s4504_s18 = scalar_lea.hbm %s887_s14, 16  ;;  %p4507_p0 = scmp.lt.u32.totalorder %s887_s14, %s6403_s1 }
 0x442   : > { %p4505_p13 = scmp.ne.s32.totalorder %s887_s14, %s4504_s18  ;;  %p4508_p1 = scmp.lt.u32.totalorder %s5089_s9, %s4504_s18 }
 0x443   : > { %p4510_p3 = scmp.lt.u32.totalorder %s4504_s18, %s887_s14 }
 0x444   : > { %p4509_p2 = por %p4508_p1, %p4507_p0 }
 0x446   : > { %p4511_p4 = por %p4510_p3, %p4509_p2 }
 0x448   : > { %p4512_p5 = pnand %p4511_p4, %p4505_p13 }
 0x44a   : > { %4515 = shalt.err (!%p4512_p5)  }
 0x44b   : > { %s4516_s25 = scalar_lea.vmem %s5998_s29, 16  ;;  %p4521_p7 = scmp.lt.s32.totalorder %s5998_s29, %s5097_s15 }
 0x44c   : > { %p4517_p6 = scmp.ne.s32.totalorder %s5998_s29, %s4516_s25  ;;  %p4522_p8 = scmp.lt.s32.totalorder %s5100_s17, %s4516_s25 }
 0x44e   : > { %p4523_p11 = por %p4522_p8, %p4521_p7 }
 0x450   : > { %p4524_p12 = pnand %p4523_p11, %p4517_p6 }
 0x452   : > { %4527 = shalt.err (!%p4524_p12)  }
 0x453   : > { %899 = dma.hbm_to_vmem [thread:$0]  %s887_s14, 16, %s5998_s29, %s5082_s4 }
 0x454   : > { %s6033_s10 = sld [smem:[#allocation5 + %s917_s24]]  ;;  %s2625_s12 = scalar_lea.vmem %s5077_s23, 49 [#allocation2] }
 0x455   : > { %s930_s0 = sshll.u32 %s2625_s12, 4  ;;  %s934_s8 = sadd.s32 50, %s5062_s6  ;;  %s6038_s0 = int_to_ptr.vmem [resolvable:$true] %s930_s0 }
 0x456   : > { %s3146_s7 = sshll.u32 %s6013_s5, 4  ;;  %s6043_s18 = sld [smem:[#allocation5 + %s934_s8]] }
 0x457   : > { %s904_s3 = scalar_lea.hbm %s6403_s1, %s3146_s7 }
 0x458   : > { %s4528_s16 = scalar_lea.hbm %s904_s3, 16  ;;  %p4531_p0 = scmp.lt.u32.totalorder %s904_s3, %s6403_s1 }
 0x459   : > { %p4529_p13 = scmp.ne.s32.totalorder %s904_s3, %s4528_s16  ;;  %p4532_p1 = scmp.lt.u32.totalorder %s5089_s9, %s4528_s16 }
 0x45a   : > { %p4534_p3 = scmp.lt.u32.totalorder %s4528_s16, %s904_s3 }
 0x45b   : > { %p4533_p2 = por %p4532_p1, %p4531_p0 }
 0x45d   : > { %p4535_p4 = por %p4534_p3, %p4533_p2 }
 0x45f   : > { %p4536_p5 = pnand %p4535_p4, %p4529_p13 }
 0x461   : > { %4539 = shalt.err (!%p4536_p5)  }
 0x462   : > { %s4540_s29 = scalar_lea.vmem %s6016_s11, 16  ;;  %p4545_p7 = scmp.lt.s32.totalorder %s6016_s11, %s5097_s15 }
 0x463   : > { %p4541_p6 = scmp.ne.s32.totalorder %s6016_s11, %s4540_s29  ;;  %p4546_p8 = scmp.lt.s32.totalorder %s5100_s17, %s4540_s29 }
 0x465   : > { %p4547_p11 = por %p4546_p8, %p4545_p7 }
 0x467   : > { %p4548_p12 = pnand %p4547_p11, %p4541_p6 }
 0x469   : > { %4551 = shalt.err (!%p4548_p12)  }
 0x46a   : > { %916 = dma.hbm_to_vmem [thread:$0]  %s904_s3, 16, %s6016_s11, %s5082_s4 }
 0x46b   : > { %s2630_s5 = scalar_lea.vmem %s5077_s23, 50 [#allocation2]  ;;  %s951_s14 = sadd.s32 51, %s5062_s6 }
 0x46c   : > { %s3148_s24 = sshll.u32 %s6033_s10, 4  ;;  %s947_s12 = sshll.u32 %s2630_s5, 4  ;;  %s6062_s12 = int_to_ptr.vmem [resolvable:$true] %s947_s12 }
 0x46d   : > { %s921_s13 = scalar_lea.hbm %s6403_s1, %s3148_s24 }
 0x46e   : > { %s4552_s27 = scalar_lea.hbm %s921_s13, 16  ;;  %p4555_p0 = scmp.lt.u32.totalorder %s921_s13, %s6403_s1 }
 0x46f   : > { %p4553_p13 = scmp.ne.s32.totalorder %s921_s13, %s4552_s27  ;;  %p4556_p1 = scmp.lt.u32.totalorder %s5089_s9, %s4552_s27 }
 0x470   : > { %p4558_p3 = scmp.lt.u32.totalorder %s4552_s27, %s921_s13 }
 0x471   : > { %p4557_p2 = por %p4556_p1, %p4555_p0 }
 0x473   : > { %p4559_p4 = por %p4558_p3, %p4557_p2 }
 0x475   : > { %p4560_p5 = pnand %p4559_p4, %p4553_p13 }
 0x477   : > { %4563 = shalt.err (!%p4560_p5)  }
 0x478   : > { %s4564_s11 = scalar_lea.vmem %s6038_s0, 16  ;;  %p4569_p7 = scmp.lt.s32.totalorder %s6038_s0, %s5097_s15 }
 0x479   : > { %p4565_p6 = scmp.ne.s32.totalorder %s6038_s0, %s4564_s11  ;;  %p4570_p8 = scmp.lt.s32.totalorder %s5100_s17, %s4564_s11 }
 0x47b   : > { %p4571_p11 = por %p4570_p8, %p4569_p7 }
 0x47d   : > { %p4572_p12 = pnand %p4571_p11, %p4565_p6 }
 0x47f   : > { %4575 = shalt.err (!%p4572_p12)  }
 0x480   : > { %933 = dma.hbm_to_vmem [thread:$0]  %s921_s13, 16, %s6038_s0, %s5082_s4 }
 0x481   : > { %s3150_s10 = sshll.u32 %s6043_s18, 4  ;;  %s6076_s3 = sld [smem:[#allocation5 + %s951_s14]] }
 0x482   : > { %s938_s5 = scalar_lea.hbm %s6403_s1, %s3150_s10  ;;  %s2635_s24 = scalar_lea.vmem %s5077_s23, 51 [#allocation2] }
 0x483   : > { %s4576_s8 = scalar_lea.hbm %s938_s5, 16  ;;  %p4579_p0 = scmp.lt.u32.totalorder %s938_s5, %s6403_s1 }
 0x484   : > { %p4577_p13 = scmp.ne.s32.totalorder %s938_s5, %s4576_s8  ;;  %p4580_p1 = scmp.lt.u32.totalorder %s5089_s9, %s4576_s8 }
 0x485   : > { %p4582_p3 = scmp.lt.u32.totalorder %s4576_s8, %s938_s5 }
 0x486   : > { %p4581_p2 = por %p4580_p1, %p4579_p0 }
 0x488   : > { %p4583_p4 = por %p4582_p3, %p4581_p2 }
 0x48a   : > { %p4584_p5 = pnand %p4583_p4, %p4577_p13 }
 0x48c   : > { %4587 = shalt.err (!%p4584_p5)  }
 0x48d   : > { %s4588_s0 = scalar_lea.vmem %s6062_s12, 16  ;;  %p4593_p7 = scmp.lt.s32.totalorder %s6062_s12, %s5097_s15 }
 0x48e   : > { %p4589_p6 = scmp.ne.s32.totalorder %s6062_s12, %s4588_s0  ;;  %p4594_p8 = scmp.lt.s32.totalorder %s5100_s17, %s4588_s0 }
 0x490   : > { %p4595_p11 = por %p4594_p8, %p4593_p7 }
 0x492   : > { %p4596_p12 = pnand %p4595_p11, %p4589_p6 }
 0x494   : > { %4599 = shalt.err (!%p4596_p12)  }
 0x495   : > { %950 = dma.hbm_to_vmem [thread:$0]  %s938_s5, 16, %s6062_s12, %s5082_s4 }
 0x496   : > { %s964_s18 = sshll.u32 %s2635_s24, 4  ;;  %s968_s14 = sadd.s32 52, %s5062_s6  ;;  %s965_s18 = int_to_ptr.vmem [resolvable:$true] %s964_s18 }
 0x497   : > { %s6094_s13 = sld [smem:[#allocation5 + %s968_s14]]  ;;  %s2640_s16 = scalar_lea.vmem %s5077_s23, 52 [#allocation2] }
 0x498   : > { %s985_s26 = sadd.s32 53, %s5062_s6  ;;  %s3152_s11 = sshll.u32 %s6076_s3, 4 }
 0x499   : > { %s981_s10 = sshll.u32 %s2640_s16, 4  ;;  %s955_s8 = scalar_lea.hbm %s6403_s1, %s3152_s11  ;;  %s6102_s10 = int_to_ptr.vmem [resolvable:$true] %s981_s10 }
 0x49a   : > { %s4600_s7 = scalar_lea.hbm %s955_s8, 16  ;;  %p4603_p0 = scmp.lt.u32.totalorder %s955_s8, %s6403_s1 }
 0x49b   : > { %p4601_p13 = scmp.ne.s32.totalorder %s955_s8, %s4600_s7  ;;  %p4604_p1 = scmp.lt.u32.totalorder %s5089_s9, %s4600_s7 }
 0x49c   : > { %p4606_p3 = scmp.lt.u32.totalorder %s4600_s7, %s955_s8 }
 0x49d   : > { %p4605_p2 = por %p4604_p1, %p4603_p0 }
 0x49f   : > { %p4607_p4 = por %p4606_p3, %p4605_p2 }
 0x4a1   : > { %p4608_p5 = pnand %p4607_p4, %p4601_p13 }
 0x4a3   : > { %4611 = shalt.err (!%p4608_p5)  }
 0x4a4   : > { %s4612_s12 = scalar_lea.vmem %s965_s18, 16  ;;  %p4617_p7 = scmp.lt.s32.totalorder %s965_s18, %s5097_s15 }
 0x4a5   : > { %p4613_p6 = scmp.ne.s32.totalorder %s965_s18, %s4612_s12  ;;  %p4618_p8 = scmp.lt.s32.totalorder %s5100_s17, %s4612_s12 }
 0x4a7   : > { %p4619_p11 = por %p4618_p8, %p4617_p7 }
 0x4a9   : > { %p4620_p12 = pnand %p4619_p11, %p4613_p6 }
 0x4ab   : > { %4623 = shalt.err (!%p4620_p12)  }
 0x4ac   : > { %967 = dma.hbm_to_vmem [thread:$0]  %s955_s8, 16, %s965_s18, %s5082_s4 }
 0x4ad   : > { %s6111_s3 = sld [smem:[#allocation5 + %s985_s26]]  ;;  %s2645_s5 = scalar_lea.vmem %s5077_s23, 53 [#allocation2] }
 0x4ae   : > { %s3154_s24 = sshll.u32 %s6094_s13, 4  ;;  %s998_s14 = sshll.u32 %s2645_s5, 4  ;;  %s6118_s14 = int_to_ptr.vmem [resolvable:$true] %s998_s14 }
 0x4af   : > { %s972_s25 = scalar_lea.hbm %s6403_s1, %s3154_s24 }
 0x4b0   : > { %s4624_s29 = scalar_lea.hbm %s972_s25, 16  ;;  %p4627_p0 = scmp.lt.u32.totalorder %s972_s25, %s6403_s1 }
 0x4b1   : > { %p4625_p13 = scmp.ne.s32.totalorder %s972_s25, %s4624_s29  ;;  %p4628_p1 = scmp.lt.u32.totalorder %s5089_s9, %s4624_s29 }
 0x4b2   : > { %p4630_p3 = scmp.lt.u32.totalorder %s4624_s29, %s972_s25 }
 0x4b3   : > { %p4629_p2 = por %p4628_p1, %p4627_p0 }
 0x4b5   : > { %p4631_p4 = por %p4630_p3, %p4629_p2 }
 0x4b7   : > { %p4632_p5 = pnand %p4631_p4, %p4625_p13 }
 0x4b9   : > { %4635 = shalt.err (!%p4632_p5)  }
 0x4ba   : > { %s4636_s18 = scalar_lea.vmem %s6102_s10, 16  ;;  %p4641_p7 = scmp.lt.s32.totalorder %s6102_s10, %s5097_s15 }
 0x4bb   : > { %p4637_p6 = scmp.ne.s32.totalorder %s6102_s10, %s4636_s18  ;;  %p4642_p8 = scmp.lt.s32.totalorder %s5100_s17, %s4636_s18 }
 0x4bd   : > { %p4643_p11 = por %p4642_p8, %p4641_p7 }
 0x4bf   : > { %p4644_p12 = pnand %p4643_p11, %p4637_p6 }
 0x4c1   : > { %4647 = shalt.err (!%p4644_p12)  }
 0x4c2   : > { %984 = dma.hbm_to_vmem [thread:$0]  %s972_s25, 16, %s6102_s10, %s5082_s4 }
 0x4c3   : > { %s1002_s13 = sadd.s32 54, %s5062_s6  ;;  %s2650_s26 = scalar_lea.vmem %s5077_s23, 54 [#allocation2] }
 0x4c4   : > { %s6133_s8 = sld [smem:[#allocation5 + %s1002_s13]]  ;;  %s1015_s0 = sshll.u32 %s2650_s26, 4  ;;  %s6136_s0 = int_to_ptr.vmem [resolvable:$true] %s1015_s0 }
 0x4c5   : > { %s3156_s12 = sshll.u32 %s6111_s3, 4  ;;  %s1019_s11 = sadd.s32 55, %s5062_s6 }
 0x4c6   : > { %s989_s16 = scalar_lea.hbm %s6403_s1, %s3156_s12 }
 0x4c7   : > { %s4648_s29 = scalar_lea.hbm %s989_s16, 16  ;;  %p4651_p0 = scmp.lt.u32.totalorder %s989_s16, %s6403_s1 }
 0x4c8   : > { %p4649_p13 = scmp.ne.s32.totalorder %s989_s16, %s4648_s29  ;;  %p4652_p1 = scmp.lt.u32.totalorder %s5089_s9, %s4648_s29 }
 0x4c9   : > { %p4654_p3 = scmp.lt.u32.totalorder %s4648_s29, %s989_s16 }
 0x4ca   : > { %p4653_p2 = por %p4652_p1, %p4651_p0 }
 0x4cc   : > { %p4655_p4 = por %p4654_p3, %p4653_p2 }
 0x4ce   : > { %p4656_p5 = pnand %p4655_p4, %p4649_p13 }
 0x4d0   : > { %4659 = shalt.err (!%p4656_p5)  }
 0x4d1   : > { %s4660_s10 = scalar_lea.vmem %s6118_s14, 16  ;;  %p4665_p7 = scmp.lt.s32.totalorder %s6118_s14, %s5097_s15 }
 0x4d2   : > { %p4661_p6 = scmp.ne.s32.totalorder %s6118_s14, %s4660_s10  ;;  %p4666_p8 = scmp.lt.s32.totalorder %s5100_s17, %s4660_s10 }
 0x4d4   : > { %p4667_p11 = por %p4666_p8, %p4665_p7 }
 0x4d6   : > { %p4668_p12 = pnand %p4667_p11, %p4661_p6 }
 0x4d8   : > { %4671 = shalt.err (!%p4668_p12)  }
 0x4d9   : > { %1001 = dma.hbm_to_vmem [thread:$0]  %s989_s16, 16, %s6118_s14, %s5082_s4 }
 0x4da   : > { %s6153_s3 = sld [smem:[#allocation5 + %s1019_s11]]  ;;  %s2655_s25 = scalar_lea.vmem %s5077_s23, 55 [#allocation2] }
 0x4db   : > { %s1032_s18 = sshll.u32 %s2655_s25, 4  ;;  %s1036_s13 = sadd.s32 56, %s5062_s6  ;;  %s6158_s18 = int_to_ptr.vmem [resolvable:$true] %s1032_s18 }
 0x4dc   : > { %s3158_s26 = sshll.u32 %s6133_s8, 4  ;;  %s6163_s29 = sld [smem:[#allocation5 + %s1036_s13]] }
 0x4dd   : > { %s1006_s24 = scalar_lea.hbm %s6403_s1, %s3158_s26 }
 0x4de   : > { %s4672_s7 = scalar_lea.hbm %s1006_s24, 16  ;;  %p4675_p0 = scmp.lt.u32.totalorder %s1006_s24, %s6403_s1 }
 0x4df   : > { %p4673_p13 = scmp.ne.s32.totalorder %s1006_s24, %s4672_s7  ;;  %p4676_p1 = scmp.lt.u32.totalorder %s5089_s9, %s4672_s7 }
 0x4e0   : > { %p4678_p3 = scmp.lt.u32.totalorder %s4672_s7, %s1006_s24 }
 0x4e1   : > { %p4677_p2 = por %p4676_p1, %p4675_p0 }
 0x4e3   : > { %p4679_p4 = por %p4678_p3, %p4677_p2 }
 0x4e5   : > { %p4680_p5 = pnand %p4679_p4, %p4673_p13 }
 0x4e7   : > { %4683 = shalt.err (!%p4680_p5)  }
 0x4e8   : > { %s4684_s14 = scalar_lea.vmem %s6136_s0, 16  ;;  %p4689_p7 = scmp.lt.s32.totalorder %s6136_s0, %s5097_s15 }
 0x4e9   : > { %p4685_p6 = scmp.ne.s32.totalorder %s6136_s0, %s4684_s14  ;;  %p4690_p8 = scmp.lt.s32.totalorder %s5100_s17, %s4684_s14 }
 0x4eb   : > { %p4691_p11 = por %p4690_p8, %p4689_p7 }
 0x4ed   : > { %p4692_p12 = pnand %p4691_p11, %p4685_p6 }
 0x4ef   : > { %4695 = shalt.err (!%p4692_p12)  }
 0x4f0   : > { %1018 = dma.hbm_to_vmem [thread:$0]  %s1006_s24, 16, %s6136_s0, %s5082_s4 }
 0x4f1   : > { %s2660_s8 = scalar_lea.vmem %s5077_s23, 56 [#allocation2]  ;;  %s1053_s16 = sadd.s32 57, %s5062_s6 }
 0x4f2   : > { %s3160_s11 = sshll.u32 %s6153_s3, 4  ;;  %s1049_s25 = sshll.u32 %s2660_s8, 4  ;;  %s6182_s25 = int_to_ptr.vmem [resolvable:$true] %s1049_s25 }
 0x4f3   : > { %s1023_s12 = scalar_lea.hbm %s6403_s1, %s3160_s11 }
 0x4f4   : > { %s4696_s5 = scalar_lea.hbm %s1023_s12, 16  ;;  %p4699_p0 = scmp.lt.u32.totalorder %s1023_s12, %s6403_s1 }
 0x4f5   : > { %p4697_p13 = scmp.ne.s32.totalorder %s1023_s12, %s4696_s5  ;;  %p4700_p1 = scmp.lt.u32.totalorder %s5089_s9, %s4696_s5 }
 0x4f6   : > { %p4702_p3 = scmp.lt.u32.totalorder %s4696_s5, %s1023_s12 }
 0x4f7   : > { %p4701_p2 = por %p4700_p1, %p4699_p0 }
 0x4f9   : > { %p4703_p4 = por %p4702_p3, %p4701_p2 }
 0x4fb   : > { %p4704_p5 = pnand %p4703_p4, %p4697_p13 }
 0x4fd   : > { %4707 = shalt.err (!%p4704_p5)  }
 0x4fe   : > { %s4708_s0 = scalar_lea.vmem %s6158_s18, 16  ;;  %p4713_p7 = scmp.lt.s32.totalorder %s6158_s18, %s5097_s15 }
 0x4ff   : > { %p4709_p6 = scmp.ne.s32.totalorder %s6158_s18, %s4708_s0  ;;  %p4714_p8 = scmp.lt.s32.totalorder %s5100_s17, %s4708_s0 }
 0x501   : > { %p4715_p11 = por %p4714_p8, %p4713_p7 }
 0x503   : > { %p4716_p12 = pnand %p4715_p11, %p4709_p6 }
 0x505   : > { %4719 = shalt.err (!%p4716_p12)  }
 0x506   : > { %1035 = dma.hbm_to_vmem [thread:$0]  %s1023_s12, 16, %s6158_s18, %s5082_s4 }
 0x507   : > { %s3162_s3 = sshll.u32 %s6163_s29, 4  ;;  %s6196_s24 = sld [smem:[#allocation5 + %s1053_s16]] }
 0x508   : > { %s1040_s8 = scalar_lea.hbm %s6403_s1, %s3162_s3  ;;  %s2665_s11 = scalar_lea.vmem %s5077_s23, 57 [#allocation2] }
 0x509   : > { %s4720_s13 = scalar_lea.hbm %s1040_s8, 16  ;;  %p4723_p0 = scmp.lt.u32.totalorder %s1040_s8, %s6403_s1 }
 0x50a   : > { %p4721_p13 = scmp.ne.s32.totalorder %s1040_s8, %s4720_s13  ;;  %p4724_p1 = scmp.lt.u32.totalorder %s5089_s9, %s4720_s13 }
 0x50b   : > { %p4726_p3 = scmp.lt.u32.totalorder %s4720_s13, %s1040_s8 }
 0x50c   : > { %p4725_p2 = por %p4724_p1, %p4723_p0 }
 0x50e   : > { %p4727_p4 = por %p4726_p3, %p4725_p2 }
 0x510   : > { %p4728_p5 = pnand %p4727_p4, %p4721_p13 }
 0x512   : > { %4731 = shalt.err (!%p4728_p5)  }
 0x513   : > { %s4732_s18 = scalar_lea.vmem %s6182_s25, 16  ;;  %p4737_p7 = scmp.lt.s32.totalorder %s6182_s25, %s5097_s15 }
 0x514   : > { %p4733_p6 = scmp.ne.s32.totalorder %s6182_s25, %s4732_s18  ;;  %p4738_p8 = scmp.lt.s32.totalorder %s5100_s17, %s4732_s18 }
 0x516   : > { %p4739_p11 = por %p4738_p8, %p4737_p7 }
 0x518   : > { %p4740_p12 = pnand %p4739_p11, %p4733_p6 }
 0x51a   : > { %4743 = shalt.err (!%p4740_p12)  }
 0x51b   : > { %1052 = dma.hbm_to_vmem [thread:$0]  %s1040_s8, 16, %s6182_s25, %s5082_s4 }
 0x51c   : > { %s1066_s29 = sshll.u32 %s2665_s11, 4  ;;  %s1070_s16 = sadd.s32 58, %s5062_s6  ;;  %s1067_s29 = int_to_ptr.vmem [resolvable:$true] %s1066_s29 }
 0x51d   : > { %s6214_s12 = sld [smem:[#allocation5 + %s1070_s16]]  ;;  %s2670_s7 = scalar_lea.vmem %s5077_s23, 58 [#allocation2] }
 0x51e   : > { %s1087_s27 = sadd.s32 59, %s5062_s6  ;;  %s3164_s0 = sshll.u32 %s6196_s24, 4 }
 0x51f   : > { %s1083_s3 = sshll.u32 %s2670_s7, 4  ;;  %s1057_s13 = scalar_lea.hbm %s6403_s1, %s3164_s0  ;;  %s6222_s3 = int_to_ptr.vmem [resolvable:$true] %s1083_s3 }
 0x520   : > { %s4744_s26 = scalar_lea.hbm %s1057_s13, 16  ;;  %p4747_p0 = scmp.lt.u32.totalorder %s1057_s13, %s6403_s1 }
 0x521   : > { %p4745_p13 = scmp.ne.s32.totalorder %s1057_s13, %s4744_s26  ;;  %p4748_p1 = scmp.lt.u32.totalorder %s5089_s9, %s4744_s26 }
 0x522   : > { %p4750_p3 = scmp.lt.u32.totalorder %s4744_s26, %s1057_s13 }
 0x523   : > { %p4749_p2 = por %p4748_p1, %p4747_p0 }
 0x525   : > { %p4751_p4 = por %p4750_p3, %p4749_p2 }
 0x527   : > { %p4752_p5 = pnand %p4751_p4, %p4745_p13 }
 0x529   : > { %4755 = shalt.err (!%p4752_p5)  }
 0x52a   : > { %s4756_s25 = scalar_lea.vmem %s1067_s29, 16  ;;  %p4761_p7 = scmp.lt.s32.totalorder %s1067_s29, %s5097_s15 }
 0x52b   : > { %p4757_p6 = scmp.ne.s32.totalorder %s1067_s29, %s4756_s25  ;;  %p4762_p8 = scmp.lt.s32.totalorder %s5100_s17, %s4756_s25 }
 0x52d   : > { %p4763_p11 = por %p4762_p8, %p4761_p7 }
 0x52f   : > { %p4764_p12 = pnand %p4763_p11, %p4757_p6 }
 0x531   : > { %4767 = shalt.err (!%p4764_p12)  }
 0x532   : > { %1069 = dma.hbm_to_vmem [thread:$0]  %s1057_s13, 16, %s1067_s29, %s5082_s4 }
 0x533   : > { %s6231_s24 = sld [smem:[#allocation5 + %s1087_s27]]  ;;  %s2675_s8 = scalar_lea.vmem %s5077_s23, 59 [#allocation2] }
 0x534   : > { %s3166_s11 = sshll.u32 %s6214_s12, 4  ;;  %s1100_s16 = sshll.u32 %s2675_s8, 4  ;;  %s6238_s16 = int_to_ptr.vmem [resolvable:$true] %s1100_s16 }
 0x535   : > { %s1074_s10 = scalar_lea.hbm %s6403_s1, %s3166_s11 }
 0x536   : > { %s4768_s14 = scalar_lea.hbm %s1074_s10, 16  ;;  %p4771_p0 = scmp.lt.u32.totalorder %s1074_s10, %s6403_s1 }
 0x537   : > { %p4769_p13 = scmp.ne.s32.totalorder %s1074_s10, %s4768_s14  ;;  %p4772_p1 = scmp.lt.u32.totalorder %s5089_s9, %s4768_s14 }
 0x538   : > { %p4774_p3 = scmp.lt.u32.totalorder %s4768_s14, %s1074_s10 }
 0x539   : > { %p4773_p2 = por %p4772_p1, %p4771_p0 }
 0x53b   : > { %p4775_p4 = por %p4774_p3, %p4773_p2 }
 0x53d   : > { %p4776_p5 = pnand %p4775_p4, %p4769_p13 }
 0x53f   : > { %4779 = shalt.err (!%p4776_p5)  }
 0x540   : > { %s4780_s29 = scalar_lea.vmem %s6222_s3, 16  ;;  %p4785_p7 = scmp.lt.s32.totalorder %s6222_s3, %s5097_s15 }
 0x541   : > { %p4781_p6 = scmp.ne.s32.totalorder %s6222_s3, %s4780_s29  ;;  %p4786_p8 = scmp.lt.s32.totalorder %s5100_s17, %s4780_s29 }
 0x543   : > { %p4787_p11 = por %p4786_p8, %p4785_p7 }
 0x545   : > { %p4788_p12 = pnand %p4787_p11, %p4781_p6 }
 0x547   : > { %4791 = shalt.err (!%p4788_p12)  }
 0x548   : > { %1086 = dma.hbm_to_vmem [thread:$0]  %s1074_s10, 16, %s6222_s3, %s5082_s4 }
 0x549   : > { %s1104_s12 = sadd.s32 60, %s5062_s6  ;;  %s2680_s27 = scalar_lea.vmem %s5077_s23, 60 [#allocation2] }
 0x54a   : > { %s6253_s13 = sld [smem:[#allocation5 + %s1104_s12]]  ;;  %s1117_s18 = sshll.u32 %s2680_s27, 4  ;;  %s6256_s18 = int_to_ptr.vmem [resolvable:$true] %s1117_s18 }
 0x54b   : > { %s3168_s25 = sshll.u32 %s6231_s24, 4  ;;  %s1121_s0 = sadd.s32 61, %s5062_s6 }
 0x54c   : > { %s1091_s7 = scalar_lea.hbm %s6403_s1, %s3168_s25 }
 0x54d   : > { %s4792_s14 = scalar_lea.hbm %s1091_s7, 16  ;;  %p4795_p0 = scmp.lt.u32.totalorder %s1091_s7, %s6403_s1 }
 0x54e   : > { %p4793_p13 = scmp.ne.s32.totalorder %s1091_s7, %s4792_s14  ;;  %p4796_p1 = scmp.lt.u32.totalorder %s5089_s9, %s4792_s14 }
 0x54f   : > { %p4798_p3 = scmp.lt.u32.totalorder %s4792_s14, %s1091_s7 }
 0x550   : > { %p4797_p2 = por %p4796_p1, %p4795_p0 }
 0x552   : > { %p4799_p4 = por %p4798_p3, %p4797_p2 }
 0x554   : > { %p4800_p5 = pnand %p4799_p4, %p4793_p13 }
 0x556   : > { %4803 = shalt.err (!%p4800_p5)  }
 0x557   : > { %s4804_s3 = scalar_lea.vmem %s6238_s16, 16  ;;  %p4809_p7 = scmp.lt.s32.totalorder %s6238_s16, %s5097_s15 }
 0x558   : > { %p4805_p6 = scmp.ne.s32.totalorder %s6238_s16, %s4804_s3  ;;  %p4810_p8 = scmp.lt.s32.totalorder %s5100_s17, %s4804_s3 }
 0x55a   : > { %p4811_p11 = por %p4810_p8, %p4809_p7 }
 0x55c   : > { %p4812_p12 = pnand %p4811_p11, %p4805_p6 }
 0x55e   : > { %4815 = shalt.err (!%p4812_p12)  }
 0x55f   : > { %1103 = dma.hbm_to_vmem [thread:$0]  %s1091_s7, 16, %s6238_s16, %s5082_s4 }
 0x560   : > { %s6273_s24 = sld [smem:[#allocation5 + %s1121_s0]]  ;;  %s2685_s10 = scalar_lea.vmem %s5077_s23, 61 [#allocation2] }
 0x561   : > { %s1134_s29 = sshll.u32 %s2685_s10, 4  ;;  %s1138_s12 = sadd.s32 62, %s5062_s6  ;;  %s6278_s29 = int_to_ptr.vmem [resolvable:$true] %s1134_s29 }
 0x562   : > { %s3170_s27 = sshll.u32 %s6253_s13, 4  ;;  %s6283_s14 = sld [smem:[#allocation5 + %s1138_s12]] }
 0x563   : > { %s1108_s11 = scalar_lea.hbm %s6403_s1, %s3170_s27 }
 0x564   : > { %s4816_s26 = scalar_lea.hbm %s1108_s11, 16  ;;  %p4819_p0 = scmp.lt.u32.totalorder %s1108_s11, %s6403_s1 }
 0x565   : > { %p4817_p13 = scmp.ne.s32.totalorder %s1108_s11, %s4816_s26  ;;  %p4820_p1 = scmp.lt.u32.totalorder %s5089_s9, %s4816_s26 }
 0x566   : > { %p4822_p3 = scmp.lt.u32.totalorder %s4816_s26, %s1108_s11 }
 0x567   : > { %p4821_p2 = por %p4820_p1, %p4819_p0 }
 0x569   : > { %p4823_p4 = por %p4822_p3, %p4821_p2 }
 0x56b   : > { %p4824_p5 = pnand %p4823_p4, %p4817_p13 }
 0x56d   : > { %4827 = shalt.err (!%p4824_p5)  }
 0x56e   : > { %s4828_s16 = scalar_lea.vmem %s6256_s18, 16  ;;  %p4833_p7 = scmp.lt.s32.totalorder %s6256_s18, %s5097_s15 }
 0x56f   : > { %p4829_p6 = scmp.ne.s32.totalorder %s6256_s18, %s4828_s16  ;;  %p4834_p8 = scmp.lt.s32.totalorder %s5100_s17, %s4828_s16 }
 0x571   : > { %p4835_p11 = por %p4834_p8, %p4833_p7 }
 0x573   : > { %p4836_p12 = pnand %p4835_p11, %p4829_p6 }
 0x575   : > { %4839 = shalt.err (!%p4836_p12)  }
 0x576   : > { %1120 = dma.hbm_to_vmem [thread:$0]  %s1108_s11, 16, %s6256_s18, %s5082_s4 }
 0x577   : > { %s2690_s13 = scalar_lea.vmem %s5077_s23, 62 [#allocation2]  ;;  %s1155_s7 = sadd.s32 63, %s5062_s6 }
 0x578   : > { %s3172_s0 = sshll.u32 %s6273_s24, 4  ;;  %s1151_s10 = sshll.u32 %s2690_s13, 4  ;;  %s6302_s10 = int_to_ptr.vmem [resolvable:$true] %s1151_s10 }
 0x579   : > { %s1125_s25 = scalar_lea.hbm %s6403_s1, %s3172_s0 }
 0x57a   : > { %s4840_s8 = scalar_lea.hbm %s1125_s25, 16  ;;  %p4843_p0 = scmp.lt.u32.totalorder %s1125_s25, %s6403_s1 }
 0x57b   : > { %p4841_p13 = scmp.ne.s32.totalorder %s1125_s25, %s4840_s8  ;;  %p4844_p1 = scmp.lt.u32.totalorder %s5089_s9, %s4840_s8 }
 0x57c   : > { %p4846_p3 = scmp.lt.u32.totalorder %s4840_s8, %s1125_s25 }
 0x57d   : > { %p4845_p2 = por %p4844_p1, %p4843_p0 }
 0x57f   : > { %p4847_p4 = por %p4846_p3, %p4845_p2 }
 0x581   : > { %p4848_p5 = pnand %p4847_p4, %p4841_p13 }
 0x583   : > { %4851 = shalt.err (!%p4848_p5)  }
 0x584   : > { %s4852_s6 = scalar_lea.vmem %s6278_s29, 16  ;;  %p4857_p7 = scmp.lt.s32.totalorder %s6278_s29, %s5097_s15 }
 0x585   : > { %p4853_p6 = scmp.ne.s32.totalorder %s6278_s29, %s4852_s6  ;;  %p4858_p8 = scmp.lt.s32.totalorder %s5100_s17, %s4852_s6 }
 0x587   : > { %p4859_p11 = por %p4858_p8, %p4857_p7 }
 0x589   : > { %p4860_p12 = pnand %p4859_p11, %p4853_p6 }
 0x58b   : > { %4863 = shalt.err (!%p4860_p12)  }
 0x58c   : > { %1137 = dma.hbm_to_vmem [thread:$0]  %s1125_s25, 16, %s6278_s29, %s5082_s4 }
 0x58d   : > { %s3174_s18 = sshll.u32 %s6283_s14, 4  ;;  %s1156_s24 = sld [smem:[#allocation5 + %s1155_s7]] }
 0x58e   : > { %s1142_s16 = scalar_lea.hbm %s6403_s1, %s3174_s18  ;;  %s2695_s13 = scalar_lea.vmem %s5077_s23, 63 [#allocation2] }
 0x58f   : > { %s4864_s0 = scalar_lea.hbm %s1142_s16, 16  ;;  %p4867_p0 = scmp.lt.u32.totalorder %s1142_s16, %s6403_s1 }
 0x590   : > { %p4865_p13 = scmp.ne.s32.totalorder %s1142_s16, %s4864_s0  ;;  %p4868_p1 = scmp.lt.u32.totalorder %s5089_s9, %s4864_s0 }
 0x591   : > { %p4870_p3 = scmp.lt.u32.totalorder %s4864_s0, %s1142_s16 }
 0x592   : > { %p4869_p2 = por %p4868_p1, %p4867_p0 }
 0x594   : > { %p4871_p4 = por %p4870_p3, %p4869_p2 }
 0x596   : > { %p4872_p5 = pnand %p4871_p4, %p4865_p13 }
 0x598   : > { %4875 = shalt.err (!%p4872_p5)  }
 0x599   : > { %s4876_s29 = scalar_lea.vmem %s6302_s10, 16  ;;  %p4881_p7 = scmp.lt.s32.totalorder %s6302_s10, %s5097_s15 }
 0x59a   : > { %p4877_p6 = scmp.ne.s32.totalorder %s6302_s10, %s4876_s29  ;;  %p4882_p8 = scmp.lt.s32.totalorder %s5100_s17, %s4876_s29 }
 0x59c   : > { %p4883_p11 = por %p4882_p8, %p4881_p7 }
 0x59e   : > { %p4884_p12 = pnand %p4883_p11, %p4877_p6 }
 0x5a0   : > { %4887 = shalt.err (!%p4884_p12)  }
 0x5a1   : > { %1154 = dma.hbm_to_vmem [thread:$0]  %s1142_s16, 16, %s6302_s10, %s5082_s4 }
 0x5a2   : > { %s1168_s14 = sshll.u32 %s2695_s13, 4  ;;  %s3176_s7 = sshll.u32 %s1156_s24, 4  ;;  %s1169_s14 = int_to_ptr.vmem [resolvable:$true] %s1168_s14 }
 0x5a3   : > { %s1159_s26 = scalar_lea.hbm %s6403_s1, %s3176_s7 }
 0x5a4   : > { %s4888_s5 = scalar_lea.hbm %s1159_s26, 16  ;;  %p4891_p0 = scmp.lt.u32.totalorder %s1159_s26, %s6403_s1 }
 0x5a5   : > { %p4889_p13 = scmp.ne.s32.totalorder %s1159_s26, %s4888_s5  ;;  %p4892_p1 = scmp.lt.u32.totalorder %s5089_s9, %s4888_s5 }
 0x5a6   : > { %p4894_p3 = scmp.lt.u32.totalorder %s4888_s5, %s1159_s26 }
 0x5a7   : > { %p4893_p2 = por %p4892_p1, %p4891_p0 }
 0x5a9   : > { %p4895_p4 = por %p4894_p3, %p4893_p2 }
 0x5ab   : > { %p4896_p5 = pnand %p4895_p4, %p4889_p13 }
 0x5ad   : > { %4899 = shalt.err (!%p4896_p5)  }
 0x5ae   : > { %s4900_s10 = scalar_lea.vmem %s1169_s14, 16  ;;  %p4905_p7 = scmp.lt.s32.totalorder %s1169_s14, %s5097_s15 }
 0x5af   : > { %p4901_p6 = scmp.ne.s32.totalorder %s1169_s14, %s4900_s10  ;;  %p4906_p8 = scmp.lt.s32.totalorder %s5100_s17, %s4900_s10 }
 0x5b1   : > { %p4907_p11 = por %p4906_p8, %p4905_p7 }
 0x5b3   : > { %p4908_p12 = pnand %p4907_p11, %p4901_p6 }
 0x5b5   : > { %4911 = shalt.err (!%p4908_p12)  }
 0x5b6   : > { %1171 = dma.hbm_to_vmem [thread:$0]  %s1159_s26, 16, %s1169_s14, %s5082_s4 }
 0x5b7   : > { %s63_s24 = scalar_lea.vmem [#allocation6], %s5057_s30 }
 0x5b8   : > { %4958 = dma.done.wait %s5082_s4, 1024 }
 0x5b9   : > { %4959 = vsyncadd %s5082_s4, 4294966272  ;;  %v2297_v0 = vld [vmem:[%s5077_s23] sm:$0xff]  ;;  %v2298_v1 = vld [vmem:[%s5077_s23 + $0x8] sm:$0xff]  ;;  %s3323_s9 = sshll.u32 %s4974_s21, 10  ;;  %s2336_s15 = sshll.u32 %s63_s24, 4  ;;  %s6358_s15 = int_to_ptr.vmem [resolvable:$true] %s2336_s15 }
 0x5ba   : > { %v2299_v2 = vld [vmem:[%s5077_s23 + $0x10] sm:$0xff]  ;;  %v2305_v3 = vmul.f32 11.313708, %v2297_v0  ;;  %v2306_v4 = vmul.f32 11.313708, %v2298_v1  ;;  %v2300_v6 = vld [vmem:[%s5077_s23 + $0x18] sm:$0xff]  ;;  %s6356_s21 = scalar_lea.hbm %s6404_s2, %s3323_s9 }
 0x5bb   : > { %v2307_v5 = vmul.f32 11.313708, %v2299_v2  ;;  %v2301_v7 = vld [vmem:[%s5077_s23 + $0x20] sm:$0xff]  ;;  %v2302_v8 = vld [vmem:[%s5077_s23 + $0x28] sm:$0xff]  ;;  %v2308_v9 = vmul.f32 11.313708, %v2300_v6 }
 0x5bc   : > { %2313 = vst [vmem:[%s63_s24] sm:$0xff] %v2305_v3  ;;  %2314 = vst [vmem:[%s63_s24 + $0x8] sm:$0xff] %v2306_v4  ;;  %v2309_v10 = vmul.f32 11.313708, %v2301_v7  ;;  %v2310_v11 = vmul.f32 11.313708, %v2302_v8  ;;  %v2303_v12 = vld [vmem:[%s5077_s23 + $0x30] sm:$0xff] }
 0x5bd   : > { %2315 = vst [vmem:[%s63_s24 + $0x10] sm:$0xff] %v2307_v5  ;;  %v2304_v13 = vld [vmem:[%s5077_s23 + $0x38] sm:$0xff]  ;;  %2316 = vst [vmem:[%s63_s24 + $0x18] sm:$0xff] %v2308_v9  ;;  %v2311_v14 = vmul.f32 11.313708, %v2303_v12  ;;  %s6414_s17 = sand.u32 1, %s4970_s20  }
 0x5be   : > { %2317 = vst [vmem:[%s63_s24 + $0x20] sm:$0xff] %v2309_v10  ;;  %2318 = vst [vmem:[%s63_s24 + $0x28] sm:$0xff] %v2310_v11  ;;  %v2312_v15 = vmul.f32 11.313708, %v2304_v13  ;;  %s6362_s11 = scalar_lea.sflag [#allocation7], %s6414_s17  ;;  %s4912_s23 = scalar_lea.vmem %s6358_s15, 1024 }
 0x5bf   : > { %2319 = vst [vmem:[%s63_s24 + $0x30] sm:$0xff] %v2311_v14  ;;  %p4913_p13 = scmp.ne.s32.totalorder %s6358_s15, %s4912_s23  ;;  %s4982_s3 = smov [#allocation6]  }
 0x5c0   : > { %2320 = vst [vmem:[%s63_s24 + $0x38] sm:$0xff] %v2312_v15  ;;  %s4916_s16 = sshll.u32 %s4982_s3, 4  ;;  %s4917_s16 = int_to_ptr.vmem [resolvable:$false] %s4916_s16 }
 0x5c1   : > { %p4914_p0 = pnand %p4913_p13, %p5049_p10  ;;  %s4918_s13 = scalar_lea.vmem %s4917_s16, 2048 }
 0x5c2   : > { %p4919_p2 = scmp.lt.s32.totalorder %s6358_s15, %s4917_s16  ;;  %p4920_p3 = scmp.lt.s32.totalorder %s4918_s13, %s4912_s23 }
 0x5c3   : > { %p4915_p1 = pneg %p4914_p0 }
 0x5c4   : > { %p4921_p4 = por %p4920_p3, %p4919_p2 }
 0x5c6   : > { %p4922_p5 = pnand %p4921_p4, %p4915_p1 }
 0x5c8   : > { %4925 = shalt.err (!%p4922_p5)
}
 0x5c9   : > { %s4926_s0 = scalar_lea.hbm %s6356_s21, 1024  ;;  %s4930_s29 = scalar_lea.hbm %s6404_s2, 2048 }
 0x5ca   : > { %p4927_p6 = scmp.ne.s32.totalorder %s6356_s21, %s4926_s0  ;;  %p4931_p11 = scmp.lt.u32.totalorder %s6356_s21, %s6404_s2 }
 0x5cb   : > { %p4932_p12 = scmp.lt.u32.totalorder %s4930_s29, %s4926_s0  ;;  %p4934_p0 = scmp.lt.u32.totalorder %s4926_s0, %s6356_s21 }
 0x5cc   : > { %p4928_p7 = pnand %p4927_p6, %p5049_p10 }
 0x5cd   : > { %p4933_p13 = por %p4932_p12, %p4931_p11 }
 0x5ce   : > { %p4929_p8 = pneg %p4928_p7 }
 0x5cf   : > { %p4935_p1 = por %p4934_p0, %p4933_p13 }
 0x5d1   : > { %p4936_p2 = pnand %p4935_p1, %p4929_p8 }
 0x5d3   : > { %4939 = shalt.err (!%p4936_p2)
}
 0x5d4   : > { %s4983_s25 = smov 128   ;;  %s4984_s8 = smov 8  }
 0x5d5   : > { %3324 = dma.vmem_to_hbm [thread:$0]  (%p5049_p10), %s6358_s15, 1024, %s6356_s21, %s6362_s11, %s4983_s25, %s4983_s25, %s4984_s8  }
 0x5d6 PF: > { %p3330_p3 = scmp.ge.s32.totalorder %s4978_s22, 1  ;;  %s2351_s5 = sand.u32 1, %s4966_s19  }
 0x5d7   : > { %s2352_s6 = scalar_lea.sflag [#allocation7], %s2351_s5 }
 0x5d8   : > { %p3327_p4 = pnand %p3330_p3, %p5042_p9 }
 0x5da   : > { %4961 = dma.done.wait (!%p3327_p4), %s2352_s6, 1024  }
 0x5db   : > { %4963 = vsyncadd (!%p3327_p4), %s2352_s6, 4294966272  ;;  %s19_s22 = sadd.s32 1, %s4978_s22   ;;  %s6416_s18 = sld [smem:[#allocation271_spill]] }
 0x5dc   : > { %p16_p5 = scmp.ge.s32.totalorder %s19_s22, 3   ;;  %s6417_s21 = sld [smem:[#allocation269_spill]] }
 0x5dd   : > { %s6418_s19 = smov %s4970_s20 }
 0x5de   :  { %18 = sbr.rel (!%p16_p5) target bundleno = 15 (0xf), region = 825 }
 0x5e1   : > { %s6419_s20 = smov %s6416_s18 }
 0x5e5   :  { %2357 = vsyncpa [#allocation7], 1 }
 0x5e6   :  { %2359 = vsyncpa [#allocation7 + $0x1], 1 }
 0x5e7   :  { %2360 = vsyncmov [#allocation3] }
 0x5ea   :  { %s2361_s28 = vpop.sfrf %2360 }
 0x5eb   :  { %p3319_p9 = scmp.ne.s32.totalorder %s2361_s28, 0 }
 0x5ed   :  { %2365 = shalt.err (%p3319_p9)  }
 0x5ee   :  { %2367 = vsyncmov [#allocation3 + $0x1] }
 0x5f1   :  { %s2368_s10 = vpop.sfrf %2367 }
 0x5f2   :  { %p3320_p10 = scmp.ne.s32.totalorder %s2368_s10, 0 }
 0x5f4   :  { %2372 = shalt.err (%p3320_p10)  }

</bundles_post_ra>
